<compile_context>
chip_gen: v5e
topology: v5e:2x2
jax: 0.10.0
libtpu: 0.0.40
codegen_flags: <defaults>
</compile_context>

<pallas_src>
import jax
import jax.numpy as jnp
import numpy as np
from jax.experimental import pallas as pl
from jax.experimental.pallas import tpu as pltpu


def _round_up(x, m):
    return ((x + m - 1) // m) * m


def _vmem_budget_bytes():
    """Per-chip VMEM budget (narrow probe; falls back to a v7x-safe default)."""
    try:
        cap = pltpu.get_tpu_info().vmem_capacity_bytes
    except Exception:  # hardware query unavailable -> conservative (v7x-sized) default
        cap = 64 * 1024 * 1024
    return min(int(cap * 0.875), 112 * 1024 * 1024)


def _lstm_vmem_bytes(t_chunk, B, H_pad, D, mm_bytes):
    """Rough VMEM footprint of one grid step (double-buffered blocks + scratch)."""
    rows = t_chunk * B
    return (
        2 * rows * H_pad * mm_bytes          # embedded-input block (double buffered)
        + 2 * rows * D * 4                   # output block (double buffered)
        + rows * 4 * H_pad * 4               # xg scratch (f32)
        + rows * H_pad * mm_bytes            # h-chunk scratch
        + 2 * 2 * H_pad * 4 * H_pad * mm_bytes  # W_ih^T, W_hh^T (double buffered)
        + 2 * H_pad * D * mm_bytes           # W_out^T (double buffered)
        + 2 * 2 * B * H_pad * 4              # h0, c0 input blocks
        + 2 * 2 * B * H_pad * 4              # h_n, c_n resident output blocks
        + 8 * B * H_pad * 4                  # in-flight gates / h / c working set
        + 2 * (4 * H_pad + D) * 4            # biases
    )


def _pick_t_chunk(T, B, H_pad, D, mm_bytes, budget, cap=32):
    """Largest multiple-of-8 time chunk (<= cap) that fits the VMEM budget."""
    tc = _round_up(min(cap, _round_up(T, 8)), 8)
    while tc > 8 and _lstm_vmem_bytes(tc, B, H_pad, D, mm_bytes) > 0.8 * budget:
        tc -= 8
    return tc


# ---------------------------------------------------------------------------
# Fused kernel: input projection (prologue) + LSTM recurrence + out_proj (epilogue)
# ---------------------------------------------------------------------------
def _make_decoder_kernel(T, t_chunk, B, H_pad, D, needs_mask, matmul_dtype):
    def kernel(emb_ref, h0_ref, c0_ref, wih_t_ref, bias_ref, whh_t_ref,
               wout_t_ref, bout_ref,
               out_ref, h_n_ref, c_n_ref,
               xg_ref, hbuf_ref):
        t_blk = pl.program_id(0)

        @pl.when(t_blk == 0)
        def _():
            h_n_ref[...] = h0_ref[...]
            c_n_ref[...] = c0_ref[...]

        # ---- chunk prologue: fused input projection (one big-M MXU matmul) ----
        xg_ref[...] = (
            jnp.dot(emb_ref[...], wih_t_ref[...],
                    preferred_element_type=jnp.float32)
            + bias_ref[...])

        # (h, c) carried in the constant-index output blocks (VMEM-resident
        # across the sequential time axis).
        h = h_n_ref[...]
        c = c_n_ref[...]
        whh_t = whh_t_ref[...]

        # ---- serial LSTM recurrence over the chunk (static unroll) ----
        for tt in range(t_chunk):
            gates = (xg_ref[pl.ds(tt * B, B), :]
                     + jnp.dot(h.astype(matmul_dtype), whh_t,
                               preferred_element_type=jnp.float32))
            i_g = jax.nn.sigmoid(gates[:, 0 * H_pad:1 * H_pad])
            f_g = jax.nn.sigmoid(gates[:, 1 * H_pad:2 * H_pad])
            g_g = jnp.tanh(gates[:, 2 * H_pad:3 * H_pad])
            o_g = jax.nn.sigmoid(gates[:, 3 * H_pad:4 * H_pad])
            c_new = f_g * c + i_g * g_g
            h_new = o_g * jnp.tanh(c_new)
            if needs_mask:  # only traced when T is not a multiple of t_chunk
                valid = (t_blk * t_chunk + tt) < T
                h_new = jnp.where(valid, h_new, h)
                c_new = jnp.where(valid, c_new, c)
            h, c = h_new, c_new
            hbuf_ref[pl.ds(tt * B, B), :] = h.astype(hbuf_ref.dtype)

        h_n_ref[...] = h
        c_n_ref[...] = c

        # ---- chunk epilogue: fused output projection (one big-M MXU matmul) ----
        out_ref[...] = (
            jnp.dot(hbuf_ref[...], wout_t_ref[...],
                    preferred_element_type=jnp.float32)
            + bout_ref[...]).astype(out_ref.dtype)

    return kernel


# ---------------------------------------------------------------------------
# Wrapper
# ---------------------------------------------------------------------------
def decoder_rnnt_forward(inputs, params, input_lengths=None, hidden_states=None,
                         *, matmul_dtype=jnp.float32):
    """inputs: int (B, T). Returns (outputs (B,T,D), (h_n (1,B,H), c_n (1,B,H)))."""
    if input_lengths is not None:
        # TODO(synk): pack_padded_sequence path not implemented (dense path only).
        raise NotImplementedError("input_lengths path is not implemented")

    emb = params["embedding"]              # (num_classes, H)
    w_ih, w_hh = params["w_ih"], params["w_hh"]        # (4H, H)
    b_ih, b_hh = params["b_ih"], params["b_hh"]        # (4H,)
    w_out, b_out = params["w_out"], params["b_out"]    # (D, H), (D,)

    H = w_hh.shape[1]
    D = w_out.shape[0]
    B, T = inputs.shape
    H_pad = _round_up(H, 128)              # lane-aligned gate blocks / state
    mm_bytes = jnp.dtype(matmul_dtype).itemsize

    # ---- weight / table repacking (gate-blocked, lane-padded, matmul dtype) ----
    def pack_gate_matrix(w):               # (4H, H) -> (H_pad, 4*H_pad) == padded w.T
        w4 = w.reshape(4, H, H)
        w4 = jnp.pad(w4, ((0, 0), (0, H_pad - H), (0, H_pad - H)))
        return jnp.transpose(w4, (2, 0, 1)).reshape(H_pad, 4 * H_pad)

    wih_t = pack_gate_matrix(w_ih).astype(matmul_dtype)
    whh_t = pack_gate_matrix(w_hh).astype(matmul_dtype)
    bias = jnp.pad((b_ih + b_hh).reshape(4, H), ((0, 0), (0, H_pad - H)))
    bias = bias.reshape(1, 4 * H_pad).astype(jnp.float32)
    wout_t = jnp.pad(jnp.transpose(w_out), ((0, H_pad - H), (0, 0))).astype(matmul_dtype)
    bout = b_out.reshape(1, D).astype(jnp.float32)
    emb_tbl = jnp.pad(emb, ((0, 0), (0, H_pad - H))).astype(matmul_dtype)

    # ---- initial (h, c) state (like nn.LSTM: zeros when not provided) ----
    if hidden_states is None:
        h0 = jnp.zeros((B, H_pad), jnp.float32)
        c0 = jnp.zeros((B, H_pad), jnp.float32)
    else:
        h0_in, c0_in = hidden_states
        h0 = jnp.pad(h0_in.reshape(B, H).astype(jnp.float32), ((0, 0), (0, H_pad - H)))
        c0 = jnp.pad(c0_in.reshape(B, H).astype(jnp.float32), ((0, 0), (0, H_pad - H)))

    # ---- chunk sizing from the per-chip VMEM budget ----
    budget = _vmem_budget_bytes()
    t_chunk = _pick_t_chunk(T, B, H_pad, D, mm_bytes, budget)
    T_pad = _round_up(T, t_chunk)
    needs_mask = (T_pad != T)
    n_t = T_pad // t_chunk
    rows = t_chunk * B

    # ---- embedding gather (XLA glue), time-major, flattened to rows ----
    ids_tm = jnp.transpose(inputs.astype(jnp.int32))        # (T, B)
    if T_pad != T:
        ids_tm = jnp.pad(ids_tm, ((0, T_pad - T), (0, 0)))   # pad tiny int ids only
    embedded = jnp.take(emb_tbl, ids_tm.reshape(T_pad * B), axis=0)   # (T_pad*B, H_pad)

    kernel = _make_decoder_kernel(T, t_chunk, B, H_pad, D, needs_mask, matmul_dtype)

    grid_spec = pltpu.PrefetchScalarGridSpec(
        num_scalar_prefetch=0,
        grid=(n_t,),
        in_specs=[
            pl.BlockSpec((rows, H_pad), lambda t: (t, 0)),       # embedded chunk
            pl.BlockSpec((B, H_pad), lambda t: (0, 0)),          # h0
            pl.BlockSpec((B, H_pad), lambda t: (0, 0)),          # c0
            pl.BlockSpec((H_pad, 4 * H_pad), lambda t: (0, 0)),  # W_ih^T (invariant)
            pl.BlockSpec((1, 4 * H_pad), lambda t: (0, 0)),      # b_ih + b_hh
            pl.BlockSpec((H_pad, 4 * H_pad), lambda t: (0, 0)),  # W_hh^T (invariant)
            pl.BlockSpec((H_pad, D), lambda t: (0, 0)),          # W_out^T (invariant)
            pl.BlockSpec((1, D), lambda t: (0, 0)),              # b_out
        ],
        out_specs=[
            pl.BlockSpec((rows, D), lambda t: (t, 0)),           # outputs chunk
            pl.BlockSpec((B, H_pad), lambda t: (0, 0)),          # h_n (state carrier)
            pl.BlockSpec((B, H_pad), lambda t: (0, 0)),          # c_n (state carrier)
        ],
        scratch_shapes=[
            pltpu.VMEM((rows, 4 * H_pad), jnp.float32),          # xg chunk
            pltpu.VMEM((rows, H_pad), matmul_dtype),             # h chunk (for epilogue)
        ],
    )

    out_flat, h_n, c_n = pl.pallas_call(
        kernel,
        out_shape=(
            jax.ShapeDtypeStruct((T_pad * B, D), jnp.float32),
            jax.ShapeDtypeStruct((B, H_pad), jnp.float32),
            jax.ShapeDtypeStruct((B, H_pad), jnp.float32),
        ),
        grid_spec=grid_spec,
        compiler_params=pltpu.CompilerParams(
            dimension_semantics=("arbitrary",),
            vmem_limit_bytes=int(budget),
        ),
    )(embedded, h0, c0, wih_t, bias, whh_t, wout_t, bout)

    # (T_pad*B, D) -> (B, T, D); the tail slice fuses into the transpose copy.
    outputs = jnp.transpose(out_flat.reshape(T_pad, B, D)[:T], (1, 0, 2))
    hidden_out = (h_n[:, :H][None], c_n[:, :H][None])  # (1, B, H) each, like nn.LSTM
    return outputs, hidden_out


# ---------------------------------------------------------------------------
# Pure-JAX reference (mirrors the PyTorch forward, input_lengths=None path)
# ---------------------------------------------------------------------------
def _reference_forward(inputs, params):
    emb = params["embedding"]
    w_ih, w_hh = params["w_ih"], params["w_hh"]
    b_ih, b_hh = params["b_ih"], params["b_hh"]
    w_out, b_out = params["w_out"], params["b_out"]

    x = jnp.take(emb, inputs, axis=0)              # (B, T, H)
    B, T, H = x.shape

    def step(carry, xt):
        h, c = carry
        gates = xt @ w_ih.T + b_ih + h @ w_hh.T + b_hh
        i, f, g, o = jnp.split(gates, 4, axis=-1)
        i, f, o = jax.nn.sigmoid(i), jax.nn.sigmoid(f), jax.nn.sigmoid(o)
        g = jnp.tanh(g)
        c = f * c + i * g
        h = o * jnp.tanh(c)
        return (h, c), h

    init = (jnp.zeros((B, H), jnp.float32), jnp.zeros((B, H), jnp.float32))
    (h_n, c_n), hs = jax.lax.scan(step, init, jnp.transpose(x, (1, 0, 2)))
    outs = hs @ w_out.T + b_out                    # (T, B, D)
    return jnp.transpose(outs, (1, 0, 2)), (h_n[None], c_n[None])


def make_params(key, num_classes, hidden_state_dim, output_dim):
    H, D = hidden_state_dim, output_dim
    ks = jax.random.split(key, 7)
    k_lstm = 1.0 / np.sqrt(H)
    k_lin = 1.0 / np.sqrt(H)
    return {
        "embedding": jax.random.normal(ks[0], (num_classes, H), jnp.float32),
        "w_ih": jax.random.uniform(ks[1], (4 * H, H), jnp.float32, -k_lstm, k_lstm),
        "w_hh": jax.random.uniform(ks[2], (4 * H, H), jnp.float32, -k_lstm, k_lstm),
        "b_ih": jax.random.uniform(ks[3], (4 * H,), jnp.float32, -k_lstm, k_lstm),
        "b_hh": jax.random.uniform(ks[4], (4 * H,), jnp.float32, -k_lstm, k_lstm),
        "w_out": jax.random.uniform(ks[5], (D, H), jnp.float32, -k_lin, k_lin),
        "b_out": jax.random.uniform(ks[6], (D,), jnp.float32, -k_lin, k_lin),
    }


if __name__ == "__main__":
    num_classes = 16
    hidden_state_dim = 32
    output_dim = 32
    batch, seq = 2, 8

    key = jax.random.PRNGKey(0)
    k_tok, k_par = jax.random.split(key)
    params = make_params(k_par, num_classes, hidden_state_dim, output_dim)
    inputs = jax.random.randint(k_tok, (batch, seq), 0, num_classes, dtype=jnp.int32)

    ref_out, (ref_h, ref_c) = _reference_forward(inputs, params)

    # f32 matmul path: matches the PyTorch/JAX f32 reference closely.
    outputs, (h_n, c_n) = decoder_rnnt_forward(inputs, params)
    jax.block_until_ready((outputs, h_n, c_n))
    np.testing.assert_allclose(np.asarray(outputs), np.asarray(ref_out), atol=1e-4, rtol=1e-4)
    np.testing.assert_allclose(np.asarray(h_n), np.asarray(ref_h), atol=1e-4, rtol=1e-4)
    np.testing.assert_allclose(np.asarray(c_n), np.asarray(ref_c), atol=1e-4, rtol=1e-4)

    # bf16 matmul operands (f32 accumulation / gate math): the fast configuration.
    outputs_bf, (h_bf, c_bf) = decoder_rnnt_forward(inputs, params,
                                                    matmul_dtype=jnp.bfloat16)
    jax.block_until_ready((outputs_bf, h_bf, c_bf))
    np.testing.assert_allclose(np.asarray(outputs_bf), np.asarray(ref_out),
                               atol=5e-2, rtol=5e-2)

    print("KERNEL_OK")
</pallas_src>

<mosaic_0001>
module attributes {stable_mosaic.version = 11 : i64} {
  func.func @kernel(%arg0: i32, %arg1: memref<16x128xf32, #tpu.memory_space<vmem>>, %arg2: memref<2x128xf32, #tpu.memory_space<vmem>>, %arg3: memref<2x128xf32, #tpu.memory_space<vmem>>, %arg4: memref<128x512xf32, #tpu.memory_space<vmem>>, %arg5: memref<1x512xf32, #tpu.memory_space<vmem>>, %arg6: memref<128x512xf32, #tpu.memory_space<vmem>>, %arg7: memref<128x32xf32, #tpu.memory_space<vmem>>, %arg8: memref<1x32xf32, #tpu.memory_space<vmem>>, %arg9: memref<16x32xf32, #tpu.memory_space<vmem>>, %arg10: memref<2x128xf32, #tpu.memory_space<vmem>>, %arg11: memref<2x128xf32, #tpu.memory_space<vmem>>, %arg12: memref<16x512xf32, #tpu.memory_space<vmem>>, %arg13: memref<16x128xf32, #tpu.memory_space<vmem>>) attributes {dimension_semantics = [#tpu.dimension_semantics<arbitrary>], iteration_bounds = array<i64: 1>, scalar_prefetch = 0 : i64, scratch_operands = 2 : i64, tpu.core_type = #tpu.core_type<tc>, window_params = [{transform_indices = @transform_0, window_bounds = array<i64: 16, 128>}, {pipeline_mode = #tpu.pipeline_mode<synchronous>, transform_indices = @transform_1, window_bounds = array<i64: 2, 128>}, {pipeline_mode = #tpu.pipeline_mode<synchronous>, transform_indices = @transform_2, window_bounds = array<i64: 2, 128>}, {pipeline_mode = #tpu.pipeline_mode<synchronous>, transform_indices = @transform_3, window_bounds = array<i64: 128, 512>}, {pipeline_mode = #tpu.pipeline_mode<synchronous>, transform_indices = @transform_4, window_bounds = array<i64: 1, 512>}, {pipeline_mode = #tpu.pipeline_mode<synchronous>, transform_indices = @transform_5, window_bounds = array<i64: 128, 512>}, {pipeline_mode = #tpu.pipeline_mode<synchronous>, transform_indices = @transform_6, window_bounds = array<i64: 128, 32>}, {pipeline_mode = #tpu.pipeline_mode<synchronous>, transform_indices = @transform_7, window_bounds = array<i64: 1, 32>}, {transform_indices = @transform_8, window_bounds = array<i64: 16, 32>}, {pipeline_mode = #tpu.pipeline_mode<synchronous>, transform_indices = @transform_9, window_bounds = array<i64: 2, 128>}, {pipeline_mode = #tpu.pipeline_mode<synchronous>, transform_indices = @transform_10, window_bounds = array<i64: 2, 128>}]} {
    %c0_i32 = arith.constant 0 : i32
    %0 = arith.cmpi eq, %arg0, %c0_i32 : i32
    %1 = arith.extui %0 : i1 to i32
    %c0_i32_0 = arith.constant 0 : i32
    %2 = arith.cmpi ne, %1, %c0_i32_0 : i32
    scf.if %2 {
      %c0_84 = arith.constant 0 : index
      %c0_85 = arith.constant 0 : index
      %254 = vector.load %arg2[%c0_84, %c0_85] : memref<2x128xf32, #tpu.memory_space<vmem>>, vector<2x128xf32>
      %c0_86 = arith.constant 0 : index
      %c0_87 = arith.constant 0 : index
      %255 = vector.load %arg10[%c0_86, %c0_87] : memref<2x128xf32, #tpu.memory_space<vmem>>, vector<2x128xf32>
      tpu.vector_store %arg10[%c0_86, %c0_87], %254 {strides = array<i32>} : memref<2x128xf32, #tpu.memory_space<vmem>>, vector<2x128xf32>,
      %c0_88 = arith.constant 0 : index
      %c0_89 = arith.constant 0 : index
      %256 = vector.load %arg3[%c0_88, %c0_89] : memref<2x128xf32, #tpu.memory_space<vmem>>, vector<2x128xf32>
      %c0_90 = arith.constant 0 : index
      %c0_91 = arith.constant 0 : index
      %257 = vector.load %arg11[%c0_90, %c0_91] : memref<2x128xf32, #tpu.memory_space<vmem>>, vector<2x128xf32>
      tpu.vector_store %arg11[%c0_90, %c0_91], %256 {strides = array<i32>} : memref<2x128xf32, #tpu.memory_space<vmem>>, vector<2x128xf32>,
    } else {
    }
    %c0 = arith.constant 0 : index
    %c0_1 = arith.constant 0 : index
    %3 = vector.load %arg1[%c0, %c0_1] : memref<16x128xf32, #tpu.memory_space<vmem>>, vector<16x128xf32>
    %c0_2 = arith.constant 0 : index
    %c0_3 = arith.constant 0 : index
    %4 = vector.load %arg4[%c0_2, %c0_3] : memref<128x512xf32, #tpu.memory_space<vmem>>, vector<128x512xf32>
    %cst = arith.constant dense<0.000000e+00> : vector<16x512xf32>
    %5 = tpu.matmul %3, %4, %cst {dimension_numbers = #tpu.dot_dimension_numbers<[1], [0], [0], [1], [0, 0, 1, 1], [], []>} : vector<16x128xf32>, vector<128x512xf32>, vector<16x512xf32> -> vector<16x512xf32>
    %c0_4 = arith.constant 0 : index
    %c0_5 = arith.constant 0 : index
    %6 = vector.load %arg5[%c0_4, %c0_5] : memref<1x512xf32, #tpu.memory_space<vmem>>, vector<1x512xf32>
    %7 = vector.broadcast %6 : vector<1x512xf32> to vector<16x512xf32>
    %8 = arith.addf %5, %7 : vector<16x512xf32>
    %c0_6 = arith.constant 0 : index
    %c0_7 = arith.constant 0 : index
    %9 = vector.load %arg12[%c0_6, %c0_7] : memref<16x512xf32, #tpu.memory_space<vmem>>, vector<16x512xf32>
    tpu.vector_store %arg12[%c0_6, %c0_7], %8 {strides = array<i32>} : memref<16x512xf32, #tpu.memory_space<vmem>>, vector<16x512xf32>,
    %c0_8 = arith.constant 0 : index
    %c0_9 = arith.constant 0 : index
    %10 = vector.load %arg10[%c0_8, %c0_9] : memref<2x128xf32, #tpu.memory_space<vmem>>, vector<2x128xf32>
    %c0_10 = arith.constant 0 : index
    %c0_11 = arith.constant 0 : index
    %11 = vector.load %arg11[%c0_10, %c0_11] : memref<2x128xf32, #tpu.memory_space<vmem>>, vector<2x128xf32>
    %c0_12 = arith.constant 0 : index
    %c0_13 = arith.constant 0 : index
    %12 = vector.load %arg6[%c0_12, %c0_13] : memref<128x512xf32, #tpu.memory_space<vmem>>, vector<128x512xf32>
    %c0_14 = arith.constant 0 : index
    %c0_15 = arith.constant 0 : index
    %13 = vector.load %arg12[%c0_14, %c0_15] : memref<16x512xf32, #tpu.memory_space<vmem>>, vector<2x512xf32>
    %cst_16 = arith.constant dense<0.000000e+00> : vector<2x512xf32>
    %14 = tpu.matmul %10, %12, %cst_16 {dimension_numbers = #tpu.dot_dimension_numbers<[1], [0], [0], [1], [0, 0, 1, 1], [], []>} : vector<2x128xf32>, vector<128x512xf32>, vector<2x512xf32> -> vector<2x512xf32>
    %15 = arith.addf %13, %14 : vector<2x512xf32>
    %16 = vector.extract_strided_slice %15 {offsets = [0, 0], sizes = [2, 128], strides = [1, 1]} : vector<2x512xf32> to vector<2x128xf32>
    %17 = arith.negf %16 : vector<2x128xf32>
    %18 = math.exp %17 : vector<2x128xf32>
    %cst_17 = arith.constant 1.000000e+00 : f32
    %19 = vector.broadcast %cst_17 : f32 to vector<2x128xf32>
    %20 = arith.addf %19, %18 : vector<2x128xf32>
    %21 = arith.divf %19, %20 : vector<2x128xf32>
    %22 = vector.extract_strided_slice %15 {offsets = [0, 128], sizes = [2, 128], strides = [1, 1]} : vector<2x512xf32> to vector<2x128xf32>
    %23 = arith.negf %22 : vector<2x128xf32>
    %24 = math.exp %23 : vector<2x128xf32>
    %cst_18 = arith.constant 1.000000e+00 : f32
    %25 = vector.broadcast %cst_18 : f32 to vector<2x128xf32>
    %26 = arith.addf %25, %24 : vector<2x128xf32>
    %27 = arith.divf %25, %26 : vector<2x128xf32>
    %28 = vector.extract_strided_slice %15 {offsets = [0, 256], sizes = [2, 128], strides = [1, 1]} : vector<2x512xf32> to vector<2x128xf32>
    %29 = math.tanh %28 : vector<2x128xf32>
    %30 = vector.extract_strided_slice %15 {offsets = [0, 384], sizes = [2, 128], strides = [1, 1]} : vector<2x512xf32> to vector<2x128xf32>
    %31 = arith.negf %30 : vector<2x128xf32>
    %32 = math.exp %31 : vector<2x128xf32>
    %cst_19 = arith.constant 1.000000e+00 : f32
    %33 = vector.broadcast %cst_19 : f32 to vector<2x128xf32>
    %34 = arith.addf %33, %32 : vector<2x128xf32>
    %35 = arith.divf %33, %34 : vector<2x128xf32>
    %36 = arith.mulf %27, %11 : vector<2x128xf32>
    %37 = arith.mulf %21, %29 : vector<2x128xf32>
    %38 = arith.addf %36, %37 : vector<2x128xf32>
    %39 = math.tanh %38 : vector<2x128xf32>
    %40 = arith.mulf %35, %39 : vector<2x128xf32>
    %c0_20 = arith.constant 0 : index
    %c0_21 = arith.constant 0 : index
    %41 = vector.load %arg13[%c0_20, %c0_21] : memref<16x128xf32, #tpu.memory_space<vmem>>, vector<2x128xf32>
    tpu.vector_store %arg13[%c0_20, %c0_21], %40 {strides = array<i32>} : memref<16x128xf32, #tpu.memory_space<vmem>>, vector<2x128xf32>,
    %c2 = arith.constant 2 : index
    %c0_22 = arith.constant 0 : index
    %42 = vector.load %arg12[%c2, %c0_22] : memref<16x512xf32, #tpu.memory_space<vmem>>, vector<2x512xf32>
    %cst_23 = arith.constant dense<0.000000e+00> : vector<2x512xf32>
    %43 = tpu.matmul %40, %12, %cst_23 {dimension_numbers = #tpu.dot_dimension_numbers<[1], [0], [0], [1], [0, 0, 1, 1], [], []>} : vector<2x128xf32>, vector<128x512xf32>, vector<2x512xf32> -> vector<2x512xf32>
    %44 = arith.addf %42, %43 : vector<2x512xf32>
    %45 = vector.extract_strided_slice %44 {offsets = [0, 0], sizes = [2, 128], strides = [1, 1]} : vector<2x512xf32> to vector<2x128xf32>
    %46 = arith.negf %45 : vector<2x128xf32>
    %47 = math.exp %46 : vector<2x128xf32>
    %cst_24 = arith.constant 1.000000e+00 : f32
    %48 = vector.broadcast %cst_24 : f32 to vector<2x128xf32>
    %49 = arith.addf %48, %47 : vector<2x128xf32>
    %50 = arith.divf %48, %49 : vector<2x128xf32>
    %51 = vector.extract_strided_slice %44 {offsets = [0, 128], sizes = [2, 128], strides = [1, 1]} : vector<2x512xf32> to vector<2x128xf32>
    %52 = arith.negf %51 : vector<2x128xf32>
    %53 = math.exp %52 : vector<2x128xf32>
    %cst_25 = arith.constant 1.000000e+00 : f32
    %54 = vector.broadcast %cst_25 : f32 to vector<2x128xf32>
    %55 = arith.addf %54, %53 : vector<2x128xf32>
    %56 = arith.divf %54, %55 : vector<2x128xf32>
    %57 = vector.extract_strided_slice %44 {offsets = [0, 256], sizes = [2, 128], strides = [1, 1]} : vector<2x512xf32> to vector<2x128xf32>
    %58 = math.tanh %57 : vector<2x128xf32>
    %59 = vector.extract_strided_slice %44 {offsets = [0, 384], sizes = [2, 128], strides = [1, 1]} : vector<2x512xf32> to vector<2x128xf32>
    %60 = arith.negf %59 : vector<2x128xf32>
    %61 = math.exp %60 : vector<2x128xf32>
    %cst_26 = arith.constant 1.000000e+00 : f32
    %62 = vector.broadcast %cst_26 : f32 to vector<2x128xf32>
    %63 = arith.addf %62, %61 : vector<2x128xf32>
    %64 = arith.divf %62, %63 : vector<2x128xf32>
    %65 = arith.mulf %56, %38 : vector<2x128xf32>
    %66 = arith.mulf %50, %58 : vector<2x128xf32>
    %67 = arith.addf %65, %66 : vector<2x128xf32>
    %68 = math.tanh %67 : vector<2x128xf32>
    %69 = arith.mulf %64, %68 : vector<2x128xf32>
    %c2_27 = arith.constant 2 : index
    %c0_28 = arith.constant 0 : index
    %70 = vector.load %arg13[%c2_27, %c0_28] : memref<16x128xf32, #tpu.memory_space<vmem>>, vector<2x128xf32>
    tpu.vector_store %arg13[%c2_27, %c0_28], %69 {strides = array<i32>} : memref<16x128xf32, #tpu.memory_space<vmem>>, vector<2x128xf32>,
    %c4 = arith.constant 4 : index
    %c0_29 = arith.constant 0 : index
    %71 = vector.load %arg12[%c4, %c0_29] : memref<16x512xf32, #tpu.memory_space<vmem>>, vector<2x512xf32>
    %cst_30 = arith.constant dense<0.000000e+00> : vector<2x512xf32>
    %72 = tpu.matmul %69, %12, %cst_30 {dimension_numbers = #tpu.dot_dimension_numbers<[1], [0], [0], [1], [0, 0, 1, 1], [], []>} : vector<2x128xf32>, vector<128x512xf32>, vector<2x512xf32> -> vector<2x512xf32>
    %73 = arith.addf %71, %72 : vector<2x512xf32>
    %74 = vector.extract_strided_slice %73 {offsets = [0, 0], sizes = [2, 128], strides = [1, 1]} : vector<2x512xf32> to vector<2x128xf32>
    %75 = arith.negf %74 : vector<2x128xf32>
    %76 = math.exp %75 : vector<2x128xf32>
    %cst_31 = arith.constant 1.000000e+00 : f32
    %77 = vector.broadcast %cst_31 : f32 to vector<2x128xf32>
    %78 = arith.addf %77, %76 : vector<2x128xf32>
    %79 = arith.divf %77, %78 : vector<2x128xf32>
    %80 = vector.extract_strided_slice %73 {offsets = [0, 128], sizes = [2, 128], strides = [1, 1]} : vector<2x512xf32> to vector<2x128xf32>
    %81 = arith.negf %80 : vector<2x128xf32>
    %82 = math.exp %81 : vector<2x128xf32>
    %cst_32 = arith.constant 1.000000e+00 : f32
    %83 = vector.broadcast %cst_32 : f32 to vector<2x128xf32>
    %84 = arith.addf %83, %82 : vector<2x128xf32>
    %85 = arith.divf %83, %84 : vector<2x128xf32>
    %86 = vector.extract_strided_slice %73 {offsets = [0, 256], sizes = [2, 128], strides = [1, 1]} : vector<2x512xf32> to vector<2x128xf32>
    %87 = math.tanh %86 : vector<2x128xf32>
    %88 = vector.extract_strided_slice %73 {offsets = [0, 384], sizes = [2, 128], strides = [1, 1]} : vector<2x512xf32> to vector<2x128xf32>
    %89 = arith.negf %88 : vector<2x128xf32>
    %90 = math.exp %89 : vector<2x128xf32>
    %cst_33 = arith.constant 1.000000e+00 : f32
    %91 = vector.broadcast %cst_33 : f32 to vector<2x128xf32>
    %92 = arith.addf %91, %90 : vector<2x128xf32>
    %93 = arith.divf %91, %92 : vector<2x128xf32>
    %94 = arith.mulf %85, %67 : vector<2x128xf32>
    %95 = arith.mulf %79, %87 : vector<2x128xf32>
    %96 = arith.addf %94, %95 : vector<2x128xf32>
    %97 = math.tanh %96 : vector<2x128xf32>
    %98 = arith.mulf %93, %97 : vector<2x128xf32>
    %c4_34 = arith.constant 4 : index
    %c0_35 = arith.constant 0 : index
    %99 = vector.load %arg13[%c4_34, %c0_35] : memref<16x128xf32, #tpu.memory_space<vmem>>, vector<2x128xf32>
    tpu.vector_store %arg13[%c4_34, %c0_35], %98 {strides = array<i32>} : memref<16x128xf32, #tpu.memory_space<vmem>>, vector<2x128xf32>,
    %c6 = arith.constant 6 : index
    %c0_36 = arith.constant 0 : index
    %100 = vector.load %arg12[%c6, %c0_36] : memref<16x512xf32, #tpu.memory_space<vmem>>, vector<2x512xf32>
    %cst_37 = arith.constant dense<0.000000e+00> : vector<2x512xf32>
    %101 = tpu.matmul %98, %12, %cst_37 {dimension_numbers = #tpu.dot_dimension_numbers<[1], [0], [0], [1], [0, 0, 1, 1], [], []>} : vector<2x128xf32>, vector<128x512xf32>, vector<2x512xf32> -> vector<2x512xf32>
    %102 = arith.addf %100, %101 : vector<2x512xf32>
    %103 = vector.extract_strided_slice %102 {offsets = [0, 0], sizes = [2, 128], strides = [1, 1]} : vector<2x512xf32> to vector<2x128xf32>
    %104 = arith.negf %103 : vector<2x128xf32>
    %105 = math.exp %104 : vector<2x128xf32>
    %cst_38 = arith.constant 1.000000e+00 : f32
    %106 = vector.broadcast %cst_38 : f32 to vector<2x128xf32>
    %107 = arith.addf %106, %105 : vector<2x128xf32>
    %108 = arith.divf %106, %107 : vector<2x128xf32>
    %109 = vector.extract_strided_slice %102 {offsets = [0, 128], sizes = [2, 128], strides = [1, 1]} : vector<2x512xf32> to vector<2x128xf32>
    %110 = arith.negf %109 : vector<2x128xf32>
    %111 = math.exp %110 : vector<2x128xf32>
    %cst_39 = arith.constant 1.000000e+00 : f32
    %112 = vector.broadcast %cst_39 : f32 to vector<2x128xf32>
    %113 = arith.addf %112, %111 : vector<2x128xf32>
    %114 = arith.divf %112, %113 : vector<2x128xf32>
    %115 = vector.extract_strided_slice %102 {offsets = [0, 256], sizes = [2, 128], strides = [1, 1]} : vector<2x512xf32> to vector<2x128xf32>
    %116 = math.tanh %115 : vector<2x128xf32>
    %117 = vector.extract_strided_slice %102 {offsets = [0, 384], sizes = [2, 128], strides = [1, 1]} : vector<2x512xf32> to vector<2x128xf32>
    %118 = arith.negf %117 : vector<2x128xf32>
    %119 = math.exp %118 : vector<2x128xf32>
    %cst_40 = arith.constant 1.000000e+00 : f32
    %120 = vector.broadcast %cst_40 : f32 to vector<2x128xf32>
    %121 = arith.addf %120, %119 : vector<2x128xf32>
    %122 = arith.divf %120, %121 : vector<2x128xf32>
    %123 = arith.mulf %114, %96 : vector<2x128xf32>
    %124 = arith.mulf %108, %116 : vector<2x128xf32>
    %125 = arith.addf %123, %124 : vector<2x128xf32>
    %126 = math.tanh %125 : vector<2x128xf32>
    %127 = arith.mulf %122, %126 : vector<2x128xf32>
    %c6_41 = arith.constant 6 : index
    %c0_42 = arith.constant 0 : index
    %128 = vector.load %arg13[%c6_41, %c0_42] : memref<16x128xf32, #tpu.memory_space<vmem>>, vector<2x128xf32>
    tpu.vector_store %arg13[%c6_41, %c0_42], %127 {strides = array<i32>} : memref<16x128xf32, #tpu.memory_space<vmem>>, vector<2x128xf32>,
    %c8 = arith.constant 8 : index
    %c0_43 = arith.constant 0 : index
    %129 = vector.load %arg12[%c8, %c0_43] : memref<16x512xf32, #tpu.memory_space<vmem>>, vector<2x512xf32>
    %cst_44 = arith.constant dense<0.000000e+00> : vector<2x512xf32>
    %130 = tpu.matmul %127, %12, %cst_44 {dimension_numbers = #tpu.dot_dimension_numbers<[1], [0], [0], [1], [0, 0, 1, 1], [], []>} : vector<2x128xf32>, vector<128x512xf32>, vector<2x512xf32> -> vector<2x512xf32>
    %131 = arith.addf %129, %130 : vector<2x512xf32>
    %132 = vector.extract_strided_slice %131 {offsets = [0, 0], sizes = [2, 128], strides = [1, 1]} : vector<2x512xf32> to vector<2x128xf32>
    %133 = arith.negf %132 : vector<2x128xf32>
    %134 = math.exp %133 : vector<2x128xf32>
    %cst_45 = arith.constant 1.000000e+00 : f32
    %135 = vector.broadcast %cst_45 : f32 to vector<2x128xf32>
    %136 = arith.addf %135, %134 : vector<2x128xf32>
    %137 = arith.divf %135, %136 : vector<2x128xf32>
    %138 = vector.extract_strided_slice %131 {offsets = [0, 128], sizes = [2, 128], strides = [1, 1]} : vector<2x512xf32> to vector<2x128xf32>
    %139 = arith.negf %138 : vector<2x128xf32>
    %140 = math.exp %139 : vector<2x128xf32>
    %cst_46 = arith.constant 1.000000e+00 : f32
    %141 = vector.broadcast %cst_46 : f32 to vector<2x128xf32>
    %142 = arith.addf %141, %140 : vector<2x128xf32>
    %143 = arith.divf %141, %142 : vector<2x128xf32>
    %144 = vector.extract_strided_slice %131 {offsets = [0, 256], sizes = [2, 128], strides = [1, 1]} : vector<2x512xf32> to vector<2x128xf32>
    %145 = math.tanh %144 : vector<2x128xf32>
    %146 = vector.extract_strided_slice %131 {offsets = [0, 384], sizes = [2, 128], strides = [1, 1]} : vector<2x512xf32> to vector<2x128xf32>
    %147 = arith.negf %146 : vector<2x128xf32>
    %148 = math.exp %147 : vector<2x128xf32>
    %cst_47 = arith.constant 1.000000e+00 : f32
    %149 = vector.broadcast %cst_47 : f32 to vector<2x128xf32>
    %150 = arith.addf %149, %148 : vector<2x128xf32>
    %151 = arith.divf %149, %150 : vector<2x128xf32>
    %152 = arith.mulf %143, %125 : vector<2x128xf32>
    %153 = arith.mulf %137, %145 : vector<2x128xf32>
    %154 = arith.addf %152, %153 : vector<2x128xf32>
    %155 = math.tanh %154 : vector<2x128xf32>
    %156 = arith.mulf %151, %155 : vector<2x128xf32>
    %c8_48 = arith.constant 8 : index
    %c0_49 = arith.constant 0 : index
    %157 = vector.load %arg13[%c8_48, %c0_49] : memref<16x128xf32, #tpu.memory_space<vmem>>, vector<2x128xf32>
    tpu.vector_store %arg13[%c8_48, %c0_49], %156 {strides = array<i32>} : memref<16x128xf32, #tpu.memory_space<vmem>>, vector<2x128xf32>,
    %c10 = arith.constant 10 : index
    %c0_50 = arith.constant 0 : index
    %158 = vector.load %arg12[%c10, %c0_50] : memref<16x512xf32, #tpu.memory_space<vmem>>, vector<2x512xf32>
    %cst_51 = arith.constant dense<0.000000e+00> : vector<2x512xf32>
    %159 = tpu.matmul %156, %12, %cst_51 {dimension_numbers = #tpu.dot_dimension_numbers<[1], [0], [0], [1], [0, 0, 1, 1], [], []>} : vector<2x128xf32>, vector<128x512xf32>, vector<2x512xf32> -> vector<2x512xf32>
    %160 = arith.addf %158, %159 : vector<2x512xf32>
    %161 = vector.extract_strided_slice %160 {offsets = [0, 0], sizes = [2, 128], strides = [1, 1]} : vector<2x512xf32> to vector<2x128xf32>
    %162 = arith.negf %161 : vector<2x128xf32>
    %163 = math.exp %162 : vector<2x128xf32>
    %cst_52 = arith.constant 1.000000e+00 : f32
    %164 = vector.broadcast %cst_52 : f32 to vector<2x128xf32>
    %165 = arith.addf %164, %163 : vector<2x128xf32>
    %166 = arith.divf %164, %165 : vector<2x128xf32>
    %167 = vector.extract_strided_slice %160 {offsets = [0, 128], sizes = [2, 128], strides = [1, 1]} : vector<2x512xf32> to vector<2x128xf32>
    %168 = arith.negf %167 : vector<2x128xf32>
    %169 = math.exp %168 : vector<2x128xf32>
    %cst_53 = arith.constant 1.000000e+00 : f32
    %170 = vector.broadcast %cst_53 : f32 to vector<2x128xf32>
    %171 = arith.addf %170, %169 : vector<2x128xf32>
    %172 = arith.divf %170, %171 : vector<2x128xf32>
    %173 = vector.extract_strided_slice %160 {offsets = [0, 256], sizes = [2, 128], strides = [1, 1]} : vector<2x512xf32> to vector<2x128xf32>
    %174 = math.tanh %173 : vector<2x128xf32>
    %175 = vector.extract_strided_slice %160 {offsets = [0, 384], sizes = [2, 128], strides = [1, 1]} : vector<2x512xf32> to vector<2x128xf32>
    %176 = arith.negf %175 : vector<2x128xf32>
    %177 = math.exp %176 : vector<2x128xf32>
    %cst_54 = arith.constant 1.000000e+00 : f32
    %178 = vector.broadcast %cst_54 : f32 to vector<2x128xf32>
    %179 = arith.addf %178, %177 : vector<2x128xf32>
    %180 = arith.divf %178, %179 : vector<2x128xf32>
    %181 = arith.mulf %172, %154 : vector<2x128xf32>
    %182 = arith.mulf %166, %174 : vector<2x128xf32>
    %183 = arith.addf %181, %182 : vector<2x128xf32>
    %184 = math.tanh %183 : vector<2x128xf32>
    %185 = arith.mulf %180, %184 : vector<2x128xf32>
    %c10_55 = arith.constant 10 : index
    %c0_56 = arith.constant 0 : index
    %186 = vector.load %arg13[%c10_55, %c0_56] : memref<16x128xf32, #tpu.memory_space<vmem>>, vector<2x128xf32>
    tpu.vector_store %arg13[%c10_55, %c0_56], %185 {strides = array<i32>} : memref<16x128xf32, #tpu.memory_space<vmem>>, vector<2x128xf32>,
    %c12 = arith.constant 12 : index
    %c0_57 = arith.constant 0 : index
    %187 = vector.load %arg12[%c12, %c0_57] : memref<16x512xf32, #tpu.memory_space<vmem>>, vector<2x512xf32>
    %cst_58 = arith.constant dense<0.000000e+00> : vector<2x512xf32>
    %188 = tpu.matmul %185, %12, %cst_58 {dimension_numbers = #tpu.dot_dimension_numbers<[1], [0], [0], [1], [0, 0, 1, 1], [], []>} : vector<2x128xf32>, vector<128x512xf32>, vector<2x512xf32> -> vector<2x512xf32>
    %189 = arith.addf %187, %188 : vector<2x512xf32>
    %190 = vector.extract_strided_slice %189 {offsets = [0, 0], sizes = [2, 128], strides = [1, 1]} : vector<2x512xf32> to vector<2x128xf32>
    %191 = arith.negf %190 : vector<2x128xf32>
    %192 = math.exp %191 : vector<2x128xf32>
    %cst_59 = arith.constant 1.000000e+00 : f32
    %193 = vector.broadcast %cst_59 : f32 to vector<2x128xf32>
    %194 = arith.addf %193, %192 : vector<2x128xf32>
    %195 = arith.divf %193, %194 : vector<2x128xf32>
    %196 = vector.extract_strided_slice %189 {offsets = [0, 128], sizes = [2, 128], strides = [1, 1]} : vector<2x512xf32> to vector<2x128xf32>
    %197 = arith.negf %196 : vector<2x128xf32>
    %198 = math.exp %197 : vector<2x128xf32>
    %cst_60 = arith.constant 1.000000e+00 : f32
    %199 = vector.broadcast %cst_60 : f32 to vector<2x128xf32>
    %200 = arith.addf %199, %198 : vector<2x128xf32>
    %201 = arith.divf %199, %200 : vector<2x128xf32>
    %202 = vector.extract_strided_slice %189 {offsets = [0, 256], sizes = [2, 128], strides = [1, 1]} : vector<2x512xf32> to vector<2x128xf32>
    %203 = math.tanh %202 : vector<2x128xf32>
    %204 = vector.extract_strided_slice %189 {offsets = [0, 384], sizes = [2, 128], strides = [1, 1]} : vector<2x512xf32> to vector<2x128xf32>
    %205 = arith.negf %204 : vector<2x128xf32>
    %206 = math.exp %205 : vector<2x128xf32>
    %cst_61 = arith.constant 1.000000e+00 : f32
    %207 = vector.broadcast %cst_61 : f32 to vector<2x128xf32>
    %208 = arith.addf %207, %206 : vector<2x128xf32>
    %209 = arith.divf %207, %208 : vector<2x128xf32>
    %210 = arith.mulf %201, %183 : vector<2x128xf32>
    %211 = arith.mulf %195, %203 : vector<2x128xf32>
    %212 = arith.addf %210, %211 : vector<2x128xf32>
    %213 = math.tanh %212 : vector<2x128xf32>
    %214 = arith.mulf %209, %213 : vector<2x128xf32>
    %c12_62 = arith.constant 12 : index
    %c0_63 = arith.constant 0 : index
    %215 = vector.load %arg13[%c12_62, %c0_63] : memref<16x128xf32, #tpu.memory_space<vmem>>, vector<2x128xf32>
    tpu.vector_store %arg13[%c12_62, %c0_63], %214 {strides = array<i32>} : memref<16x128xf32, #tpu.memory_space<vmem>>, vector<2x128xf32>,
    %c14 = arith.constant 14 : index
    %c0_64 = arith.constant 0 : index
    %216 = vector.load %arg12[%c14, %c0_64] : memref<16x512xf32, #tpu.memory_space<vmem>>, vector<2x512xf32>
    %cst_65 = arith.constant dense<0.000000e+00> : vector<2x512xf32>
    %217 = tpu.matmul %214, %12, %cst_65 {dimension_numbers = #tpu.dot_dimension_numbers<[1], [0], [0], [1], [0, 0, 1, 1], [], []>} : vector<2x128xf32>, vector<128x512xf32>, vector<2x512xf32> -> vector<2x512xf32>
    %218 = arith.addf %216, %217 : vector<2x512xf32>
    %219 = vector.extract_strided_slice %218 {offsets = [0, 0], sizes = [2, 128], strides = [1, 1]} : vector<2x512xf32> to vector<2x128xf32>
    %220 = arith.negf %219 : vector<2x128xf32>
    %221 = math.exp %220 : vector<2x128xf32>
    %cst_66 = arith.constant 1.000000e+00 : f32
    %222 = vector.broadcast %cst_66 : f32 to vector<2x128xf32>
    %223 = arith.addf %222, %221 : vector<2x128xf32>
    %224 = arith.divf %222, %223 : vector<2x128xf32>
    %225 = vector.extract_strided_slice %218 {offsets = [0, 128], sizes = [2, 128], strides = [1, 1]} : vector<2x512xf32> to vector<2x128xf32>
    %226 = arith.negf %225 : vector<2x128xf32>
    %227 = math.exp %226 : vector<2x128xf32>
    %cst_67 = arith.constant 1.000000e+00 : f32
    %228 = vector.broadcast %cst_67 : f32 to vector<2x128xf32>
    %229 = arith.addf %228, %227 : vector<2x128xf32>
    %230 = arith.divf %228, %229 : vector<2x128xf32>
    %231 = vector.extract_strided_slice %218 {offsets = [0, 256], sizes = [2, 128], strides = [1, 1]} : vector<2x512xf32> to vector<2x128xf32>
    %232 = math.tanh %231 : vector<2x128xf32>
    %233 = vector.extract_strided_slice %218 {offsets = [0, 384], sizes = [2, 128], strides = [1, 1]} : vector<2x512xf32> to vector<2x128xf32>
    %234 = arith.negf %233 : vector<2x128xf32>
    %235 = math.exp %234 : vector<2x128xf32>
    %cst_68 = arith.constant 1.000000e+00 : f32
    %236 = vector.broadcast %cst_68 : f32 to vector<2x128xf32>
    %237 = arith.addf %236, %235 : vector<2x128xf32>
    %238 = arith.divf %236, %237 : vector<2x128xf32>
    %239 = arith.mulf %230, %212 : vector<2x128xf32>
    %240 = arith.mulf %224, %232 : vector<2x128xf32>
    %241 = arith.addf %239, %240 : vector<2x128xf32>
    %242 = math.tanh %241 : vector<2x128xf32>
    %243 = arith.mulf %238, %242 : vector<2x128xf32>
    %c14_69 = arith.constant 14 : index
    %c0_70 = arith.constant 0 : index
    %244 = vector.load %arg13[%c14_69, %c0_70] : memref<16x128xf32, #tpu.memory_space<vmem>>, vector<2x128xf32>
    tpu.vector_store %arg13[%c14_69, %c0_70], %243 {strides = array<i32>} : memref<16x128xf32, #tpu.memory_space<vmem>>, vector<2x128xf32>,
    %c0_71 = arith.constant 0 : index
    %c0_72 = arith.constant 0 : index
    %245 = vector.load %arg10[%c0_71, %c0_72] : memref<2x128xf32, #tpu.memory_space<vmem>>, vector<2x128xf32>
    tpu.vector_store %arg10[%c0_71, %c0_72], %243 {strides = array<i32>} : memref<2x128xf32, #tpu.memory_space<vmem>>, vector<2x128xf32>,
    %c0_73 = arith.constant 0 : index
    %c0_74 = arith.constant 0 : index
    %246 = vector.load %arg11[%c0_73, %c0_74] : memref<2x128xf32, #tpu.memory_space<vmem>>, vector<2x128xf32>
    tpu.vector_store %arg11[%c0_73, %c0_74], %241 {strides = array<i32>} : memref<2x128xf32, #tpu.memory_space<vmem>>, vector<2x128xf32>,
    %c0_75 = arith.constant 0 : index
    %c0_76 = arith.constant 0 : index
    %247 = vector.load %arg13[%c0_75, %c0_76] : memref<16x128xf32, #tpu.memory_space<vmem>>, vector<16x128xf32>
    %c0_77 = arith.constant 0 : index
    %c0_78 = arith.constant 0 : index
    %248 = vector.load %arg7[%c0_77, %c0_78] : memref<128x32xf32, #tpu.memory_space<vmem>>, vector<128x32xf32>
    %cst_79 = arith.constant dense<0.000000e+00> : vector<16x32xf32>
    %249 = tpu.matmul %247, %248, %cst_79 {dimension_numbers = #tpu.dot_dimension_numbers<[1], [0], [0], [1], [0, 0, 1, 1], [], []>} : vector<16x128xf32>, vector<128x32xf32>, vector<16x32xf32> -> vector<16x32xf32>
    %c0_80 = arith.constant 0 : index
    %c0_81 = arith.constant 0 : index
    %250 = vector.load %arg8[%c0_80, %c0_81] : memref<1x32xf32, #tpu.memory_space<vmem>>, vector<1x32xf32>
    %251 = vector.broadcast %250 : vector<1x32xf32> to vector<16x32xf32>
    %252 = arith.addf %249, %251 : vector<16x32xf32>
    %c0_82 = arith.constant 0 : index
    %c0_83 = arith.constant 0 : index
    %253 = vector.load %arg9[%c0_82, %c0_83] : memref<16x32xf32, #tpu.memory_space<vmem>>, vector<16x32xf32>
    tpu.vector_store %arg9[%c0_82, %c0_83], %252 {strides = array<i32>} : memref<16x32xf32, #tpu.memory_space<vmem>>, vector<16x32xf32>,
    return
  }
  func.func @transform_0(%arg0: i32) -> (i32, i32) {
    %c0_i32 = arith.constant 0 : i32
    %c0_i32_0 = arith.constant 0 : i32
    return %arg0, %c0_i32 : i32, i32
  }
  func.func @transform_1(%arg0: i32) -> (i32, i32) {
    %c0_i32 = arith.constant 0 : i32
    %c0_i32_0 = arith.constant 0 : i32
    %c0_i32_1 = arith.constant 0 : i32
    return %c0_i32, %c0_i32_0 : i32, i32
  }
  func.func @transform_2(%arg0: i32) -> (i32, i32) {
    %c0_i32 = arith.constant 0 : i32
    %c0_i32_0 = arith.constant 0 : i32
    %c0_i32_1 = arith.constant 0 : i32
    return %c0_i32, %c0_i32_0 : i32, i32
  }
  func.func @transform_3(%arg0: i32) -> (i32, i32) {
    %c0_i32 = arith.constant 0 : i32
    %c0_i32_0 = arith.constant 0 : i32
    %c0_i32_1 = arith.constant 0 : i32
    return %c0_i32, %c0_i32_0 : i32, i32
  }
  func.func @transform_4(%arg0: i32) -> (i32, i32) {
    %c0_i32 = arith.constant 0 : i32
    %c0_i32_0 = arith.constant 0 : i32
    %c0_i32_1 = arith.constant 0 : i32
    return %c0_i32, %c0_i32_0 : i32, i32
  }
  func.func @transform_5(%arg0: i32) -> (i32, i32) {
    %c0_i32 = arith.constant 0 : i32
    %c0_i32_0 = arith.constant 0 : i32
    %c0_i32_1 = arith.constant 0 : i32
    return %c0_i32, %c0_i32_0 : i32, i32
  }
  func.func @transform_6(%arg0: i32) -> (i32, i32) {
    %c0_i32 = arith.constant 0 : i32
    %c0_i32_0 = arith.constant 0 : i32
    %c0_i32_1 = arith.constant 0 : i32
    return %c0_i32, %c0_i32_0 : i32, i32
  }
  func.func @transform_7(%arg0: i32) -> (i32, i32) {
    %c0_i32 = arith.constant 0 : i32
    %c0_i32_0 = arith.constant 0 : i32
    %c0_i32_1 = arith.constant 0 : i32
    return %c0_i32, %c0_i32_0 : i32, i32
  }
  func.func @transform_8(%arg0: i32) -> (i32, i32) {
    %c0_i32 = arith.constant 0 : i32
    %c0_i32_0 = arith.constant 0 : i32
    return %arg0, %c0_i32 : i32, i32
  }
  func.func @transform_9(%arg0: i32) -> (i32, i32) {
    %c0_i32 = arith.constant 0 : i32
    %c0_i32_0 = arith.constant 0 : i32
    %c0_i32_1 = arith.constant 0 : i32
    return %c0_i32, %c0_i32_0 : i32, i32
  }
  func.func @transform_10(%arg0: i32) -> (i32, i32) {
    %c0_i32 = arith.constant 0 : i32
    %c0_i32_0 = arith.constant 0 : i32
    %c0_i32_1 = arith.constant 0 : i32
    return %c0_i32, %c0_i32_0 : i32, i32
  }
}

</mosaic_0001>

<bundles_post_ra>
// kernel: tpu_custom_call.1
= control target key start
LH: loop header
LB: loop body
LE: loop exit
PB: predicated region body
PF: predicated region fallthrough
CT: control target
= control target key end

     0   :  { %16 = vsyncpa [#allocation5], 0  ;;  %s3066_s0 = inlined_call_operand.vmem [shape: f32[16,128], index: 0, kind: input, shape index: {}]   ;;  %s3067_s1 = inlined_call_operand.vmem [shape: f32[2,128], index: 1, kind: input, shape index: {}]   ;;  %s3068_s2 = inlined_call_operand.vmem [shape: f32[2,128], index: 2, kind: input, shape index: {}]   ;;  %s3069_s3 = inlined_call_operand.hbm [shape: f32[128,512], index: 3, kind: input, shape index: {}]   ;;  %s3070_s4 = inlined_call_operand.vmem [shape: f32[1,512], index: 4, kind: input, shape index: {}]   ;;  %s3071_s5 = inlined_call_operand.hbm [shape: f32[128,512], index: 5, kind: input, shape index: {}]   ;;  %s3072_s6 = inlined_call_operand.vmem [shape: f32[128,32], index: 6, kind: input, shape index: {}]   ;;  %s3073_s7 = inlined_call_operand.vmem [shape: f32[1,32], index: 7, kind: input, shape index: {}]   ;;  %s3074_s8 = inlined_call_operand.hbm [shape: f32[16,32], index: 8, kind: output, shape index: {0}]   ;;  %s3075_s9 = inlined_call_operand.hbm [shape: f32[2,128], index: 9, kind: output, shape index: {1}]   ;;  %s3076_s10 = inlined_call_operand.hbm [shape: f32[2,128], index: 10, kind: output, shape index: {2}]  }
   0x1   :  { %17 = vsyncpa [#allocation8], 0 }
   0x2   :  { %18 = vsyncpa [#allocation6], 0 }
   0x3   :  { %19 = vsyncpa [#allocation11], 0  ;;  %s30_s15 = sshll.u32 %s3069_s3, 4  ;;  %s2095_s16 = smov [#allocation4]   ;;  %s31_s15 = int_to_ptr.hbm [resolvable:$true] %s30_s15 }
   0x4   :  { %s32_s17 = sshll.u32 %s2095_s16, 4  ;;  %s45_s20 = sshll.u32 %s3071_s5, 4  ;;  %s33_s17 = int_to_ptr.vmem [resolvable:$true] %s32_s17  ;;  %s46_s20 = int_to_ptr.hbm [resolvable:$true] %s45_s20 }
   0x5   :  { %s2096_s21 = smov 512   ;;  %s2097_s22 = smov 32  }
   0x6   :  { %38 = dma.hbm_to_vmem [thread:$0]  %s31_s15, 8192, %s33_s17, [#allocation5], %s2096_s21, %s2096_s21, %s2097_s22  }
   0x7   :  { %s2098_s23 = smov [#allocation7]  }
   0x8   :  { %s47_s24 = sshll.u32 %s2098_s23, 4  ;;  %s48_s24 = int_to_ptr.vmem [resolvable:$true] %s47_s24 }
   0x9   :  { %53 = dma.hbm_to_vmem [thread:$0]  %s46_s20, 8192, %s48_s24, [#allocation8], %s2096_s21, %s2096_s21, %s2097_s22  }
   0xa   :  { %2087 = dma.done.wait [#allocation5], 8192  }
   0xb   :  { %2088 = vsyncadd [#allocation5], 4294959104 }
   0xc   :  { %2089 = dma.done.wait [#allocation8], 8192  }
   0xd   :  { %2090 = vsyncadd [#allocation8], 4294959104  ;;  %v136_v0 = vld [vmem:[#allocation4 + $0x1e0] sm:$0xff]  ;;  %v138_v3 = vld [vmem:[#allocation4 + $0x1f0] sm:$0xff]  ;;  %s1710_s19 = sshll.u32 %s3075_s9, 4  ;;  %s2100_s20 = smov [#allocation12]   ;;  %s1711_s19 = int_to_ptr.hbm [resolvable:$true] %s1710_s19 }
   0xe   :  { %v132_v1 = vld [vmem:[#allocation4 + $0x1c0] sm:$0xff]  ;;  %150 = vmatpush.msra.mxu1 %v136_v0  ;;  %v134_v4 = vld [vmem:[#allocation4 + $0x1d0] sm:$0xff]  ;;  %196 = vmatpush.msra.mxu2 %v138_v3  ;;  %v139_v7 = vld [vmem:[#allocation4 + $0x1f8] sm:$0xff]  ;;  %s1719_s21 = sshll.u32 %s2100_s20, 4  ;;  %s1721_s24 = sshll.u32 %s3076_s10, 4  ;;  %s1720_s21 = int_to_ptr.vmem [resolvable:$true] %s1719_s21  ;;  %s1722_s24 = int_to_ptr.hbm [resolvable:$true] %s1721_s24 }
   0xf   :  { %v128_v2 = vld [vmem:[#allocation4 + $0x1a0] sm:$0xff]  ;;  %v130_v6 = vld [vmem:[#allocation4 + $0x1b0] sm:$0xff]  ;;  %v135_v8 = vld [vmem:[#allocation4 + $0x1d8] sm:$0xff]  ;;  %219 = vmatpush.msra.mxu3 %v139_v7  ;;  %s2101_s3 = smov [#allocation9]   ;;  %s2102_s9 = smov 128  }
  0x10   :  { %151 = vmatpush.msra.mxu1 %v132_v1  ;;  %v124_v5 = vld [vmem:[#allocation4 + $0x180] sm:$0xff]  ;;  %197 = vmatpush.msra.mxu2 %v134_v4  ;;  %v126_v10 = vld [vmem:[#allocation4 + $0x190] sm:$0xff]  ;;  %v131_v11 = vld [vmem:[#allocation4 + $0x1b8] sm:$0xff]  ;;  %s1694_s5 = sshll.u32 %s2101_s3, 4  ;;  %s2103_s27 = smov 8   ;;  %s1695_s5 = int_to_ptr.vmem [resolvable:$true] %s1694_s5 }
  0x11   :  { %v120_v9 = vld [vmem:[#allocation4 + $0x160] sm:$0xff]  ;;  %v122_v13 = vld [vmem:[#allocation4 + $0x170] sm:$0xff]  ;;  %220 = vmatpush.msra.mxu3 %v135_v8  ;;  %v127_v14 = vld [vmem:[#allocation4 + $0x198] sm:$0xff] }
  0x12   :  { %152 = vmatpush.msra.mxu1 %v128_v2  ;;  %198 = vmatpush.msra.mxu2 %v130_v6  ;;  %v116_v12 = vld [vmem:[#allocation4 + $0x140] sm:$0xff]  ;;  %v118_v17 = vld [vmem:[#allocation4 + $0x150] sm:$0xff]  ;;  %v123_v18 = vld [vmem:[#allocation4 + $0x178] sm:$0xff] }
  0x13   :  { %v2165_v15 = vld [vmem:[#allocation7 + $0x1e0] sm:$0xff]  ;;  %221 = vmatpush.msra.mxu3 %v131_v11  ;;  %v114_v21 = vld [vmem:[#allocation4 + $0x130] sm:$0xff]  ;;  %v119_v23 = vld [vmem:[#allocation4 + $0x158] sm:$0xff] }
  0x14   :  { %153 = vmatpush.msra.mxu1 %v124_v5  ;;  %199 = vmatpush.msra.mxu2 %v126_v10  ;;  %v112_v16 = vld [vmem:[#allocation4 + $0x120] sm:$0xff]  ;;  %v110_v25 = vld [vmem:[#allocation4 + $0x110] sm:$0xff]  ;;  %v115_v27 = vld [vmem:[#allocation4 + $0x138] sm:$0xff] }
  0x15   :  { %320 = vmatpush.msra.mxu0 %v2165_v15  ;;  %v2168_v19 = vld [vmem:[#allocation7 + $0x1c0] sm:$0xff]  ;;  %222 = vmatpush.msra.mxu3 %v127_v14  ;;  %v106_v30 = vld [vmem:[#allocation4 + $0xf0] sm:$0xff]  ;;  %v111_v31 = vld [vmem:[#allocation4 + $0x118] sm:$0xff] }
  0x16   :  { %154 = vmatpush.msra.mxu1 %v120_v9  ;;  %200 = vmatpush.msra.mxu2 %v122_v13  ;;  %v108_v20 = vld [vmem:[#allocation4 + $0x100] sm:$0xff]  ;;  %v102_v34 = vld [vmem:[#allocation4 + $0xd0] sm:$0xff]  ;;  %v107_v35 = vld [vmem:[#allocation4 + $0xf8] sm:$0xff] }
  0x17   :  { %321 = vmatpush.msra.mxu0 %v2168_v19  ;;  %v2171_v22 = vld [vmem:[#allocation7 + $0x1a0] sm:$0xff]  ;;  %223 = vmatpush.msra.mxu3 %v123_v18  ;;  %v98_v38 = vld [vmem:[#allocation4 + $0xb0] sm:$0xff]  ;;  %v103_v39 = vld [vmem:[#allocation4 + $0xd8] sm:$0xff] }
  0x18   :  { %155 = vmatpush.msra.mxu1 %v116_v12  ;;  %201 = vmatpush.msra.mxu2 %v118_v17  ;;  %v104_v24 = vld [vmem:[#allocation4 + $0xe0] sm:$0xff]  ;;  %v94_v42 = vld [vmem:[#allocation4 + $0x90] sm:$0xff]  ;;  %v99_v43 = vld [vmem:[#allocation4 + $0xb8] sm:$0xff] }
  0x19   :  { %322 = vmatpush.msra.mxu0 %v2171_v22  ;;  %v2174_v26 = vld [vmem:[#allocation7 + $0x180] sm:$0xff]  ;;  %224 = vmatpush.msra.mxu3 %v119_v23  ;;  %v90_v46 = vld [vmem:[#allocation4 + $0x70] sm:$0xff]  ;;  %v95_v47 = vld [vmem:[#allocation4 + $0x98] sm:$0xff] }
  0x1a   :  { %156 = vmatpush.msra.mxu1 %v112_v16  ;;  %202 = vmatpush.msra.mxu2 %v114_v21  ;;  %v2176_v28 = vld [vmem:[#allocation7 + $0x160] sm:$0xff]  ;;  %v86_v50 = vld [vmem:[#allocation4 + $0x50] sm:$0xff]  ;;  %v91_v51 = vld [vmem:[#allocation4 + $0x78] sm:$0xff] }
  0x1b   :  { %v100_v29 = vld [vmem:[#allocation4 + $0xc0] sm:$0xff]  ;;  %323 = vmatpush.msra.mxu0 %v2174_v26  ;;  %225 = vmatpush.msra.mxu3 %v115_v27  ;;  %v82_v54 = vld [vmem:[#allocation4 + $0x30] sm:$0xff]  ;;  %v137_v55 = vld [vmem:[#allocation4 + $0x1e8] sm:$0xff] }
  0x1c   :  { %157 = vmatpush.msra.mxu1 %v108_v20  ;;  %203 = vmatpush.msra.mxu2 %v110_v25  ;;  %v2179_v32 = vld [vmem:[#allocation7 + $0x140] sm:$0xff]  ;;  %v87_v56 = vld [vmem:[#allocation4 + $0x58] sm:$0xff]  ;;  %v78_v57 = vld [vmem:[#allocation4 + $0x10] sm:$0xff] }
  0x1d   :  { %v96_v33 = vld [vmem:[#allocation4 + $0xa0] sm:$0xff]  ;;  %324 = vmatpush.msra.mxu0 %v2176_v28  ;;  %226 = vmatpush.msra.mxu3 %v111_v31  ;;  %v2201_v58 = vld [vmem:[%s3066_s0] sm:$0xff]  ;;  %v133_v60 = vld [vmem:[#allocation4 + $0x1c8] sm:$0xff] }
  0x1e   :  { %158 = vmatpush.msra.mxu1 %v104_v24  ;;  %204 = vmatpush.msra.mxu2 %v106_v30  ;;  %v2182_v36 = vld [vmem:[#allocation7 + $0x120] sm:$0xff]  ;;  %v70_v59 = vld [vmem:[%s3067_s1] sm:$0x3]  ;;  %v83_v62 = vld [vmem:[#allocation4 + $0x38] sm:$0xff]  ;;  %s1696_s1 = sshll.u32 %s3074_s8, 4  ;;  %s1697_s1 = int_to_ptr.hbm [resolvable:$true] %s1696_s1 }
  0x1f   :  { %v92_v37 = vld [vmem:[#allocation4 + $0x80] sm:$0xff]  ;;  %325 = vmatpush.msra.mxu0 %v2179_v32  ;;  %227 = vmatpush.msra.mxu3 %v107_v35  ;;  %v2206_v61 = vld [vmem:[#allocation7 + $0x1f0] sm:$0xff]  ;;  %71 = vst [vmem:[#allocation10] sm:$0x3] %v70_v59  ;;  %v129_v0 = vld [vmem:[#allocation4 + $0x1a8] sm:$0xff] }
  0x20   :  { %159 = vmatpush.msra.mxu1 %v100_v29  ;;  %205 = vmatpush.msra.mxu2 %v102_v34  ;;  %v2185_v40 = vld [vmem:[#allocation7 + $0x100] sm:$0xff]  ;;  %v2210_v1 = vld [vmem:[#allocation7 + $0x1d0] sm:$0xff]  ;;  %v79_v2 = vld [vmem:[#allocation4 + $0x18] sm:$0xff] }
  0x21   :  { %v88_v41 = vld [vmem:[#allocation4 + $0x60] sm:$0xff]  ;;  %326 = vmatpush.msra.mxu0 %v2182_v36  ;;  %228 = vmatpush.msra.mxu3 %v103_v39  ;;  %v125_v4 = vld [vmem:[#allocation4 + $0x188] sm:$0xff]  ;;  %v2216_v5 = vld [vmem:[#allocation7 + $0x1b0] sm:$0xff] }
  0x22   :  { %160 = vmatpush.msra.mxu1 %v96_v33  ;;  %206 = vmatpush.msra.mxu2 %v98_v38  ;;  %v2188_v44 = vld [vmem:[#allocation7 + $0xe0] sm:$0xff]  ;;  %v2220_v6 = vld [vmem:[#allocation7 + $0x1f8] sm:$0xff]  ;;  %v121_v8 = vld [vmem:[#allocation4 + $0x168] sm:$0xff] }
  0x23   :  { %v84_v45 = vld [vmem:[#allocation4 + $0x40] sm:$0xff]  ;;  %327 = vmatpush.msra.mxu0 %v2185_v40  ;;  %229 = vmatpush.msra.mxu3 %v99_v43  ;;  %v2224_v9 = vld [vmem:[#allocation7 + $0x190] sm:$0xff]  ;;  %v2228_v10 = vld [vmem:[#allocation7 + $0x1d8] sm:$0xff] }
  0x24   :  { %161 = vmatpush.msra.mxu1 %v92_v37  ;;  %207 = vmatpush.msra.mxu2 %v94_v42  ;;  %v2191_v48 = vld [vmem:[#allocation7 + $0xc0] sm:$0xff]  ;;  %v117_v12 = vld [vmem:[#allocation4 + $0x148] sm:$0xff]  ;;  %v2233_v13 = vld [vmem:[#allocation7 + $0x170] sm:$0xff] }
  0x25   :  { %v80_v49 = vld [vmem:[#allocation4 + $0x20] sm:$0xff]  ;;  %328 = vmatpush.msra.mxu0 %v2188_v44  ;;  %230 = vmatpush.msra.mxu3 %v95_v47  ;;  %v2237_v14 = vld [vmem:[#allocation7 + $0x1b8] sm:$0xff]  ;;  %v113_v16 = vld [vmem:[#allocation4 + $0x128] sm:$0xff] }
  0x26   :  { %162 = vmatpush.msra.mxu1 %v88_v41  ;;  %208 = vmatpush.msra.mxu2 %v90_v46  ;;  %v2194_v52 = vld [vmem:[#allocation7 + $0xa0] sm:$0xff]  ;;  %v2240_v17 = vld [vmem:[#allocation7 + $0x150] sm:$0xff]  ;;  %v2244_v18 = vld [vmem:[#allocation7 + $0x198] sm:$0xff] }
  0x27   :  { %3172 = vst [vmem:[#allocation17_spill] sm:$0xff] %v2194_v52  ;;  %v76_v53 = vld [vmem:[#allocation4] sm:$0xff]  ;;  %329 = vmatpush.msra.mxu0 %v2191_v48  ;;  %231 = vmatpush.msra.mxu3 %v91_v51  ;;  %v109_v21 = vld [vmem:[#allocation4 + $0x108] sm:$0xff]  ;;  %v2249_v23 = vld [vmem:[#allocation7 + $0x130] sm:$0xff] }
  0x28   :  { %163 = vmatpush.msra.mxu1 %v84_v45  ;;  %209 = vmatpush.msra.mxu2 %v86_v50  ;;  %v2208_v63 = vld [vmem:[#allocation7 + $0x80] sm:$0xff]  ;;  %v2253_v24 = vld [vmem:[#allocation7 + $0x178] sm:$0xff]  ;;  %v2255_v25 = vld [vmem:[#allocation10] sm:$0x3] }
  0x29   :  { %330 = vmatpush.msra.mxu0 %v2194_v52  ;;  %232 = vmatpush.msra.mxu3 %v87_v56  ;;  %3173 = vst [vmem:[#allocation18_spill] sm:$0xff] %v2208_v63  ;;  %v2214_v3 = vld [vmem:[#allocation7 + $0x60] sm:$0xff]  ;;  %v105_v27 = vld [vmem:[#allocation4 + $0xe8] sm:$0xff]  ;;  %v2258_v29 = vld [vmem:[#allocation7 + $0x110] sm:$0xff] }
  0x2a   :  { %164 = vmatpush.msra.mxu1 %v80_v49  ;;  %210 = vmatpush.msra.mxu2 %v82_v54  ;;  %3174 = vst [vmem:[#allocation19_spill] sm:$0xff] %v2214_v3  ;;  %v2222_v7 = vld [vmem:[#allocation7 + $0x40] sm:$0xff]  ;;  %v2262_v30 = vld [vmem:[#allocation7 + $0x158] sm:$0xff]  ;;  %v101_v31 = vld [vmem:[#allocation4 + $0xc8] sm:$0xff] }
  0x2b   :  { %233 = vmatpush.msra.mxu3 %v83_v62  ;;  %331 = vmatpush.msra.mxu0 %v2208_v63  ;;  %3175 = vst [vmem:[#allocation20_spill] sm:$0xff] %v2222_v7  ;;  %v2230_v11 = vld [vmem:[#allocation7 + $0x20] sm:$0xff]  ;;  %v2266_v33 = vld [vmem:[#allocation7 + $0xf0] sm:$0xff]  ;;  %v2269_v34 = vld [vmem:[#allocation7 + $0x138] sm:$0xff] }
  0x2c   :  { %165 = vmatpush.msra.mxu1 %v76_v53  ;;  %211 = vmatpush.msra.mxu2 %v78_v57  ;;  %3176 = vst [vmem:[#allocation21_spill] sm:$0xff] %v2230_v11  ;;  %v2246_v20 = vld [vmem:[#allocation7] sm:$0xff]  ;;  %v2274_v35 = vld [vmem:[%s3066_s0 + $0x8] sm:$0xff]  ;;  %v97_v37 = vld [vmem:[#allocation4 + $0xa8] sm:$0xff] }
  0x2d   :  { %166 = vmatmul.f32.vlgmr.msra.gmra.mxu1 %v2201_v58  ;;  %234 = vmatpush.msra.mxu3 %v79_v2  ;;  %3177 = vst [vmem:[#allocation22_spill] sm:$0xff] %v2246_v20  ;;  %v2277_v38 = vld [vmem:[#allocation7 + $0xd0] sm:$0xff]  ;;  %v2281_v39 = vld [vmem:[#allocation7 + $0x118] sm:$0xff]  ;;  %v93_v41 = vld [vmem:[#allocation4 + $0x88] sm:$0xff] }
  0x2e   :  { %173 = vmatpush.msrb.mxu1 %v137_v55  ;;  %360 = vmatpush.msrb.mxu2 %v2206_v61  ;;  %v2284_v42 = vld [vmem:[#allocation7 + $0xb0] sm:$0xff]  ;;  %v89_v43 = vld [vmem:[#allocation4 + $0x68] sm:$0xff]  ;;  %v2293_v46 = vld [vmem:[#allocation7 + $0xf8] sm:$0xff] }
  0x2f   :  { %332 = vmatpush.msra.mxu0 %v2214_v3  ;;  %380 = vmatpush.msrb.mxu3 %v2220_v6  ;;  %3178 = vst [vmem:[#allocation23_spill] sm:$0xff] %v2284_v42  ;;  %v2289_v45 = vld [vmem:[#allocation7 + $0x90] sm:$0xff]  ;;  %v85_v47 = vld [vmem:[#allocation4 + $0x48] sm:$0xff]  ;;  %v2300_v50 = vld [vmem:[#allocation7 + $0xd8] sm:$0xff] }
  0x30   :  { %174 = vmatpush.msrb.mxu1 %v133_v60  ;;  %361 = vmatpush.msrb.mxu2 %v2210_v1  ;;  %3179 = vst [vmem:[#allocation24_spill] sm:$0xff] %v2289_v45  ;;  %v2296_v49 = vld [vmem:[#allocation7 + $0x70] sm:$0xff]  ;;  %v81_v51 = vld [vmem:[#allocation4 + $0x28] sm:$0xff]  ;;  %v2307_v54 = vld [vmem:[#allocation7 + $0xb8] sm:$0xff] }
  0x31   :  { %333 = vmatpush.msra.mxu0 %v2222_v7  ;;  %381 = vmatpush.msrb.mxu3 %v2228_v10  ;;  %3180 = vst [vmem:[#allocation25_spill] sm:$0xff] %v2296_v49  ;;  %v2303_v53 = vld [vmem:[#allocation7 + $0x50] sm:$0xff]  ;;  %v77_v55 = vld [vmem:[#allocation4 + $0x8] sm:$0xff]  ;;  %v2316_v59 = vld [vmem:[#allocation7 + $0x98] sm:$0xff] }
  0x32   :  { %175 = vmatpush.msrb.mxu1 %v129_v0  ;;  %362 = vmatpush.msrb.mxu2 %v2216_v5  ;;  %3181 = vst [vmem:[#allocation26_spill] sm:$0xff] %v2300_v50  ;;  %v2310_v56 = vld [vmem:[#allocation7 + $0x30] sm:$0xff]  ;;  %v2313_v57 = vld [vmem:[#allocation7 + $0x1e8] sm:$0xff]  ;;  %v2325_v0 = vld [vmem:[#allocation7 + $0x78] sm:$0xff] }
  0x33   :  { %334 = vmatpush.msra.mxu0 %v2230_v11  ;;  %382 = vmatpush.msrb.mxu3 %v2237_v14  ;;  %3182 = vst [vmem:[#allocation27_spill] sm:$0xff] %v2303_v53  ;;  %v2319_v60 = vld [vmem:[#allocation7 + $0x10] sm:$0xff]  ;;  %v2322_v62 = vld [vmem:[#allocation7 + $0x1c8] sm:$0xff] }
  0x34   :  { %176 = vmatpush.msrb.mxu1 %v125_v4  ;;  %363 = vmatpush.msrb.mxu2 %v2224_v9  ;;  %3183 = vst [vmem:[#allocation28_spill] sm:$0xff] %v2307_v54  ;;  %v2329_v2 = vld [vmem:[#allocation7 + $0x1a8] sm:$0xff]  ;;  %v2333_v4 = vld [vmem:[#allocation7 + $0x58] sm:$0xff] }
  0x35   :  { %212 = vmatmul.f32.vlgmr.msra.gmra.mxu2 %v2201_v58  ;;  %383 = vmatpush.msrb.mxu3 %v2244_v18  ;;  %3184 = vst [vmem:[#allocation29_spill] sm:$0xff] %v2310_v56 }
  0x36   :  { %177 = vmatpush.msrb.mxu1 %v121_v8  ;;  %364 = vmatpush.msrb.mxu2 %v2233_v13  ;;  %3185 = vst [vmem:[#allocation30_spill] sm:$0xff] %v2316_v59  ;;  %v2337_v8 = vld [vmem:[#allocation7 + $0x188] sm:$0xff] }
  0x37   :  { %335 = vmatpush.msra.mxu0 %v2246_v20  ;;  %384 = vmatpush.msrb.mxu3 %v2253_v24  ;;  %3186 = vst [vmem:[#allocation31_spill] sm:$0xff] %v2319_v60 }
  0x38   :  { %178 = vmatpush.msrb.mxu1 %v117_v12  ;;  %365 = vmatpush.msrb.mxu2 %v2240_v17  ;;  %3187 = vst [vmem:[#allocation32_spill] sm:$0xff] %v2325_v0  ;;  %v2340_v12 = vld [vmem:[#allocation7 + $0x38] sm:$0xff] }
  0x39   :  { %336 = vmatmul.f32.vlgmr.msra.gmra.mxu0 %v2255_v25  ;;  %385 = vmatpush.msrb.mxu3 %v2262_v30  ;;  %3188 = vst [vmem:[#allocation33_spill] sm:$0xff] %v2333_v4 }
  0x3a   :  { %179 = vmatpush.msrb.mxu1 %v113_v16  ;;  %366 = vmatpush.msrb.mxu2 %v2249_v23  ;;  %3189 = vst [vmem:[#allocation34_spill] sm:$0xff] %v2340_v12  ;;  %v2345_v16 = vld [vmem:[#allocation7 + $0x168] sm:$0xff] }
  0x3b   :  { %169 = vmatmul.f32.gmra.mxu1 %v2274_v35  ;;  %386 = vmatpush.msrb.mxu3 %v2269_v34 }
  0x3c   :  { %180 = vmatpush.msrb.mxu1 %v109_v21  ;;  %367 = vmatpush.msrb.mxu2 %v2258_v29  ;;  %v2347_v21 = vld [vmem:[#allocation7 + $0x18] sm:$0xff] }
  0x3d   :  { %215 = vmatmul.f32.gmra.mxu2 %v2274_v35  ;;  %387 = vmatpush.msrb.mxu3 %v2281_v39  ;;  %3190 = vst [vmem:[#allocation35_spill] sm:$0xff] %v2347_v21 }
  0x3e   :  { %181 = vmatpush.msrb.mxu1 %v105_v27  ;;  %368 = vmatpush.msrb.mxu2 %v2266_v33  ;;  %v2353_v27 = vld [vmem:[#allocation7 + $0x148] sm:$0xff] }
  0x3f   :  { %472 = vmatpush.msrb.mxu0 %v2165_v15  ;;  %235 = vmatmul.f32.vlgmr.msra.gmra.mxu3 %v2201_v58 }
  0x40   :  { %182 = vmatpush.msrb.mxu1 %v101_v31  ;;  %369 = vmatpush.msrb.mxu2 %v2277_v38  ;;  %v2365_v31 = vld [vmem:[#allocation7 + $0x108] sm:$0xff] }
  0x41   :  { %473 = vmatpush.msrb.mxu0 %v2168_v19  ;;  %388 = vmatpush.msrb.mxu3 %v2293_v46 }
  0x42   :  { %183 = vmatpush.msrb.mxu1 %v97_v37  ;;  %370 = vmatpush.msrb.mxu2 %v2284_v42  ;;  %v2371_v37 = vld [vmem:[#allocation7 + $0xe8] sm:$0xff] }
  0x43   :  { %474 = vmatpush.msrb.mxu0 %v2171_v22  ;;  %389 = vmatpush.msrb.mxu3 %v2300_v50 }
  0x44   :  { %184 = vmatpush.msrb.mxu1 %v93_v41  ;;  %371 = vmatpush.msrb.mxu2 %v2289_v45  ;;  %v2377_v41 = vld [vmem:[#allocation7 + $0xc8] sm:$0xff] }
  0x45   :  { %475 = vmatpush.msrb.mxu0 %v2174_v26  ;;  %390 = vmatpush.msrb.mxu3 %v2307_v54 }
  0x46   :  { %185 = vmatpush.msrb.mxu1 %v89_v43  ;;  %372 = vmatpush.msrb.mxu2 %v2296_v49  ;;  %v2389_v43 = vld [vmem:[#allocation7 + $0x88] sm:$0xff] }
  0x47   :  { %476 = vmatpush.msrb.mxu0 %v2176_v28  ;;  %391 = vmatpush.msrb.mxu3 %v2316_v59  ;;  %3192 = vst [vmem:[#allocation37_spill] sm:$0xff] %v2389_v43 }
  0x48   :  { %186 = vmatpush.msrb.mxu1 %v85_v47  ;;  %373 = vmatpush.msrb.mxu2 %v2303_v53  ;;  %v2395_v47 = vld [vmem:[#allocation7 + $0x68] sm:$0xff] }
  0x49   :  { %238 = vmatmul.f32.gmra.mxu3 %v2274_v35  ;;  %477 = vmatpush.msrb.mxu0 %v2179_v32  ;;  %3193 = vst [vmem:[#allocation38_spill] sm:$0xff] %v2395_v47 }
  0x4a   :  { %187 = vmatpush.msrb.mxu1 %v81_v51  ;;  %374 = vmatpush.msrb.mxu2 %v2310_v56  ;;  %v2401_v51 = vld [vmem:[#allocation7 + $0x48] sm:$0xff] }
  0x4b   :  { %392 = vmatpush.msrb.mxu3 %v2325_v0  ;;  %478 = vmatpush.msrb.mxu0 %v2182_v36  ;;  %3194 = vst [vmem:[#allocation39_spill] sm:$0xff] %v2401_v51 }
  0x4c   :  { %188 = vmatpush.msrb.mxu1 %v77_v55  ;;  %375 = vmatpush.msrb.mxu2 %v2319_v60  ;;  %v2407_v55 = vld [vmem:[#allocation7 + $0x28] sm:$0xff] }
  0x4d   :  { %376 = vmatmul.f32.vlgmr.msrb.gmra.mxu2 %v2255_v25  ;;  %189 = vmatmul.f32.vlgmr.msrb.gmra.mxu1 %v2201_v58  ;;  %v2359_v58 = vld [vmem:[#allocation7 + $0x128] sm:$0xff]  ;;  %3195 = vst [vmem:[#allocation40_spill] sm:$0xff] %v2407_v55 }
  0x4e   :  { %340 = vmatpush.msra.mxu1 %v2313_v57  ;;  %393 = vmatpush.msrb.mxu3 %v2333_v4 }
  0x4f   :  { %512 = vmatpush.msra.mxu2 %v2206_v61  ;;  %479 = vmatpush.msrb.mxu0 %v2185_v40 }
  0x50   :  { %341 = vmatpush.msra.mxu1 %v2322_v62  ;;  %394 = vmatpush.msrb.mxu3 %v2340_v12 }
  0x51   :  { %513 = vmatpush.msra.mxu2 %v2210_v1  ;;  %480 = vmatpush.msrb.mxu0 %v2188_v44 }
  0x52   :  { %342 = vmatpush.msra.mxu1 %v2329_v2  ;;  %395 = vmatpush.msrb.mxu3 %v2347_v21 }
  0x53   :  { %396 = vmatmul.f32.vlgmr.msrb.gmra.mxu3 %v2255_v25  ;;  %514 = vmatpush.msra.mxu2 %v2216_v5 }
  0x54   :  { %343 = vmatpush.msra.mxu1 %v2337_v8  ;;  %532 = vmatpush.msra.mxu3 %v2220_v6 }
  0x55   :  { %192 = vmatmul.f32.gmra.mxu1 %v2274_v35  ;;  %515 = vmatpush.msra.mxu2 %v2224_v9  ;;  %v2383_v35 = vld [vmem:[#allocation7 + $0xa8] sm:$0xff] }
  0x56   :  { %344 = vmatpush.msra.mxu1 %v2345_v16  ;;  %533 = vmatpush.msra.mxu3 %v2228_v10  ;;  %3191 = vst [vmem:[#allocation36_spill] sm:$0xff] %v2383_v35 }
  0x57   :  { %516 = vmatpush.msra.mxu2 %v2233_v13  ;;  %481 = vmatpush.msrb.mxu0 %v2191_v48 }
  0x58   :  { %345 = vmatpush.msra.mxu1 %v2353_v27  ;;  %534 = vmatpush.msra.mxu3 %v2237_v14 }
  0x59   :  { %517 = vmatpush.msra.mxu2 %v2240_v17  ;;  %482 = vmatpush.msrb.mxu0 %v2194_v52 }
  0x5a   :  { %346 = vmatpush.msra.mxu1 %v2359_v58  ;;  %535 = vmatpush.msra.mxu3 %v2244_v18 }
  0x5b   :  { %518 = vmatpush.msra.mxu2 %v2249_v23  ;;  %483 = vmatpush.msrb.mxu0 %v2208_v63  ;;  %v2413_v63 = vld [vmem:[#allocation7 + $0x8] sm:$0xff] }
  0x5c   :  { %347 = vmatpush.msra.mxu1 %v2365_v31  ;;  %536 = vmatpush.msra.mxu3 %v2253_v24  ;;  %3196 = vst [vmem:[#allocation41_spill] sm:$0xff] %v2413_v63 }
  0x5d   :  { %519 = vmatpush.msra.mxu2 %v2258_v29  ;;  %484 = vmatpush.msrb.mxu0 %v2214_v3 }
  0x5e   :  { %348 = vmatpush.msra.mxu1 %v2371_v37  ;;  %537 = vmatpush.msra.mxu3 %v2262_v30 }
  0x5f   :  { %520 = vmatpush.msra.mxu2 %v2266_v33  ;;  %485 = vmatpush.msrb.mxu0 %v2222_v7 }
  0x60   :  { %349 = vmatpush.msra.mxu1 %v2377_v41  ;;  %538 = vmatpush.msra.mxu3 %v2269_v34 }
  0x61   :  { %521 = vmatpush.msra.mxu2 %v2277_v38  ;;  %486 = vmatpush.msrb.mxu0 %v2230_v11 }
  0x62   :  { %350 = vmatpush.msra.mxu1 %v2383_v35  ;;  %539 = vmatpush.msra.mxu3 %v2281_v39 }
  0x63   :  { %522 = vmatpush.msra.mxu2 %v2284_v42  ;;  %487 = vmatpush.msrb.mxu0 %v2246_v20 }
  0x64   :  { %351 = vmatpush.msra.mxu1 %v2389_v43  ;;  %540 = vmatpush.msra.mxu3 %v2293_v46 }
  0x65   :  { %523 = vmatpush.msra.mxu2 %v2289_v45  ;;  %642 = vmatpush.msra.mxu0 %v2165_v15 }
  0x66   :  { %352 = vmatpush.msra.mxu1 %v2395_v47  ;;  %541 = vmatpush.msra.mxu3 %v2300_v50 }
  0x67   :  { %524 = vmatpush.msra.mxu2 %v2296_v49  ;;  %643 = vmatpush.msra.mxu0 %v2168_v19 }
  0x68   :  { %353 = vmatpush.msra.mxu1 %v2401_v51  ;;  %542 = vmatpush.msra.mxu3 %v2307_v54 }
  0x69   :  { %525 = vmatpush.msra.mxu2 %v2303_v53  ;;  %644 = vmatpush.msra.mxu0 %v2171_v22 }
  0x6a   :  { %354 = vmatpush.msra.mxu1 %v2407_v55  ;;  %543 = vmatpush.msra.mxu3 %v2316_v59 }
  0x6b   :  { %526 = vmatpush.msra.mxu2 %v2310_v56  ;;  %645 = vmatpush.msra.mxu0 %v2174_v26 }
  0x6c   :  { %355 = vmatpush.msra.mxu1 %v2413_v63  ;;  %544 = vmatpush.msra.mxu3 %v2325_v0 }
  0x6d   :  { %356 = vmatmul.f32.vlgmr.msra.gmra.mxu1 %v2255_v25  ;;  %527 = vmatpush.msra.mxu2 %v2319_v60  ;;  %v3197_v25 = vld [vmem:[#allocation18_spill] sm:$0xff] }
  0x6e   :  { %492 = vmatpush.msrb.mxu1 %v2313_v57  ;;  %545 = vmatpush.msra.mxu3 %v2333_v4 }
  0x6f   :  { %682 = vmatpush.msrb.mxu2 %v2206_v61  ;;  %646 = vmatpush.msra.mxu0 %v2176_v28 }
  0x70   :  { %493 = vmatpush.msrb.mxu1 %v2322_v62  ;;  %546 = vmatpush.msra.mxu3 %v2340_v12 }
  0x71   :  { %683 = vmatpush.msrb.mxu2 %v2210_v1  ;;  %647 = vmatpush.msra.mxu0 %v2179_v32 }
  0x72   :  { %494 = vmatpush.msrb.mxu1 %v2329_v2  ;;  %547 = vmatpush.msra.mxu3 %v2347_v21 }
  0x73   :  { %684 = vmatpush.msrb.mxu2 %v2216_v5  ;;  %648 = vmatpush.msra.mxu0 %v2182_v36 }
  0x74   :  { %495 = vmatpush.msrb.mxu1 %v2337_v8  ;;  %702 = vmatpush.msrb.mxu3 %v2220_v6 }
  0x75   :  { %685 = vmatpush.msrb.mxu2 %v2224_v9  ;;  %649 = vmatpush.msra.mxu0 %v2185_v40 }
  0x76   :  { %496 = vmatpush.msrb.mxu1 %v2345_v16  ;;  %703 = vmatpush.msrb.mxu3 %v2228_v10 }
  0x77   :  { %686 = vmatpush.msrb.mxu2 %v2233_v13  ;;  %650 = vmatpush.msra.mxu0 %v2188_v44 }
  0x78   :  { %497 = vmatpush.msrb.mxu1 %v2353_v27  ;;  %704 = vmatpush.msrb.mxu3 %v2237_v14 }
  0x79   :  { %687 = vmatpush.msrb.mxu2 %v2240_v17  ;;  %651 = vmatpush.msra.mxu0 %v2191_v48 }
  0x7a   :  { %498 = vmatpush.msrb.mxu1 %v2359_v58  ;;  %705 = vmatpush.msrb.mxu3 %v2244_v18 }
  0x7b   :  { %688 = vmatpush.msrb.mxu2 %v2249_v23  ;;  %652 = vmatpush.msra.mxu0 %v2194_v52 }
  0x7c   :  { %499 = vmatpush.msrb.mxu1 %v2365_v31  ;;  %706 = vmatpush.msrb.mxu3 %v2253_v24 }
  0x7d   :  { %689 = vmatpush.msrb.mxu2 %v2258_v29  ;;  %653 = vmatpush.msra.mxu0 %v3197_v25 }
  0x7e   :  { %500 = vmatpush.msrb.mxu1 %v2371_v37  ;;  %707 = vmatpush.msrb.mxu3 %v2262_v30 }
  0x7f   :  { %690 = vmatpush.msrb.mxu2 %v2266_v33  ;;  %654 = vmatpush.msra.mxu0 %v2214_v3 }
  0x80   :  { %501 = vmatpush.msrb.mxu1 %v2377_v41  ;;  %708 = vmatpush.msrb.mxu3 %v2269_v34 }
  0x81   :  { %691 = vmatpush.msrb.mxu2 %v2277_v38  ;;  %655 = vmatpush.msra.mxu0 %v2222_v7 }
  0x82   :  { %502 = vmatpush.msrb.mxu1 %v2383_v35  ;;  %709 = vmatpush.msrb.mxu3 %v2281_v39 }
  0x83   :  { %692 = vmatpush.msrb.mxu2 %v2284_v42  ;;  %656 = vmatpush.msra.mxu0 %v2230_v11 }
  0x84   :  { %503 = vmatpush.msrb.mxu1 %v2389_v43  ;;  %710 = vmatpush.msrb.mxu3 %v2293_v46 }
  0x85   :  { %693 = vmatpush.msrb.mxu2 %v2289_v45  ;;  %657 = vmatpush.msra.mxu0 %v2246_v20 }
  0x86   :  { %504 = vmatpush.msrb.mxu1 %v2395_v47  ;;  %711 = vmatpush.msrb.mxu3 %v2300_v50 }
  0x87   :  { %694 = vmatpush.msrb.mxu2 %v2296_v49 }
  0x88   :  { %505 = vmatpush.msrb.mxu1 %v2401_v51  ;;  %712 = vmatpush.msrb.mxu3 %v2307_v54 }
  0x89   :  { %695 = vmatpush.msrb.mxu2 %v2303_v53 }
  0x8a   :  { %506 = vmatpush.msrb.mxu1 %v2407_v55  ;;  %713 = vmatpush.msrb.mxu3 %v2316_v59 }
  0x8b   :  { %696 = vmatpush.msrb.mxu2 %v2310_v56 }
  0x8c   :  { %507 = vmatpush.msrb.mxu1 %v2413_v63  ;;  %714 = vmatpush.msrb.mxu3 %v2325_v0 }
  0x8d   :  { %697 = vmatpush.msrb.mxu2 %v2319_v60 }
  0x8e   :  { %662 = vmatpush.msra.mxu1 %v2313_v57  ;;  %715 = vmatpush.msrb.mxu3 %v2333_v4 }
  0x90   :  { %663 = vmatpush.msra.mxu1 %v2322_v62  ;;  %716 = vmatpush.msrb.mxu3 %v2340_v12 }
  0x92   :  { %664 = vmatpush.msra.mxu1 %v2329_v2  ;;  %717 = vmatpush.msrb.mxu3 %v2347_v21  ;;  %v140_v21 = vld [vmem:[%s3070_s4] sm:$0xf] }
  0x93   :  { %v142_v60 = vperm.slane %v140_v21, 0  ;;  %v144_v56 = vperm.slane %v140_v21, 2  ;;  %v145_v49 = vperm.slane %v140_v21, 3 }
  0x94   :  { %665 = vmatpush.msra.mxu1 %v2337_v8 }
  0x96   :  { %666 = vmatpush.msra.mxu1 %v2345_v16 }
  0x98   :  { %667 = vmatpush.msra.mxu1 %v2353_v27 }
  0x9a   :  { %668 = vmatpush.msra.mxu1 %v2359_v58 }
  0x9c   :  { %669 = vmatpush.msra.mxu1 %v2365_v31 }
  0x9e   :  { %670 = vmatpush.msra.mxu1 %v2371_v37 }
  0xa0   :  { %671 = vmatpush.msra.mxu1 %v2377_v41 }
  0xa2   :  { %672 = vmatpush.msra.mxu1 %v2383_v35 }
  0xa4   :  { %673 = vmatpush.msra.mxu1 %v2389_v43 }
  0xa6   :  { %674 = vmatpush.msra.mxu1 %v2395_v47 }
  0xa8   :  { %675 = vmatpush.msra.mxu1 %v2401_v51 }
  0xaa   :  { %676 = vmatpush.msra.mxu1 %v2407_v55  ;;  %v167_v20 = vpop.f32.mrf.mxu1  ;;  %v143_v55 = vperm.slane %v140_v21, 1 }
  0xab   :  { %v168_v12 = vadd.f32 %v167_v20, %v142_v60 }
  0xac   :  { %677 = vmatpush.msra.mxu1 %v2413_v63 }
  0xad   :  { %242 = vst [vmem:[#allocation2 + $0x30] sm:$0xff] %v168_v12 }
  0xb4   :  { %v316_v45 = vld [vmem:[#allocation2 + $0x30] sm:$0x3] }
  0xb6   :  { %v337_v20 = vpop.f32.mrf.mxu0 }
  0xb8   :  { %v213_v11 = vpop.f32.mrf.mxu2  ;;  %v170_v4 = vpop.f32.mrf.mxu1 }
  0xb9   :  { %v214_v53 = vadd.f32 %v213_v11, %v144_v56  ;;  %v171_v7 = vadd.f32 %v170_v4, %v142_v60  ;;  %v72_v11 = vld [vmem:[%s3068_s2] sm:$0x3] }
  0xba   :  { %73 = vst [vmem:[#allocation12] sm:$0x3] %v72_v11 }
  0xbb   :  { %244 = vst [vmem:[#allocation2 + $0x18] sm:$0xff] %v214_v53 }
  0xbc   :  { %246 = vst [vmem:[#allocation2 + $0x8] sm:$0xff] %v171_v7  ;;  %v400_v7 = vadd.f32 %v337_v20, %v316_v45 }
  0xbe   :  { %v1741_v60 = vmul.f32 -1.442695, %v400_v7 }
  0xc0   :  { %v216_v0 = vpop.f32.mrf.mxu2  ;;  %1775 = vpow2.f32 %v1741_v60 }
  0xc1   :  { %v217_v47 = vadd.f32 %v216_v0, %v144_v56  ;;  %v251_v35 = vld [vmem:[#allocation12] sm:$0x3] }
  0xc2   :  { %v236_v51 = vpop.f32.mrf.mxu3 }
  0xc3   :  { %248 = vst [vmem:[#allocation2 + $0x28] sm:$0xff] %v217_v47  ;;  %v237_v3 = vadd.f32 %v236_v51, %v145_v49 }
  0xc5   :  { %245 = vst [vmem:[#allocation2 + $0x10] sm:$0xff] %v237_v3 }
  0xca   :  { %v190_v59 = vpop.f32.mrf.mxu1 }
  0xcb   :  { %v191_v63 = vadd.f32 %v190_v59, %v143_v55  ;;  %v1776_v59 = vpop.eup %1775 }
  0xcc   :  { %v239_v12 = vpop.f32.mrf.mxu3  ;;  %v319_v3 = vld [vmem:[#allocation2 + $0x10] sm:$0x3]  ;;  %v407_v21 = vadd.f32 1.0, %v1776_v59 }
  0xcd   :  { %243 = vst [vmem:[#allocation2] sm:$0xff] %v191_v63  ;;  %v240_v43 = vadd.f32 %v239_v12, %v145_v49 }
  0xce   :  { %1777 = vrcp.f32 %v407_v21  ;;  %vm413_vm0 = vweird.f32 %v407_v21 }
  0xcf   :  { %249 = vst [vmem:[#allocation2 + $0x38] sm:$0xff] %v240_v43 }
  0xd0   :  { %v377_v60 = vpop.f32.mrf.mxu2 }
  0xd2   :  { %v193_v53 = vpop.f32.mrf.mxu1 }
  0xd3   :  { %v194_v56 = vadd.f32 %v193_v53, %v143_v55 }
  0xd4   :  { %v317_v49 = vld [vmem:[#allocation2] sm:$0x3]  ;;  %v1778_v45 = vpop.eup %1777 }
  0xd5   :  { %247 = vst [vmem:[#allocation2 + $0x20] sm:$0xff] %v194_v56  ;;  %v409_v20 = vmul.f32 %v1778_v45, %v407_v21  ;;  %v318_v56 = vld [vmem:[#allocation2 + $0x18] sm:$0x3]  ;;  %vm414_vm1 = vweird.f32 %v1778_v45 }
  0xd6   :  { %v397_v0 = vpop.f32.mrf.mxu3  ;;  %vm2518_vm2 = vmor %vm413_vm0, %vm414_vm1 }
  0xd7   :  { %v403_v4 = vadd.f32 %v397_v0, %v319_v3  ;;  %v410_v53 = vsub.f32 1.0, %v409_v20  ;;  %v402_v0 = vadd.f32 %v377_v60, %v318_v56 }
  0xd9   :  { %v1743_v63 = vmul.f32 -1.442695, %v403_v4  ;;  %v411_v3 = vmul.f32 %v1778_v45, %v410_v53 }
  0xdb   :  { %1779 = vpow2.f32 %v1743_v63  ;;  %v417_v63 = vand.u32 2147483647, %v407_v21 }
  0xdd   :  { %vm418_vm3 = vcmp.eq.f32.partialorder %v417_v63, 8.507059e+37 }
  0xe1   :  { %v1780_v43 = vpop.eup %1779 }
  0xe2   :  { %v446_v55 = vadd.f32 1.0, %v1780_v43 }
  0xe4   :  { %vm452_vm8 = vweird.f32 %v446_v55 }
  0xea   :  { %v357_v47 = vpop.f32.mrf.mxu1 }
  0xeb   :  { %v401_v51 = vadd.f32 %v357_v47, %v317_v49  ;;  %v419_v49 = vand.u32 2147483648, %v407_v21  ;;  %v412_v47 = vadd.f32 %v1778_v45, %v411_v3 }
  0xed   :  { %v1742_v12 = vmul.f32 -1.442695, %v401_v51  ;;  %v416_v53 = vsel %vm2518_vm2, %v1778_v45, %v412_v47  ;;  %v458_v45 = vand.u32 2147483648, %v446_v55 }
  0xef   :  { %1781 = vpow2.f32 %v1742_v12 }
  0xf0   :  { %1783 = vrcp.f32 %v446_v55 }
  0xf5   :  { %v1782_v11 = vpop.eup %1781 }
  0xf6   :  { %v426_v7 = vadd.f32 1.0, %v1782_v11  ;;  %v1784_v59 = vpop.eup %1783  ;;  %v420_v11 = vor.u32 1.1754944e-38, %v419_v49 }
  0xf7   :  { %v448_v43 = vmul.f32 %v1784_v59, %v446_v55  ;;  %vm453_vm9 = vweird.f32 %v1784_v59 }
  0xf8   :  { %1785 = vrcp.f32 %v426_v7  ;;  %v438_v25 = vand.u32 2147483648, %v426_v7  ;;  %v436_v60 = vand.u32 2147483647, %v426_v7  ;;  %vm432_vm5 = vweird.f32 %v426_v7  ;;  %vm454_vm10 = vmor %vm452_vm8, %vm453_vm9 }
  0xf9   :  { %1787 = vtanh.f32 %v402_v0  ;;  %v449_v54 = vsub.f32 1.0, %v448_v43  ;;  %v421_v42 = vsel %vm418_vm3, %v420_v11, %v416_v53  ;;  %v456_v43 = vand.u32 2147483647, %v446_v55 }
  0xfa   :  { %v439_v52 = vor.u32 1.1754944e-38, %v438_v25  ;;  %vm437_vm7 = vcmp.eq.f32.partialorder %v436_v60, 8.507059e+37 }
  0xfb   :  { %vm457_vm11 = vcmp.eq.f32.partialorder %v456_v43, 8.507059e+37 }
  0xfe   :  { %v1786_v4 = vpop.eup %1785 }
  0xff   :  { %v428_v51 = vmul.f32 %v1786_v4, %v426_v7  ;;  %vm433_vm4 = vweird.f32 %v1786_v4  ;;  %v1788_v3 = vpop.eup %1787  ;;  %v459_v7 = vor.u32 1.1754944e-38, %v458_v45 }
 0x100   :  { %vm434_vm6 = vmor %vm432_vm5, %vm433_vm4  ;;  %v463_v49 = vmul.f32 %v1788_v3, %v421_v42 }
 0x101   :  { %v429_v20 = vsub.f32 1.0, %v428_v51  ;;  %v450_v51 = vmul.f32 %v1784_v59, %v449_v54  ;;  %v469_v54 = vld [vmem:[#allocation2] sm:$0xc] }
 0x103   :  { %v430_v56 = vmul.f32 %v1786_v4, %v429_v20  ;;  %v451_v12 = vadd.f32 %v1784_v59, %v450_v51 }
 0x105   :  { %v431_v21 = vadd.f32 %v1786_v4, %v430_v56  ;;  %v455_v20 = vsel %vm454_vm10, %v1784_v59, %v451_v12 }
 0x107   :  { %v435_v0 = vsel %vm434_vm6, %v1786_v4, %v431_v21  ;;  %v460_v4 = vsel %vm457_vm11, %v459_v7, %v455_v20  ;;  %v471_v21 = vld [vmem:[#allocation2 + $0x10] sm:$0xc]  ;;  %v470_v20 = vld [vmem:[#allocation2 + $0x18] sm:$0xc] }
 0x108   :  { %v440_v63 = vsel %vm437_vm7, %v439_v52, %v435_v0  ;;  %v3210_v52 = vld [vmem:[#allocation38_spill] sm:$0xff] }
 0x109   :  { %v462_v50 = vmul.f32 %v440_v63, %v251_v35 }
 0x10b   :  { %v2524_v47 = vadd.f32 %v463_v49, %v462_v50  ;;  %v468_v50 = vld [vmem:[#allocation2 + $0x30] sm:$0xc] }
 0x10d   :  { %1789 = vtanh.f32 %v2524_v47 }
 0x113   :  { %v1790_v25 = vpop.eup %1789 }
 0x114   :  { %v466_v11 = vmul.f32 %v1790_v25, %v460_v4 }
 0x116   :  { %467 = vst [vmem:[#allocation3] sm:$0x3] %v466_v11  ;;  %488 = vmatmul.f32.vlgmr.msrb.gmra.mxu0 %v466_v11  ;;  %508 = vmatmul.f32.vlgmr.msrb.gmra.mxu1 %v466_v11 }
 0x117   :  { %528 = vmatmul.f32.vlgmr.msra.gmra.mxu2 %v466_v11  ;;  %548 = vmatmul.f32.vlgmr.msra.gmra.mxu3 %v466_v11 }
 0x118   :  { %812 = vmatpush.msrb.mxu0 %v2165_v15  ;;  %832 = vmatpush.msrb.mxu1 %v2313_v57  ;;  %v3200_v15 = vld [vmem:[#allocation26_spill] sm:$0xff] }
 0x119   :  { %852 = vmatpush.msra.mxu2 %v2206_v61  ;;  %872 = vmatpush.msra.mxu3 %v2220_v6  ;;  %v3211_v61 = vld [vmem:[#allocation25_spill] sm:$0xff]  ;;  %v3214_v6 = vld [vmem:[#allocation39_spill] sm:$0xff] }
 0x11a   :  { %813 = vmatpush.msrb.mxu0 %v2168_v19  ;;  %833 = vmatpush.msrb.mxu1 %v2322_v62  ;;  %v3201_v19 = vld [vmem:[#allocation17_spill] sm:$0xff] }
 0x11b   :  { %853 = vmatpush.msra.mxu2 %v2210_v1  ;;  %873 = vmatpush.msra.mxu3 %v2228_v10  ;;  %v3212_v1 = vld [vmem:[#allocation32_spill] sm:$0xff]  ;;  %v3216_v10 = vld [vmem:[#allocation33_spill] sm:$0xff] }
 0x11c   :  { %814 = vmatpush.msrb.mxu0 %v2171_v22  ;;  %834 = vmatpush.msrb.mxu1 %v2329_v2  ;;  %v3202_v22 = vld [vmem:[#allocation36_spill] sm:$0xff] }
 0x11d   :  { %854 = vmatpush.msra.mxu2 %v2216_v5  ;;  %874 = vmatpush.msra.mxu3 %v2237_v14  ;;  %v3213_v5 = vld [vmem:[#allocation20_spill] sm:$0xff] }
 0x11e   :  { %815 = vmatpush.msrb.mxu0 %v2174_v26  ;;  %835 = vmatpush.msrb.mxu1 %v2337_v8  ;;  %v3203_v26 = vld [vmem:[#allocation23_spill] sm:$0xff]  ;;  %v3218_v14 = vld [vmem:[#allocation40_spill] sm:$0xff] }
 0x11f   :  { %855 = vmatpush.msra.mxu2 %v2224_v9  ;;  %875 = vmatpush.msra.mxu3 %v2244_v18  ;;  %v3215_v9 = vld [vmem:[#allocation27_spill] sm:$0xff]  ;;  %v3220_v18 = vld [vmem:[#allocation34_spill] sm:$0xff] }
 0x120   :  { %816 = vmatpush.msrb.mxu0 %v2176_v28  ;;  %836 = vmatpush.msrb.mxu1 %v2345_v16  ;;  %v3204_v28 = vld [vmem:[#allocation28_spill] sm:$0xff] }
 0x121   :  { %856 = vmatpush.msra.mxu2 %v2233_v13  ;;  %876 = vmatpush.msra.mxu3 %v2253_v24  ;;  %v3217_v13 = vld [vmem:[#allocation21_spill] sm:$0xff] }
 0x122   :  { %817 = vmatpush.msrb.mxu0 %v2179_v32  ;;  %837 = vmatpush.msrb.mxu1 %v2353_v27  ;;  %v3205_v32 = vld [vmem:[#allocation18_spill] sm:$0xff]  ;;  %v3222_v24 = vld [vmem:[#allocation41_spill] sm:$0xff] }
 0x123   :  { %857 = vmatpush.msra.mxu2 %v2240_v17  ;;  %877 = vmatpush.msra.mxu3 %v2262_v30  ;;  %v3219_v17 = vld [vmem:[#allocation29_spill] sm:$0xff]  ;;  %v3224_v30 = vld [vmem:[#allocation35_spill] sm:$0xff] }
 0x124   :  { %818 = vmatpush.msrb.mxu0 %v2182_v36  ;;  %838 = vmatpush.msrb.mxu1 %v2359_v58  ;;  %v3206_v36 = vld [vmem:[#allocation37_spill] sm:$0xff] }
 0x125   :  { %858 = vmatpush.msra.mxu2 %v2249_v23  ;;  %878 = vmatpush.msra.mxu3 %v2269_v34  ;;  %v3221_v23 = vld [vmem:[#allocation22_spill] sm:$0xff] }
 0x126   :  { %819 = vmatpush.msrb.mxu0 %v2185_v40  ;;  %839 = vmatpush.msrb.mxu1 %v2365_v31  ;;  %v3207_v40 = vld [vmem:[#allocation24_spill] sm:$0xff] }
 0x127   :  { %859 = vmatpush.msra.mxu2 %v2258_v29  ;;  %879 = vmatpush.msra.mxu3 %v2281_v39  ;;  %v3223_v29 = vld [vmem:[#allocation31_spill] sm:$0xff] }
 0x128   :  { %820 = vmatpush.msrb.mxu0 %v2188_v44  ;;  %840 = vmatpush.msrb.mxu1 %v2371_v37  ;;  %v3208_v44 = vld [vmem:[#allocation30_spill] sm:$0xff] }
 0x129   :  { %860 = vmatpush.msra.mxu2 %v2266_v33  ;;  %880 = vmatpush.msra.mxu3 %v2293_v46 }
 0x12a   :  { %821 = vmatpush.msrb.mxu0 %v2191_v48  ;;  %841 = vmatpush.msrb.mxu1 %v2377_v41  ;;  %v3209_v48 = vld [vmem:[#allocation19_spill] sm:$0xff] }
 0x12b   :  { %861 = vmatpush.msra.mxu2 %v2277_v38  ;;  %881 = vmatpush.msra.mxu3 %v3200_v15 }
 0x12c   :  { %822 = vmatpush.msrb.mxu0 %v3201_v19  ;;  %842 = vmatpush.msrb.mxu1 %v3202_v22 }
 0x12d   :  { %862 = vmatpush.msra.mxu2 %v3203_v26  ;;  %882 = vmatpush.msra.mxu3 %v3204_v28 }
 0x12e   :  { %823 = vmatpush.msrb.mxu0 %v3205_v32  ;;  %843 = vmatpush.msrb.mxu1 %v3206_v36 }
 0x12f   :  { %863 = vmatpush.msra.mxu2 %v3207_v40  ;;  %883 = vmatpush.msra.mxu3 %v3208_v44 }
 0x130   :  { %824 = vmatpush.msrb.mxu0 %v3209_v48  ;;  %844 = vmatpush.msrb.mxu1 %v3210_v52 }
 0x131   :  { %864 = vmatpush.msra.mxu2 %v3211_v61  ;;  %884 = vmatpush.msra.mxu3 %v3212_v1 }
 0x132   :  { %825 = vmatpush.msrb.mxu0 %v3213_v5  ;;  %845 = vmatpush.msrb.mxu1 %v3214_v6 }
 0x133   :  { %865 = vmatpush.msra.mxu2 %v3215_v9  ;;  %885 = vmatpush.msra.mxu3 %v3216_v10 }
 0x134   :  { %826 = vmatpush.msrb.mxu0 %v3217_v13  ;;  %846 = vmatpush.msrb.mxu1 %v3218_v14 }
 0x135   :  { %866 = vmatpush.msra.mxu2 %v3219_v17  ;;  %886 = vmatpush.msra.mxu3 %v3220_v18 }
 0x136   :  { %827 = vmatpush.msrb.mxu0 %v3221_v23  ;;  %847 = vmatpush.msrb.mxu1 %v3222_v24 }
 0x137   :  { %867 = vmatpush.msra.mxu2 %v3223_v29  ;;  %887 = vmatpush.msra.mxu3 %v3224_v30 }
 0x193   :  { %v489_v33 = vpop.f32.mrf.mxu0  ;;  %v509_v34 = vpop.f32.mrf.mxu1 }
 0x194   :  { %v556_v38 = vrot.slane %v489_v33, 6  ;;  %v557_v42 = vrot.slane %v509_v34, 6 }
 0x196   :  { %v564_v35 = vadd.f32 %v556_v38, %v468_v50  ;;  %v565_v55 = vadd.f32 %v557_v42, %v469_v54 }
 0x198   :  { %v1744_v59 = vmul.f32 -1.442695, %v564_v35  ;;  %v1745_v53 = vmul.f32 -1.442695, %v565_v55 }
 0x19a   :  { %1791 = vpow2.f32 %v1744_v59  ;;  %v549_v56 = vpop.f32.mrf.mxu3  ;;  %v529_v12 = vpop.f32.mrf.mxu2 }
 0x19b   :  { %1793 = vpow2.f32 %v1745_v53  ;;  %v559_v60 = vrot.slane %v549_v56, 6  ;;  %v558_v43 = vrot.slane %v529_v12, 6  ;;  %v627_v56 = vrot.slane %v2524_v47, 6 }
 0x19d   :  { %v567_v3 = vadd.f32 %v559_v60, %v471_v21  ;;  %v566_v11 = vadd.f32 %v558_v43, %v470_v20 }
 0x19f   :  { %v1746_v0 = vmul.f32 -1.442695, %v567_v3 }
 0x1a0   :  { %v1792_v51 = vpop.eup %1791 }
 0x1a1   :  { %v1794_v63 = vpop.eup %1793  ;;  %v571_v49 = vadd.f32 1.0, %v1792_v51  ;;  %1795 = vpow2.f32 %v1746_v0 }
 0x1a2   :  { %v590_v45 = vadd.f32 1.0, %v1794_v63 }
 0x1a3   :  { %1797 = vrcp.f32 %v571_v49  ;;  %v583_v5 = vand.u32 2147483648, %v571_v49  ;;  %v581_v33 = vand.u32 2147483647, %v571_v49  ;;  %vm577_vm14 = vweird.f32 %v571_v49 }
 0x1a4   :  { %1799 = vrcp.f32 %v590_v45  ;;  %v602_v13 = vand.u32 2147483648, %v590_v45  ;;  %v600_v38 = vand.u32 2147483647, %v590_v45  ;;  %vm596_vm15 = vweird.f32 %v590_v45 }
 0x1a5   :  { %v584_v54 = vor.u32 1.1754944e-38, %v583_v5  ;;  %vm582_vm2 = vcmp.eq.f32.partialorder %v581_v33, 8.507059e+37  ;;  %v2605_v5 = vld [vmem:[#allocation7 + $0x1c0] sm:$0xff]  ;;  %v2619_v33 = vld [vmem:[#allocation7 + $0x1b0] sm:$0xff] }
 0x1a6   :  { %v603_v59 = vor.u32 1.1754944e-38, %v602_v13  ;;  %vm601_vm3 = vcmp.eq.f32.partialorder %v600_v38, 8.507059e+37  ;;  %v2609_v13 = vld [vmem:[#allocation7 + $0x1d0] sm:$0xff] }
 0x1a7   :  { %v1796_v7 = vpop.eup %1795  ;;  %v2629_v38 = vld [vmem:[#allocation7 + $0x190] sm:$0xff] }
 0x1a8   :  { %v610_v25 = vadd.f32 1.0, %v1796_v7 }
 0x1a9   :  { %v1798_v4 = vpop.eup %1797 }
 0x1aa   :  { %v1800_v19 = vpop.eup %1799  ;;  %v573_v26 = vmul.f32 %v1798_v4, %v571_v49  ;;  %1801 = vrcp.f32 %v610_v25  ;;  %vm578_vm12 = vweird.f32 %v1798_v4  ;;  %v622_v7 = vand.u32 2147483648, %v610_v25 }
 0x1ab   :  { %v592_v32 = vmul.f32 %v1800_v19, %v590_v45  ;;  %1803 = vtanh.f32 %v566_v11  ;;  %vm597_vm13 = vweird.f32 %v1800_v19  ;;  %vm579_vm0 = vmor %vm577_vm14, %vm578_vm12  ;;  %vm616_vm5 = vweird.f32 %v610_v25 }
 0x1ac   :  { %v574_v40 = vsub.f32 1.0, %v573_v26  ;;  %vm598_vm1 = vmor %vm596_vm15, %vm597_vm13  ;;  %v620_v20 = vand.u32 2147483647, %v610_v25 }
 0x1ad   :  { %v593_v48 = vsub.f32 1.0, %v592_v32 }
 0x1ae   :  { %v575_v23 = vmul.f32 %v1798_v4, %v574_v40  ;;  %vm621_vm7 = vcmp.eq.f32.partialorder %v620_v20, 8.507059e+37  ;;  %v2595_v40 = vld [vmem:[#allocation7 + $0x1e0] sm:$0xff] }
 0x1af   :  { %v594_v34 = vmul.f32 %v1800_v19, %v593_v48  ;;  %v2602_v48 = vld [vmem:[#allocation7 + $0x1f8] sm:$0xff] }
 0x1b0   :  { %v1802_v42 = vpop.eup %1801  ;;  %v576_v50 = vadd.f32 %v1798_v4, %v575_v23  ;;  %v2612_v23 = vld [vmem:[#allocation7 + $0x1d8] sm:$0xff] }
 0x1b1   :  { %v595_v35 = vadd.f32 %v1800_v19, %v594_v34  ;;  %v612_v55 = vmul.f32 %v1802_v42, %v610_v25  ;;  %v1804_v60 = vpop.eup %1803  ;;  %vm617_vm4 = vweird.f32 %v1802_v42  ;;  %v2599_v25 = vld [vmem:[#allocation7 + $0x1f0] sm:$0xff]  ;;  %v2622_v34 = vld [vmem:[#allocation7 + $0x1b8] sm:$0xff] }
 0x1b2   :  { %v580_v53 = vsel %vm579_vm0, %v1798_v4, %v576_v50  ;;  %vm618_vm6 = vmor %vm616_vm5, %vm617_vm4  ;;  %v623_v4 = vor.u32 1.1754944e-38, %v622_v7  ;;  %v2639_v50 = vld [vmem:[#allocation7 + $0x170] sm:$0xff] }
 0x1b3   :  { %v585_v21 = vsel %vm582_vm2, %v584_v54, %v580_v53  ;;  %v599_v3 = vsel %vm598_vm1, %v1800_v19, %v595_v35  ;;  %v613_v0 = vsub.f32 1.0, %v612_v55  ;;  %v2642_v54 = vld [vmem:[#allocation7 + $0x178] sm:$0xff]  ;;  %v2649_v35 = vld [vmem:[#allocation7 + $0x150] sm:$0xff] }
 0x1b4   :  { %v604_v51 = vsel %vm601_vm3, %v603_v59, %v599_v3  ;;  %v630_v63 = vmul.f32 %v1804_v60, %v585_v21  ;;  %v2652_v55 = vld [vmem:[#allocation7 + $0x158] sm:$0xff]  ;;  %v2659_v59 = vld [vmem:[#allocation7 + $0x130] sm:$0xff]  ;;  %v2681_v21 = vld [vmem:[#allocation7 + $0xc0] sm:$0xff] }
 0x1b5   :  { %v629_v12 = vmul.f32 %v627_v56, %v604_v51  ;;  %v614_v49 = vmul.f32 %v1802_v42, %v613_v0  ;;  %v2662_v53 = vld [vmem:[#allocation7 + $0x138] sm:$0xff]  ;;  %v2669_v56 = vld [vmem:[#allocation7 + $0x110] sm:$0xff]  ;;  %v638_v51 = vld [vmem:[#allocation2 + $0x10] sm:$0x30] }
 0x1b6   :  { %v2677_v60 = vld [vmem:[#allocation7 + $0xf0] sm:$0xff] }
 0x1b7   :  { %v2592_v45 = vadd.f32 %v630_v63, %v629_v12  ;;  %v615_v43 = vadd.f32 %v1802_v42, %v614_v49 }
 0x1b9   :  { %1805 = vtanh.f32 %v2592_v45  ;;  %v619_v47 = vsel %vm618_vm6, %v1802_v42, %v615_v43  ;;  %v2632_v42 = vld [vmem:[#allocation7 + $0x198] sm:$0xff] }
 0x1ba   :  { %v624_v19 = vsel %vm621_vm7, %v623_v4, %v619_v47  ;;  %v637_v47 = vld [vmem:[#allocation2 + $0x18] sm:$0x30] }
 0x1bf   :  { %v1806_v11 = vpop.eup %1805 }
 0x1c0   :  { %v633_v26 = vmul.f32 %v1806_v11, %v624_v19 }
 0x1c2   :  { %634 = vst [vmem:[#allocation3] sm:$0xc] %v633_v26  ;;  %v640_v32 = vrot.slane %v633_v26, 2 }
 0x1c4   :  { %658 = vmatmul.f32.vlgmr.msra.gmra.mxu0 %v640_v32  ;;  %678 = vmatmul.f32.vlgmr.msra.gmra.mxu1 %v640_v32 }
 0x1c5   :  { %698 = vmatmul.f32.vlgmr.msrb.gmra.mxu2 %v640_v32  ;;  %718 = vmatmul.f32.vlgmr.msrb.gmra.mxu3 %v640_v32 }
 0x1c6   :  { %982 = vmatpush.msra.mxu0 %v2595_v40  ;;  %1002 = vmatpush.msra.mxu1 %v2313_v57  ;;  %v2615_v57 = vld [vmem:[#allocation7 + $0x1a0] sm:$0xff] }
 0x1c7   :  { %1022 = vmatpush.msrb.mxu2 %v2599_v25  ;;  %1042 = vmatpush.msrb.mxu3 %v2602_v48 }
 0x1c8   :  { %983 = vmatpush.msra.mxu0 %v2605_v5  ;;  %1003 = vmatpush.msra.mxu1 %v2322_v62  ;;  %v2625_v62 = vld [vmem:[#allocation7 + $0x180] sm:$0xff] }
 0x1c9   :  { %1023 = vmatpush.msrb.mxu2 %v2609_v13  ;;  %1043 = vmatpush.msrb.mxu3 %v2612_v23 }
 0x1ca   :  { %984 = vmatpush.msra.mxu0 %v2615_v57  ;;  %1004 = vmatpush.msra.mxu1 %v2329_v2  ;;  %v2635_v2 = vld [vmem:[#allocation7 + $0x160] sm:$0xff] }
 0x1cb   :  { %1024 = vmatpush.msrb.mxu2 %v2619_v33  ;;  %1044 = vmatpush.msrb.mxu3 %v2622_v34 }
 0x1cc   :  { %985 = vmatpush.msra.mxu0 %v2625_v62  ;;  %1005 = vmatpush.msra.mxu1 %v2337_v8  ;;  %v2645_v8 = vld [vmem:[#allocation7 + $0x140] sm:$0xff] }
 0x1cd   :  { %1025 = vmatpush.msrb.mxu2 %v2629_v38  ;;  %1045 = vmatpush.msrb.mxu3 %v2632_v42 }
 0x1ce   :  { %986 = vmatpush.msra.mxu0 %v2635_v2  ;;  %1006 = vmatpush.msra.mxu1 %v2345_v16  ;;  %v2655_v16 = vld [vmem:[#allocation7 + $0x120] sm:$0xff] }
 0x1cf   :  { %1026 = vmatpush.msrb.mxu2 %v2639_v50  ;;  %1046 = vmatpush.msrb.mxu3 %v2642_v54 }
 0x1d0   :  { %987 = vmatpush.msra.mxu0 %v2645_v8  ;;  %1007 = vmatpush.msra.mxu1 %v2353_v27  ;;  %v2665_v27 = vld [vmem:[#allocation7 + $0x100] sm:$0xff] }
 0x1d1   :  { %1027 = vmatpush.msrb.mxu2 %v2649_v35  ;;  %1047 = vmatpush.msrb.mxu3 %v2652_v55 }
 0x1d2   :  { %988 = vmatpush.msra.mxu0 %v2655_v16  ;;  %1008 = vmatpush.msra.mxu1 %v2359_v58  ;;  %v2673_v58 = vld [vmem:[#allocation7 + $0xe0] sm:$0xff] }
 0x1d3   :  { %1028 = vmatpush.msrb.mxu2 %v2659_v59  ;;  %1048 = vmatpush.msrb.mxu3 %v2662_v53 }
 0x1d4   :  { %989 = vmatpush.msra.mxu0 %v2665_v27  ;;  %1009 = vmatpush.msra.mxu1 %v2365_v31  ;;  %v2685_v31 = vld [vmem:[#allocation7 + $0xd0] sm:$0xff] }
 0x1d5   :  { %1029 = vmatpush.msrb.mxu2 %v2669_v56  ;;  %1049 = vmatpush.msrb.mxu3 %v2281_v39  ;;  %3225 = vst [vmem:[#allocation26_spill] sm:$0xff] %v2685_v31  ;;  %v2689_v39 = vld [vmem:[#allocation7 + $0xa0] sm:$0xff] }
 0x1d6   :  { %990 = vmatpush.msra.mxu0 %v2673_v58  ;;  %1010 = vmatpush.msra.mxu1 %v2371_v37  ;;  %3226 = vst [vmem:[#allocation17_spill] sm:$0xff] %v2689_v39  ;;  %v2693_v37 = vld [vmem:[#allocation7 + $0xb0] sm:$0xff] }
 0x1d7   :  { %1030 = vmatpush.msrb.mxu2 %v2677_v60  ;;  %1050 = vmatpush.msrb.mxu3 %v2293_v46  ;;  %3227 = vst [vmem:[#allocation36_spill] sm:$0xff] %v2693_v37  ;;  %v2697_v46 = vld [vmem:[#allocation7 + $0x80] sm:$0xff] }
 0x1d8   :  { %991 = vmatpush.msra.mxu0 %v2681_v21  ;;  %1011 = vmatpush.msra.mxu1 %v2377_v41  ;;  %3228 = vst [vmem:[#allocation23_spill] sm:$0xff] %v2697_v46  ;;  %v2701_v41 = vld [vmem:[#allocation7 + $0x90] sm:$0xff] }
 0x1d9   :  { %1031 = vmatpush.msrb.mxu2 %v2685_v31  ;;  %1051 = vmatpush.msrb.mxu3 %v3200_v15  ;;  %3229 = vst [vmem:[#allocation28_spill] sm:$0xff] %v2701_v41  ;;  %v2705_v15 = vld [vmem:[#allocation7 + $0x60] sm:$0xff] }
 0x1da   :  { %992 = vmatpush.msra.mxu0 %v2689_v39  ;;  %1012 = vmatpush.msra.mxu1 %v3202_v22  ;;  %3230 = vst [vmem:[#allocation18_spill] sm:$0xff] %v2705_v15  ;;  %v2711_v22 = vld [vmem:[#allocation7 + $0x40] sm:$0xff] }
 0x1db   :  { %1032 = vmatpush.msrb.mxu2 %v2693_v37  ;;  %1052 = vmatpush.msrb.mxu3 %v3204_v28  ;;  %3231 = vst [vmem:[#allocation37_spill] sm:$0xff] %v2711_v22  ;;  %v2717_v28 = vld [vmem:[#allocation7 + $0x20] sm:$0xff] }
 0x1dc   :  { %993 = vmatpush.msra.mxu0 %v2697_v46  ;;  %1013 = vmatpush.msra.mxu1 %v3206_v36  ;;  %3232 = vst [vmem:[#allocation24_spill] sm:$0xff] %v2717_v28  ;;  %v2723_v36 = vld [vmem:[#allocation7] sm:$0xff] }
 0x1dd   :  { %1033 = vmatpush.msrb.mxu2 %v2701_v41  ;;  %1053 = vmatpush.msrb.mxu3 %v3208_v44  ;;  %3233 = vst [vmem:[#allocation30_spill] sm:$0xff] %v2723_v36 }
 0x1de   :  { %994 = vmatpush.msra.mxu0 %v2705_v15  ;;  %1014 = vmatpush.msra.mxu1 %v3210_v52 }
 0x1df   :  { %1034 = vmatpush.msrb.mxu2 %v3211_v61  ;;  %1054 = vmatpush.msrb.mxu3 %v3212_v1 }
 0x1e0   :  { %995 = vmatpush.msra.mxu0 %v2711_v22  ;;  %1015 = vmatpush.msra.mxu1 %v3214_v6  ;;  %v635_v6 = vld [vmem:[#allocation2 + $0x30] sm:$0x30] }
 0x1e1   :  { %1035 = vmatpush.msrb.mxu2 %v3215_v9  ;;  %1055 = vmatpush.msrb.mxu3 %v3216_v10  ;;  %v636_v9 = vld [vmem:[#allocation2] sm:$0x30] }
 0x1e2   :  { %996 = vmatpush.msra.mxu0 %v2717_v28  ;;  %1016 = vmatpush.msra.mxu1 %v3218_v14 }
 0x1e3   :  { %1036 = vmatpush.msrb.mxu2 %v3219_v17  ;;  %1056 = vmatpush.msrb.mxu3 %v3220_v18 }
 0x1e4   :  { %997 = vmatpush.msra.mxu0 %v2723_v36  ;;  %1017 = vmatpush.msra.mxu1 %v3222_v24 }
 0x1e5   :  { %1037 = vmatpush.msrb.mxu2 %v3223_v29  ;;  %1057 = vmatpush.msrb.mxu3 %v3224_v30 }
 0x241   :  { %v659_v44 = vpop.f32.mrf.mxu0  ;;  %v679_v52 = vpop.f32.mrf.mxu1 }
 0x242   :  { %v726_v61 = vrot.slane %v659_v44, 4  ;;  %v727_v1 = vrot.slane %v679_v52, 4 }
 0x244   :  { %v734_v10 = vadd.f32 %v726_v61, %v635_v6  ;;  %v735_v14 = vadd.f32 %v727_v1, %v636_v9 }
 0x246   :  { %v1747_v17 = vmul.f32 -1.442695, %v734_v10  ;;  %v1748_v18 = vmul.f32 -1.442695, %v735_v14 }
 0x248   :  { %1807 = vpow2.f32 %v1747_v17  ;;  %v719_v3 = vpop.f32.mrf.mxu3  ;;  %v699_v43 = vpop.f32.mrf.mxu2 }
 0x249   :  { %1809 = vpow2.f32 %v1748_v18  ;;  %v729_v0 = vrot.slane %v719_v3, 4  ;;  %v728_v7 = vrot.slane %v699_v43, 4 }
 0x24b   :  { %v737_v24 = vadd.f32 %v729_v0, %v638_v51  ;;  %v736_v19 = vadd.f32 %v728_v7, %v637_v47 }
 0x24d   :  { %v1749_v63 = vmul.f32 -1.442695, %v737_v24 }
 0x24e   :  { %v1808_v29 = vpop.eup %1807 }
 0x24f   :  { %v1810_v12 = vpop.eup %1809  ;;  %v741_v30 = vadd.f32 1.0, %v1808_v29  ;;  %1811 = vpow2.f32 %v1749_v63  ;;  %v797_v63 = vrot.slane %v2592_v45, 6 }
 0x250   :  { %v760_v49 = vadd.f32 1.0, %v1810_v12 }
 0x251   :  { %1813 = vrcp.f32 %v741_v30  ;;  %v753_v1 = vand.u32 2147483648, %v741_v30  ;;  %v751_v10 = vand.u32 2147483647, %v741_v30  ;;  %vm747_vm10 = vweird.f32 %v741_v30 }
 0x252   :  { %1815 = vrcp.f32 %v760_v49  ;;  %v772_v6 = vand.u32 2147483648, %v760_v49  ;;  %v770_v17 = vand.u32 2147483647, %v760_v49  ;;  %vm766_vm11 = vweird.f32 %v760_v49 }
 0x253   :  { %v754_v0 = vor.u32 1.1754944e-38, %v753_v1  ;;  %vm752_vm14 = vcmp.eq.f32.partialorder %v751_v10, 8.507059e+37 }
 0x254   :  { %v773_v29 = vor.u32 1.1754944e-38, %v772_v6  ;;  %vm771_vm15 = vcmp.eq.f32.partialorder %v770_v17, 8.507059e+37  ;;  %v2746_v17 = vld [vmem:[#allocation7 + $0x1a8] sm:$0xff] }
 0x255   :  { %v1812_v20 = vpop.eup %1811 }
 0x256   :  { %v780_v4 = vadd.f32 1.0, %v1812_v20 }
 0x257   :  { %v1814_v11 = vpop.eup %1813 }
 0x258   :  { %v1816_v26 = vpop.eup %1815  ;;  %v743_v32 = vmul.f32 %v1814_v11, %v741_v30  ;;  %1817 = vrcp.f32 %v780_v4  ;;  %vm748_vm8 = vweird.f32 %v1814_v11  ;;  %v792_v45 = vand.u32 2147483648, %v780_v4 }
 0x259   :  { %v762_v44 = vmul.f32 %v1816_v26, %v760_v49  ;;  %1819 = vtanh.f32 %v736_v19  ;;  %vm767_vm9 = vweird.f32 %v1816_v26  ;;  %vm749_vm12 = vmor %vm747_vm10, %vm748_vm8  ;;  %vm786_vm1 = vweird.f32 %v780_v4 }
 0x25a   :  { %v744_v52 = vsub.f32 1.0, %v743_v32  ;;  %vm768_vm13 = vmor %vm766_vm11, %vm767_vm9  ;;  %v793_v1 = vor.u32 1.1754944e-38, %v792_v45  ;;  %v2826_v45 = vld [vmem:[#allocation7 + $0x48] sm:$0xff] }
 0x25b   :  { %v763_v61 = vsub.f32 1.0, %v762_v44  ;;  %3242 = vst [vmem:[#allocation21_spill] sm:$0xff] %v2826_v45 }
 0x25c   :  { %v745_v9 = vmul.f32 %v1814_v11, %v744_v52 }
 0x25d   :  { %v764_v14 = vmul.f32 %v1816_v26, %v763_v61  ;;  %v790_v61 = vand.u32 2147483647, %v780_v4 }
 0x25e   :  { %v1818_v18 = vpop.eup %1817  ;;  %v746_v3 = vadd.f32 %v1814_v11, %v745_v9 }
 0x25f   :  { %v765_v51 = vadd.f32 %v1816_v26, %v764_v14  ;;  %v782_v24 = vmul.f32 %v1818_v18, %v780_v4  ;;  %v1820_v43 = vpop.eup %1819  ;;  %vm787_vm0 = vweird.f32 %v1818_v18  ;;  %vm791_vm3 = vcmp.eq.f32.partialorder %v790_v61, 8.507059e+37  ;;  %v2734_v14 = vld [vmem:[#allocation7 + $0x1e8] sm:$0xff]  ;;  %v2829_v61 = vld [vmem:[#allocation7 + $0x50] sm:$0xff] }
 0x260   :  { %v750_v12 = vsel %vm749_vm12, %v1814_v11, %v746_v3  ;;  %vm788_vm2 = vmor %vm786_vm1, %vm787_vm0  ;;  %v2740_v4 = vld [vmem:[#allocation7 + $0x1c8] sm:$0xff]  ;;  %3243 = vst [vmem:[#allocation40_spill] sm:$0xff] %v2829_v61 }
 0x261   :  { %v755_v7 = vsel %vm752_vm14, %v754_v0, %v750_v12  ;;  %v769_v20 = vsel %vm768_vm13, %v1816_v26, %v765_v51  ;;  %v783_v47 = vsub.f32 1.0, %v782_v24  ;;  %v2758_v3 = vld [vmem:[#allocation7 + $0x168] sm:$0xff]  ;;  %v2788_v12 = vld [vmem:[#allocation7 + $0xf8] sm:$0xff] }
 0x262   :  { %v774_v19 = vsel %vm771_vm15, %v773_v29, %v769_v20  ;;  %v800_v32 = vmul.f32 %v1820_v43, %v755_v7  ;;  %v2764_v0 = vld [vmem:[#allocation7 + $0x148] sm:$0xff]  ;;  %v2796_v7 = vld [vmem:[#allocation7 + $0xd8] sm:$0xff] }
 0x263   :  { %v799_v44 = vmul.f32 %v797_v63, %v774_v19  ;;  %v784_v30 = vmul.f32 %v1818_v18, %v783_v47  ;;  %v2770_v51 = vld [vmem:[#allocation7 + $0x128] sm:$0xff]  ;;  %v2780_v63 = vld [vmem:[#allocation7 + $0x118] sm:$0xff]  ;;  %3234 = vst [vmem:[#allocation19_spill] sm:$0xff] %v2796_v7 }
 0x264   :  { %v2776_v24 = vld [vmem:[#allocation7 + $0x108] sm:$0xff]  ;;  %v2804_v47 = vld [vmem:[#allocation7 + $0xb8] sm:$0xff] }
 0x265   :  { %v2730_v49 = vadd.f32 %v800_v32, %v799_v44  ;;  %v785_v52 = vadd.f32 %v1818_v18, %v784_v30  ;;  %v2784_v29 = vld [vmem:[#allocation7 + $0xe8] sm:$0xff]  ;;  %3236 = vst [vmem:[#allocation25_spill] sm:$0xff] %v2804_v47  ;;  %v2812_v32 = vld [vmem:[#allocation7 + $0x98] sm:$0xff]  ;;  %v2819_v30 = vld [vmem:[#allocation7 + $0x70] sm:$0xff] }
 0x266   :  { %v2792_v43 = vld [vmem:[#allocation7 + $0xc8] sm:$0xff]  ;;  %3238 = vst [vmem:[#allocation20_spill] sm:$0xff] %v2812_v32 }
 0x267   :  { %1821 = vtanh.f32 %v2730_v49  ;;  %v789_v11 = vsel %vm788_vm2, %v1818_v18, %v785_v52  ;;  %v2752_v18 = vld [vmem:[#allocation7 + $0x188] sm:$0xff]  ;;  %3240 = vst [vmem:[#allocation27_spill] sm:$0xff] %v2819_v30  ;;  %v2822_v52 = vld [vmem:[#allocation7 + $0x78] sm:$0xff] }
 0x268   :  { %v794_v6 = vsel %vm791_vm3, %v793_v1, %v789_v11  ;;  %v2800_v20 = vld [vmem:[#allocation7 + $0xa8] sm:$0xff]  ;;  %3241 = vst [vmem:[#allocation33_spill] sm:$0xff] %v2822_v52  ;;  %v2832_v11 = vld [vmem:[#allocation7 + $0x58] sm:$0xff] }
 0x269   :  { %3235 = vst [vmem:[#allocation38_spill] sm:$0xff] %v2800_v20  ;;  %v2808_v19 = vld [vmem:[#allocation7 + $0x88] sm:$0xff] }
 0x26a   :  { %3237 = vst [vmem:[#allocation32_spill] sm:$0xff] %v2808_v19  ;;  %v2816_v44 = vld [vmem:[#allocation7 + $0x68] sm:$0xff] }
 0x26b   :  { %3239 = vst [vmem:[#allocation39_spill] sm:$0xff] %v2816_v44  ;;  %v2836_v1 = vld [vmem:[#allocation7 + $0x28] sm:$0xff] }
 0x26c   :  { %3244 = vst [vmem:[#allocation29_spill] sm:$0xff] %v2832_v11 }
 0x26d   :  { %v1822_v26 = vpop.eup %1821  ;;  %3245 = vst [vmem:[#allocation34_spill] sm:$0xff] %v2836_v1 }
 0x26e   :  { %v803_v9 = vmul.f32 %v1822_v26, %v794_v6  ;;  %v2839_v26 = vld [vmem:[#allocation7 + $0x30] sm:$0xff]  ;;  %v2842_v6 = vld [vmem:[#allocation7 + $0x38] sm:$0xff] }
 0x26f   :  { %3246 = vst [vmem:[#allocation22_spill] sm:$0xff] %v2839_v26 }
 0x270   :  { %804 = vst [vmem:[#allocation3] sm:$0x30] %v803_v9  ;;  %v810_v10 = vrot.slane %v803_v9, 4  ;;  %v2846_v9 = vld [vmem:[#allocation7 + $0x8] sm:$0xff] }
 0x271   :  { %3247 = vst [vmem:[#allocation41_spill] sm:$0xff] %v2842_v6 }
 0x272   :  { %828 = vmatmul.f32.vlgmr.msrb.gmra.mxu0 %v810_v10  ;;  %848 = vmatmul.f32.vlgmr.msrb.gmra.mxu1 %v810_v10  ;;  %3248 = vst [vmem:[#allocation31_spill] sm:$0xff] %v2846_v9 }
 0x273   :  { %868 = vmatmul.f32.vlgmr.msra.gmra.mxu2 %v810_v10  ;;  %888 = vmatmul.f32.vlgmr.msra.gmra.mxu3 %v810_v10  ;;  %v2849_v10 = vld [vmem:[#allocation7 + $0x10] sm:$0xff] }
 0x274   :  { %1137 = vmatpush.msrb.mxu0 %v2595_v40  ;;  %1157 = vmatpush.msrb.mxu1 %v2734_v14  ;;  %3249 = vst [vmem:[#allocation35_spill] sm:$0xff] %v2849_v10 }
 0x275   :  { %1177 = vmatpush.msra.mxu2 %v2599_v25  ;;  %1197 = vmatpush.msra.mxu3 %v2602_v48 }
 0x276   :  { %1138 = vmatpush.msrb.mxu0 %v2605_v5  ;;  %1158 = vmatpush.msrb.mxu1 %v2740_v4 }
 0x277   :  { %1178 = vmatpush.msra.mxu2 %v2609_v13  ;;  %1198 = vmatpush.msra.mxu3 %v2612_v23 }
 0x278   :  { %1139 = vmatpush.msrb.mxu0 %v2615_v57  ;;  %1159 = vmatpush.msrb.mxu1 %v2746_v17 }
 0x279   :  { %1179 = vmatpush.msra.mxu2 %v2619_v33  ;;  %1199 = vmatpush.msra.mxu3 %v2622_v34 }
 0x27a   :  { %1140 = vmatpush.msrb.mxu0 %v2625_v62  ;;  %1160 = vmatpush.msrb.mxu1 %v2752_v18 }
 0x27b   :  { %1180 = vmatpush.msra.mxu2 %v2629_v38  ;;  %1200 = vmatpush.msra.mxu3 %v2632_v42 }
 0x27c   :  { %1141 = vmatpush.msrb.mxu0 %v2635_v2  ;;  %1161 = vmatpush.msrb.mxu1 %v2758_v3 }
 0x27d   :  { %1181 = vmatpush.msra.mxu2 %v2639_v50  ;;  %1201 = vmatpush.msra.mxu3 %v2642_v54 }
 0x27e   :  { %1142 = vmatpush.msrb.mxu0 %v2645_v8  ;;  %1162 = vmatpush.msrb.mxu1 %v2764_v0 }
 0x27f   :  { %1182 = vmatpush.msra.mxu2 %v2649_v35  ;;  %1202 = vmatpush.msra.mxu3 %v2652_v55 }
 0x280   :  { %1143 = vmatpush.msrb.mxu0 %v2655_v16  ;;  %1163 = vmatpush.msrb.mxu1 %v2770_v51 }
 0x281   :  { %1183 = vmatpush.msra.mxu2 %v2659_v59  ;;  %1203 = vmatpush.msra.mxu3 %v2662_v53 }
 0x282   :  { %1144 = vmatpush.msrb.mxu0 %v2665_v27  ;;  %1164 = vmatpush.msrb.mxu1 %v2776_v24 }
 0x283   :  { %1184 = vmatpush.msra.mxu2 %v2669_v56  ;;  %1204 = vmatpush.msra.mxu3 %v2780_v63 }
 0x284   :  { %1145 = vmatpush.msrb.mxu0 %v2673_v58  ;;  %1165 = vmatpush.msrb.mxu1 %v2784_v29 }
 0x285   :  { %1185 = vmatpush.msra.mxu2 %v2677_v60  ;;  %1205 = vmatpush.msra.mxu3 %v2788_v12 }
 0x286   :  { %1146 = vmatpush.msrb.mxu0 %v2681_v21  ;;  %1166 = vmatpush.msrb.mxu1 %v2792_v43 }
 0x287   :  { %1186 = vmatpush.msra.mxu2 %v2685_v31  ;;  %1206 = vmatpush.msra.mxu3 %v2796_v7 }
 0x288   :  { %1147 = vmatpush.msrb.mxu0 %v2689_v39  ;;  %1167 = vmatpush.msrb.mxu1 %v2800_v20 }
 0x289   :  { %1187 = vmatpush.msra.mxu2 %v2693_v37  ;;  %1207 = vmatpush.msra.mxu3 %v2804_v47 }
 0x28a   :  { %1148 = vmatpush.msrb.mxu0 %v2697_v46  ;;  %1168 = vmatpush.msrb.mxu1 %v2808_v19 }
 0x28b   :  { %1188 = vmatpush.msra.mxu2 %v2701_v41  ;;  %1208 = vmatpush.msra.mxu3 %v2812_v32 }
 0x28c   :  { %1149 = vmatpush.msrb.mxu0 %v2705_v15  ;;  %1169 = vmatpush.msrb.mxu1 %v2816_v44  ;;  %v808_v15 = vld [vmem:[#allocation2 + $0x10] sm:$0xc0] }
 0x28d   :  { %1189 = vmatpush.msra.mxu2 %v2819_v30  ;;  %1209 = vmatpush.msra.mxu3 %v2822_v52 }
 0x28e   :  { %1150 = vmatpush.msrb.mxu0 %v2711_v22  ;;  %1170 = vmatpush.msrb.mxu1 %v2826_v45  ;;  %v805_v45 = vld [vmem:[#allocation2 + $0x30] sm:$0xc0] }
 0x28f   :  { %1190 = vmatpush.msra.mxu2 %v2829_v61  ;;  %1210 = vmatpush.msra.mxu3 %v2832_v11 }
 0x290   :  { %1151 = vmatpush.msrb.mxu0 %v2717_v28  ;;  %1171 = vmatpush.msrb.mxu1 %v2836_v1  ;;  %v2852_v28 = vld [vmem:[#allocation7 + $0x18] sm:$0xff] }
 0x291   :  { %1191 = vmatpush.msra.mxu2 %v2839_v26  ;;  %1211 = vmatpush.msra.mxu3 %v2842_v6  ;;  %3250 = vst [vmem:[#allocation42_spill] sm:$0xff] %v2852_v28  ;;  %v806_v6 = vld [vmem:[#allocation2] sm:$0xc0] }
 0x292   :  { %1152 = vmatpush.msrb.mxu0 %v2723_v36  ;;  %1172 = vmatpush.msrb.mxu1 %v2846_v9 }
 0x293   :  { %1192 = vmatpush.msra.mxu2 %v2849_v10  ;;  %1212 = vmatpush.msra.mxu3 %v2852_v28 }
 0x2ef   :  { %v829_v1 = vpop.f32.mrf.mxu0  ;;  %v849_v26 = vpop.f32.mrf.mxu1 }
 0x2f0   :  { %v896_v11 = vrot.slane %v829_v1, 2  ;;  %v897_v61 = vrot.slane %v849_v26, 2 }
 0x2f2   :  { %v904_v22 = vadd.f32 %v896_v11, %v805_v45  ;;  %v905_v36 = vadd.f32 %v897_v61, %v806_v6  ;;  %v807_v61 = vld [vmem:[#allocation2 + $0x18] sm:$0xc0] }
 0x2f4   :  { %v1750_v52 = vmul.f32 -1.442695, %v904_v22  ;;  %v1751_v30 = vmul.f32 -1.442695, %v905_v36 }
 0x2f6   :  { %1823 = vpow2.f32 %v1750_v52  ;;  %v889_v9 = vpop.f32.mrf.mxu3  ;;  %v869_v1 = vpop.f32.mrf.mxu2 }
 0x2f7   :  { %1825 = vpow2.f32 %v1751_v30  ;;  %v899_v44 = vrot.slane %v889_v9, 2  ;;  %v898_v26 = vrot.slane %v869_v1, 2 }
 0x2f9   :  { %v907_v10 = vadd.f32 %v899_v44, %v808_v15  ;;  %v906_v52 = vadd.f32 %v898_v26, %v807_v61 }
 0x2fb   :  { %v1752_v32 = vmul.f32 -1.442695, %v907_v10 }
 0x2fc   :  { %v1824_v41 = vpop.eup %1823 }
 0x2fd   :  { %v1826_v19 = vpop.eup %1825  ;;  %v911_v28 = vadd.f32 1.0, %v1824_v41  ;;  %1827 = vpow2.f32 %v1752_v32 }
 0x2fe   :  { %v930_v46 = vadd.f32 1.0, %v1826_v19 }
 0x2ff   :  { %1829 = vrcp.f32 %v911_v28  ;;  %v923_v9 = vand.u32 2147483648, %v911_v28  ;;  %v921_v19 = vand.u32 2147483647, %v911_v28  ;;  %vm917_vm6 = vweird.f32 %v911_v28 }
 0x300   :  { %1831 = vrcp.f32 %v930_v46  ;;  %v942_v41 = vand.u32 2147483648, %v930_v46  ;;  %v940_v1 = vand.u32 2147483647, %v930_v46  ;;  %vm936_vm7 = vweird.f32 %v930_v46 }
 0x301   :  { %v924_v26 = vor.u32 1.1754944e-38, %v923_v9  ;;  %vm922_vm10 = vcmp.eq.f32.partialorder %v921_v19, 8.507059e+37 }
 0x302   :  { %vm941_vm11 = vcmp.eq.f32.partialorder %v940_v1, 8.507059e+37  ;;  %v3256_v1 = vld [vmem:[#allocation25_spill] sm:$0xff] }
 0x303   :  { %v1828_v45 = vpop.eup %1827 }
 0x304   :  { %v950_v22 = vadd.f32 1.0, %v1828_v45 }
 0x305   :  { %v1830_v36 = vpop.eup %1829 }
 0x306   :  { %v1832_v11 = vpop.eup %1831  ;;  %v913_v30 = vmul.f32 %v1830_v36, %v911_v28  ;;  %1833 = vrcp.f32 %v950_v22  ;;  %vm918_vm4 = vweird.f32 %v1830_v36  ;;  %vm956_vm13 = vweird.f32 %v950_v22 }
 0x307   :  { %v932_v6 = vmul.f32 %v1832_v11, %v930_v46  ;;  %1835 = vtanh.f32 %v906_v52  ;;  %vm937_vm5 = vweird.f32 %v1832_v11  ;;  %vm919_vm8 = vmor %vm917_vm6, %vm918_vm4 }
 0x308   :  { %v914_v15 = vsub.f32 1.0, %v913_v30  ;;  %v967_v30 = vrot.slane %v2730_v49, 6  ;;  %vm938_vm9 = vmor %vm936_vm7, %vm937_vm5  ;;  %v962_v49 = vand.u32 2147483648, %v950_v22 }
 0x309   :  { %v933_v44 = vsub.f32 1.0, %v932_v6  ;;  %v943_v6 = vor.u32 1.1754944e-38, %v942_v41  ;;  %v960_v41 = vand.u32 2147483647, %v950_v22 }
 0x30a   :  { %v915_v32 = vmul.f32 %v1830_v36, %v914_v15 }
 0x30b   :  { %v934_v10 = vmul.f32 %v1832_v11, %v933_v44  ;;  %vm961_vm15 = vcmp.eq.f32.partialorder %v960_v41, 8.507059e+37  ;;  %v3269_v41 = vld [vmem:[#allocation24_spill] sm:$0xff] }
 0x30c   :  { %v1834_v47 = vpop.eup %1833  ;;  %v916_v37 = vadd.f32 %v1830_v36, %v915_v32 }
 0x30d   :  { %v935_v45 = vadd.f32 %v1832_v11, %v934_v10  ;;  %v952_v61 = vmul.f32 %v1834_v47, %v950_v22  ;;  %v1836_v15 = vpop.eup %1835  ;;  %vm957_vm12 = vweird.f32 %v1834_v47  ;;  %v3255_v22 = vld [vmem:[#allocation36_spill] sm:$0xff] }
 0x30e   :  { %v920_v52 = vsel %vm919_vm8, %v1830_v36, %v916_v37  ;;  %vm958_vm14 = vmor %vm956_vm13, %vm957_vm12  ;;  %v963_v36 = vor.u32 1.1754944e-38, %v962_v49  ;;  %v3268_v49 = vld [vmem:[#allocation29_spill] sm:$0xff] }
 0x30f   :  { %v925_v20 = vsel %vm922_vm10, %v924_v26, %v920_v52  ;;  %v939_v39 = vsel %vm938_vm9, %v1832_v11, %v935_v45  ;;  %v953_v44 = vsub.f32 1.0, %v952_v61  ;;  %v3257_v26 = vld [vmem:[#allocation23_spill] sm:$0xff]  ;;  %v3258_v45 = vld [vmem:[#allocation32_spill] sm:$0xff] }
 0x310   :  { %v944_v7 = vsel %vm941_vm11, %v943_v6, %v939_v39  ;;  %v970_v31 = vmul.f32 %v1836_v15, %v925_v20  ;;  %v3253_v20 = vld [vmem:[#allocation17_spill] sm:$0xff]  ;;  %v3259_v61 = vld [vmem:[#allocation28_spill] sm:$0xff]  ;;  %v3261_v6 = vld [vmem:[#allocation18_spill] sm:$0xff] }
 0x311   :  { %v969_v32 = vmul.f32 %v967_v30, %v944_v7  ;;  %v954_v28 = vmul.f32 %v1834_v47, %v953_v44  ;;  %v3252_v7 = vld [vmem:[#allocation19_spill] sm:$0xff]  ;;  %v3260_v30 = vld [vmem:[#allocation20_spill] sm:$0xff]  ;;  %v3264_v44 = vld [vmem:[#allocation33_spill] sm:$0xff] }
 0x312   :  { %v3262_v52 = vld [vmem:[#allocation39_spill] sm:$0xff] }
 0x313   :  { %v2856_v46 = vadd.f32 %v970_v31, %v969_v32  ;;  %v955_v9 = vadd.f32 %v1834_v47, %v954_v28  ;;  %v3251_v31 = vld [vmem:[#allocation26_spill] sm:$0xff]  ;;  %v3263_v15 = vld [vmem:[#allocation27_spill] sm:$0xff]  ;;  %v3265_v32 = vld [vmem:[#allocation37_spill] sm:$0xff] }
 0x314   :  { %v3266_v28 = vld [vmem:[#allocation21_spill] sm:$0xff] }
 0x315   :  { %1837 = vtanh.f32 %v2856_v46  ;;  %v959_v37 = vsel %vm958_vm14, %v1834_v47, %v955_v9  ;;  %v3254_v47 = vld [vmem:[#allocation38_spill] sm:$0xff]  ;;  %v3267_v9 = vld [vmem:[#allocation40_spill] sm:$0xff] }
 0x316   :  { %v964_v19 = vsel %vm961_vm15, %v963_v36, %v959_v37  ;;  %v3270_v37 = vld [vmem:[#allocation34_spill] sm:$0xff] }
 0x317   :  { %v3271_v36 = vld [vmem:[#allocation22_spill] sm:$0xff] }
 0x31b   :  { %v1838_v11 = vpop.eup %1837 }
 0x31c   :  { %v973_v10 = vmul.f32 %v1838_v11, %v964_v19  ;;  %v3272_v11 = vld [vmem:[#allocation41_spill] sm:$0xff]  ;;  %v3273_v19 = vld [vmem:[#allocation30_spill] sm:$0xff] }
 0x31e   :  { %974 = vst [vmem:[#allocation3] sm:$0xc0] %v973_v10  ;;  %v980_v39 = vrot.slane %v973_v10, 6  ;;  %v3274_v10 = vld [vmem:[#allocation31_spill] sm:$0xff] }
 0x320   :  { %998 = vmatmul.f32.vlgmr.msra.gmra.mxu0 %v980_v39  ;;  %1018 = vmatmul.f32.vlgmr.msra.gmra.mxu1 %v980_v39 }
 0x321   :  { %1038 = vmatmul.f32.vlgmr.msrb.gmra.mxu2 %v980_v39  ;;  %1058 = vmatmul.f32.vlgmr.msrb.gmra.mxu3 %v980_v39  ;;  %v3275_v39 = vld [vmem:[#allocation35_spill] sm:$0xff] }
 0x322   :  { %1307 = vmatpush.msra.mxu0 %v2595_v40  ;;  %1327 = vmatpush.msra.mxu1 %v2734_v14 }
 0x323   :  { %1347 = vmatpush.msrb.mxu2 %v2599_v25  ;;  %1367 = vmatpush.msrb.mxu3 %v2602_v48 }
 0x324   :  { %1308 = vmatpush.msra.mxu0 %v2605_v5  ;;  %1328 = vmatpush.msra.mxu1 %v2740_v4 }
 0x325   :  { %1348 = vmatpush.msrb.mxu2 %v2609_v13  ;;  %1368 = vmatpush.msrb.mxu3 %v2612_v23 }
 0x326   :  { %1309 = vmatpush.msra.mxu0 %v2615_v57  ;;  %1329 = vmatpush.msra.mxu1 %v2746_v17 }
 0x327   :  { %1349 = vmatpush.msrb.mxu2 %v2619_v33  ;;  %1369 = vmatpush.msrb.mxu3 %v2622_v34 }
 0x328   :  { %1310 = vmatpush.msra.mxu0 %v2625_v62  ;;  %1330 = vmatpush.msra.mxu1 %v2752_v18 }
 0x329   :  { %1350 = vmatpush.msrb.mxu2 %v2629_v38  ;;  %1370 = vmatpush.msrb.mxu3 %v2632_v42 }
 0x32a   :  { %1311 = vmatpush.msra.mxu0 %v2635_v2  ;;  %1331 = vmatpush.msra.mxu1 %v2758_v3 }
 0x32b   :  { %1351 = vmatpush.msrb.mxu2 %v2639_v50  ;;  %1371 = vmatpush.msrb.mxu3 %v2642_v54 }
 0x32c   :  { %1312 = vmatpush.msra.mxu0 %v2645_v8  ;;  %1332 = vmatpush.msra.mxu1 %v2764_v0 }
 0x32d   :  { %1352 = vmatpush.msrb.mxu2 %v2649_v35  ;;  %1372 = vmatpush.msrb.mxu3 %v2652_v55 }
 0x32e   :  { %1313 = vmatpush.msra.mxu0 %v2655_v16  ;;  %1333 = vmatpush.msra.mxu1 %v2770_v51 }
 0x32f   :  { %1353 = vmatpush.msrb.mxu2 %v2659_v59  ;;  %1373 = vmatpush.msrb.mxu3 %v2662_v53 }
 0x330   :  { %1314 = vmatpush.msra.mxu0 %v2665_v27  ;;  %1334 = vmatpush.msra.mxu1 %v2776_v24 }
 0x331   :  { %1354 = vmatpush.msrb.mxu2 %v2669_v56  ;;  %1374 = vmatpush.msrb.mxu3 %v2780_v63 }
 0x332   :  { %1315 = vmatpush.msra.mxu0 %v2673_v58  ;;  %1335 = vmatpush.msra.mxu1 %v2784_v29 }
 0x333   :  { %1355 = vmatpush.msrb.mxu2 %v2677_v60  ;;  %1375 = vmatpush.msrb.mxu3 %v2788_v12 }
 0x334   :  { %1316 = vmatpush.msra.mxu0 %v2681_v21  ;;  %1336 = vmatpush.msra.mxu1 %v2792_v43 }
 0x335   :  { %1356 = vmatpush.msrb.mxu2 %v3251_v31  ;;  %1376 = vmatpush.msrb.mxu3 %v3252_v7 }
 0x336   :  { %1317 = vmatpush.msra.mxu0 %v3253_v20  ;;  %1337 = vmatpush.msra.mxu1 %v3254_v47 }
 0x337   :  { %1357 = vmatpush.msrb.mxu2 %v3255_v22  ;;  %1377 = vmatpush.msrb.mxu3 %v3256_v1 }
 0x338   :  { %1318 = vmatpush.msra.mxu0 %v3257_v26  ;;  %1338 = vmatpush.msra.mxu1 %v3258_v45  ;;  %v977_v26 = vld [vmem:[#allocation2 + $0x28] sm:$0x3] }
 0x339   :  { %1358 = vmatpush.msrb.mxu2 %v3259_v61  ;;  %1378 = vmatpush.msrb.mxu3 %v3260_v30 }
 0x33a   :  { %1319 = vmatpush.msra.mxu0 %v3261_v6  ;;  %1339 = vmatpush.msra.mxu1 %v3262_v52 }
 0x33b   :  { %1359 = vmatpush.msrb.mxu2 %v3263_v15  ;;  %1379 = vmatpush.msrb.mxu3 %v3264_v44  ;;  %v976_v44 = vld [vmem:[#allocation2 + $0x20] sm:$0x3] }
 0x33c   :  { %1320 = vmatpush.msra.mxu0 %v3265_v32  ;;  %1340 = vmatpush.msra.mxu1 %v3266_v28  ;;  %v3276_v32 = vld [vmem:[#allocation42_spill] sm:$0xff]  ;;  %v975_v28 = vld [vmem:[#allocation2 + $0x8] sm:$0x3] }
 0x33d   :  { %1360 = vmatpush.msrb.mxu2 %v3267_v9  ;;  %1380 = vmatpush.msrb.mxu3 %v3268_v49 }
 0x33e   :  { %1321 = vmatpush.msra.mxu0 %v3269_v41  ;;  %1341 = vmatpush.msra.mxu1 %v3270_v37 }
 0x33f   :  { %1361 = vmatpush.msrb.mxu2 %v3271_v36  ;;  %1381 = vmatpush.msrb.mxu3 %v3272_v11  ;;  %v978_v36 = vld [vmem:[#allocation2 + $0x38] sm:$0x3] }
 0x340   :  { %1322 = vmatpush.msra.mxu0 %v3273_v19  ;;  %1342 = vmatpush.msra.mxu1 %v3274_v10 }
 0x341   :  { %1362 = vmatpush.msrb.mxu2 %v3275_v39  ;;  %1382 = vmatpush.msrb.mxu3 %v3276_v32 }
 0x39d   :  { %v999_v9 = vpop.f32.mrf.mxu0  ;;  %v1019_v49 = vpop.f32.mrf.mxu1 }
 0x39e   :  { %v1062_v15 = vadd.f32 %v999_v9, %v975_v28  ;;  %v1063_v41 = vadd.f32 %v1019_v49, %v976_v44 }
 0x3a0   :  { %v1753_v52 = vmul.f32 -1.442695, %v1062_v15  ;;  %v1754_v37 = vmul.f32 -1.442695, %v1063_v41 }
 0x3a2   :  { %1839 = vpow2.f32 %v1753_v52 }
 0x3a3   :  { %1841 = vpow2.f32 %v1754_v37 }
 0x3a4   :  { %v1059_v11 = vpop.f32.mrf.mxu3  ;;  %v1039_v32 = vpop.f32.mrf.mxu2 }
 0x3a5   :  { %v1065_v6 = vadd.f32 %v1059_v11, %v978_v36  ;;  %v1064_v15 = vadd.f32 %v1039_v32, %v977_v26 }
 0x3a7   :  { %v1755_v19 = vmul.f32 -1.442695, %v1065_v6 }
 0x3a8   :  { %v1840_v30 = vpop.eup %1839 }
 0x3a9   :  { %v1842_v10 = vpop.eup %1841  ;;  %v1069_v61 = vadd.f32 1.0, %v1840_v30  ;;  %1843 = vpow2.f32 %v1755_v19 }
 0x3aa   :  { %v1088_v39 = vadd.f32 1.0, %v1842_v10 }
 0x3ab   :  { %1845 = vrcp.f32 %v1069_v61  ;;  %v1081_v6 = vand.u32 2147483648, %v1069_v61  ;;  %v1079_v11 = vand.u32 2147483647, %v1069_v61  ;;  %vm1075_vm2 = vweird.f32 %v1069_v61 }
 0x3ac   :  { %1847 = vrcp.f32 %v1088_v39  ;;  %v1100_v36 = vand.u32 2147483648, %v1088_v39  ;;  %v1098_v10 = vand.u32 2147483647, %v1088_v39  ;;  %vm1094_vm3 = vweird.f32 %v1088_v39 }
 0x3ad   :  { %v1082_v26 = vor.u32 1.1754944e-38, %v1081_v6  ;;  %vm1080_vm6 = vcmp.eq.f32.partialorder %v1079_v11, 8.507059e+37 }
 0x3ae   :  { %vm1099_vm7 = vcmp.eq.f32.partialorder %v1098_v10, 8.507059e+37 }
 0x3af   :  { %v1844_v45 = vpop.eup %1843 }
 0x3b0   :  { %v1108_v28 = vadd.f32 1.0, %v1844_v45 }
 0x3b1   :  { %v1846_v44 = vpop.eup %1845 }
 0x3b2   :  { %v1848_v9 = vpop.eup %1847  ;;  %v1071_v52 = vmul.f32 %v1846_v44, %v1069_v61  ;;  %1849 = vrcp.f32 %v1108_v28  ;;  %vm1076_vm0 = vweird.f32 %v1846_v44  ;;  %vm1114_vm9 = vweird.f32 %v1108_v28 }
 0x3b3   :  { %v1090_v49 = vmul.f32 %v1848_v9, %v1088_v39  ;;  %1851 = vtanh.f32 %v1064_v15  ;;  %vm1095_vm1 = vweird.f32 %v1848_v9  ;;  %vm1077_vm4 = vmor %vm1075_vm2, %vm1076_vm0  ;;  %v1125_v15 = vrot.slane %v2856_v46, 6 }
 0x3b4   :  { %v1072_v41 = vsub.f32 1.0, %v1071_v52  ;;  %vm1096_vm5 = vmor %vm1094_vm3, %vm1095_vm1  ;;  %v1101_v52 = vor.u32 1.1754944e-38, %v1100_v36  ;;  %v1120_v36 = vand.u32 2147483648, %v1108_v28 }
 0x3b5   :  { %v1091_v37 = vsub.f32 1.0, %v1090_v49 }
 0x3b6   :  { %v1073_v30 = vmul.f32 %v1846_v44, %v1072_v41 }
 0x3b7   :  { %v1092_v19 = vmul.f32 %v1848_v9, %v1091_v37 }
 0x3b8   :  { %v1850_v1 = vpop.eup %1849  ;;  %v1074_v22 = vadd.f32 %v1846_v44, %v1073_v30 }
 0x3b9   :  { %v1093_v45 = vadd.f32 %v1848_v9, %v1092_v19  ;;  %v1110_v32 = vmul.f32 %v1850_v1, %v1108_v28  ;;  %v1852_v41 = vpop.eup %1851  ;;  %vm1115_vm8 = vweird.f32 %v1850_v1 }
 0x3ba   :  { %v1078_v49 = vsel %vm1077_vm4, %v1846_v44, %v1074_v22  ;;  %v1118_v22 = vand.u32 2147483647, %v1108_v28  ;;  %vm1116_vm10 = vmor %vm1114_vm9, %vm1115_vm8  ;;  %v1121_v44 = vor.u32 1.1754944e-38, %v1120_v36 }
 0x3bb   :  { %v1083_v47 = vsel %vm1080_vm6, %v1082_v26, %v1078_v49  ;;  %v1097_v20 = vsel %vm1096_vm5, %v1848_v9, %v1093_v45  ;;  %v1111_v37 = vsub.f32 1.0, %v1110_v32 }
 0x3bc   :  { %v1102_v7 = vsel %vm1099_vm7, %v1101_v52, %v1097_v20  ;;  %v1128_v31 = vmul.f32 %v1852_v41, %v1083_v47  ;;  %vm1119_vm11 = vcmp.eq.f32.partialorder %v1118_v22, 8.507059e+37  ;;  %v1135_v52 = vld [vmem:[#allocation2 + $0x28] sm:$0xc] }
 0x3bd   :  { %v1127_v30 = vmul.f32 %v1125_v15, %v1102_v7  ;;  %v1112_v61 = vmul.f32 %v1850_v1, %v1111_v37 }
 0x3bf   :  { %v2924_v39 = vadd.f32 %v1128_v31, %v1127_v30  ;;  %v1113_v6 = vadd.f32 %v1850_v1, %v1112_v61  ;;  %v1136_v31 = vld [vmem:[#allocation2 + $0x38] sm:$0xc] }
 0x3c1   :  { %1853 = vtanh.f32 %v2924_v39  ;;  %v1117_v46 = vsel %vm1116_vm10, %v1850_v1, %v1113_v6 }
 0x3c2   :  { %v1122_v11 = vsel %vm1119_vm11, %v1121_v44, %v1117_v46 }
 0x3c7   :  { %v1854_v9 = vpop.eup %1853 }
 0x3c8   :  { %v1131_v19 = vmul.f32 %v1854_v9, %v1122_v11 }
 0x3ca   :  { %1132 = vst [vmem:[#allocation3 + $0x8] sm:$0x3] %v1131_v19  ;;  %1153 = vmatmul.f32.vlgmr.msrb.gmra.mxu0 %v1131_v19  ;;  %1173 = vmatmul.f32.vlgmr.msrb.gmra.mxu1 %v1131_v19 }
 0x3cb   :  { %1193 = vmatmul.f32.vlgmr.msra.gmra.mxu2 %v1131_v19  ;;  %1213 = vmatmul.f32.vlgmr.msra.gmra.mxu3 %v1131_v19 }
 0x3cc   :  { %1477 = vmatpush.msrb.mxu0 %v2595_v40  ;;  %1497 = vmatpush.msrb.mxu1 %v2734_v14  ;;  %v3277_v40 = vld [vmem:[#allocation26_spill] sm:$0xff] }
 0x3cd   :  { %1517 = vmatpush.msra.mxu2 %v2599_v25  ;;  %1537 = vmatpush.msra.mxu3 %v2602_v48  ;;  %v3278_v25 = vld [vmem:[#allocation19_spill] sm:$0xff]  ;;  %v3279_v48 = vld [vmem:[#allocation17_spill] sm:$0xff] }
 0x3ce   :  { %1478 = vmatpush.msrb.mxu0 %v2605_v5  ;;  %1498 = vmatpush.msrb.mxu1 %v2740_v4  ;;  %v3280_v5 = vld [vmem:[#allocation38_spill] sm:$0xff] }
 0x3cf   :  { %1518 = vmatpush.msra.mxu2 %v2609_v13  ;;  %1538 = vmatpush.msra.mxu3 %v2612_v23  ;;  %v3281_v13 = vld [vmem:[#allocation36_spill] sm:$0xff]  ;;  %v3282_v23 = vld [vmem:[#allocation25_spill] sm:$0xff] }
 0x3d0   :  { %1479 = vmatpush.msrb.mxu0 %v2615_v57  ;;  %1499 = vmatpush.msrb.mxu1 %v2746_v17  ;;  %v3283_v57 = vld [vmem:[#allocation23_spill] sm:$0xff] }
 0x3d1   :  { %1519 = vmatpush.msra.mxu2 %v2619_v33  ;;  %1539 = vmatpush.msra.mxu3 %v2622_v34  ;;  %v3284_v33 = vld [vmem:[#allocation32_spill] sm:$0xff] }
 0x3d2   :  { %1480 = vmatpush.msrb.mxu0 %v2625_v62  ;;  %1500 = vmatpush.msrb.mxu1 %v2752_v18  ;;  %v3285_v34 = vld [vmem:[#allocation28_spill] sm:$0xff] }
 0x3d3   :  { %1520 = vmatpush.msra.mxu2 %v2629_v38  ;;  %1540 = vmatpush.msra.mxu3 %v2632_v42  ;;  %v3286_v62 = vld [vmem:[#allocation20_spill] sm:$0xff]  ;;  %v3287_v38 = vld [vmem:[#allocation18_spill] sm:$0xff]  ;;  %v3288_v42 = vld [vmem:[#allocation39_spill] sm:$0xff] }
 0x3d4   :  { %1481 = vmatpush.msrb.mxu0 %v2635_v2  ;;  %1501 = vmatpush.msrb.mxu1 %v2758_v3  ;;  %v3289_v2 = vld [vmem:[#allocation27_spill] sm:$0xff]  ;;  %v1133_v3 = vld [vmem:[#allocation2 + $0x8] sm:$0xc] }
 0x3d5   :  { %1521 = vmatpush.msra.mxu2 %v2639_v50  ;;  %1541 = vmatpush.msra.mxu3 %v2642_v54  ;;  %v3290_v50 = vld [vmem:[#allocation33_spill] sm:$0xff] }
 0x3d6   :  { %1482 = vmatpush.msrb.mxu0 %v2645_v8  ;;  %1502 = vmatpush.msrb.mxu1 %v2764_v0  ;;  %v3291_v54 = vld [vmem:[#allocation37_spill] sm:$0xff]  ;;  %v1134_v0 = vld [vmem:[#allocation2 + $0x20] sm:$0xc] }
 0x3d7   :  { %1522 = vmatpush.msra.mxu2 %v2649_v35  ;;  %1542 = vmatpush.msra.mxu3 %v2652_v55  ;;  %v3292_v8 = vld [vmem:[#allocation21_spill] sm:$0xff]  ;;  %v3293_v35 = vld [vmem:[#allocation40_spill] sm:$0xff] }
 0x3d8   :  { %1483 = vmatpush.msrb.mxu0 %v2655_v16  ;;  %1503 = vmatpush.msrb.mxu1 %v2770_v51  ;;  %v3294_v55 = vld [vmem:[#allocation29_spill] sm:$0xff]  ;;  %v3295_v16 = vld [vmem:[#allocation24_spill] sm:$0xff] }
 0x3d9   :  { %1523 = vmatpush.msra.mxu2 %v2659_v59  ;;  %1543 = vmatpush.msra.mxu3 %v2662_v53  ;;  %v3296_v59 = vld [vmem:[#allocation34_spill] sm:$0xff] }
 0x3da   :  { %1484 = vmatpush.msrb.mxu0 %v2665_v27  ;;  %1504 = vmatpush.msrb.mxu1 %v2776_v24  ;;  %v3297_v53 = vld [vmem:[#allocation22_spill] sm:$0xff]  ;;  %v3298_v27 = vld [vmem:[#allocation41_spill] sm:$0xff] }
 0x3db   :  { %1524 = vmatpush.msra.mxu2 %v2669_v56  ;;  %1544 = vmatpush.msra.mxu3 %v2780_v63  ;;  %v3299_v56 = vld [vmem:[#allocation30_spill] sm:$0xff] }
 0x3dc   :  { %1485 = vmatpush.msrb.mxu0 %v2673_v58  ;;  %1505 = vmatpush.msrb.mxu1 %v2784_v29  ;;  %v3300_v58 = vld [vmem:[#allocation31_spill] sm:$0xff] }
 0x3dd   :  { %1525 = vmatpush.msra.mxu2 %v2677_v60  ;;  %1545 = vmatpush.msra.mxu3 %v2788_v12  ;;  %v3301_v60 = vld [vmem:[#allocation35_spill] sm:$0xff] }
 0x3de   :  { %1486 = vmatpush.msrb.mxu0 %v2681_v21  ;;  %1506 = vmatpush.msrb.mxu1 %v2792_v43  ;;  %v3302_v21 = vld [vmem:[#allocation42_spill] sm:$0xff] }
 0x3df   :  { %1526 = vmatpush.msra.mxu2 %v3277_v40  ;;  %1546 = vmatpush.msra.mxu3 %v3278_v25 }
 0x3e0   :  { %1487 = vmatpush.msrb.mxu0 %v3279_v48  ;;  %1507 = vmatpush.msrb.mxu1 %v3280_v5 }
 0x3e1   :  { %1527 = vmatpush.msra.mxu2 %v3281_v13  ;;  %1547 = vmatpush.msra.mxu3 %v3282_v23  ;;  %v1292_v23 = vrot.slane %v2924_v39, 6 }
 0x3e2   :  { %1488 = vmatpush.msrb.mxu0 %v3283_v57  ;;  %1508 = vmatpush.msrb.mxu1 %v3284_v33 }
 0x3e3   :  { %1528 = vmatpush.msra.mxu2 %v3285_v34  ;;  %1548 = vmatpush.msra.mxu3 %v3286_v62 }
 0x3e4   :  { %1489 = vmatpush.msrb.mxu0 %v3287_v38  ;;  %1509 = vmatpush.msrb.mxu1 %v3288_v42 }
 0x3e5   :  { %1529 = vmatpush.msra.mxu2 %v3289_v2  ;;  %1549 = vmatpush.msra.mxu3 %v3290_v50 }
 0x3e6   :  { %1490 = vmatpush.msrb.mxu0 %v3291_v54  ;;  %1510 = vmatpush.msrb.mxu1 %v3292_v8 }
 0x3e7   :  { %1530 = vmatpush.msra.mxu2 %v3293_v35  ;;  %1550 = vmatpush.msra.mxu3 %v3294_v55 }
 0x3e8   :  { %1491 = vmatpush.msrb.mxu0 %v3295_v16  ;;  %1511 = vmatpush.msrb.mxu1 %v3296_v59 }
 0x3e9   :  { %1531 = vmatpush.msra.mxu2 %v3297_v53  ;;  %1551 = vmatpush.msra.mxu3 %v3298_v27 }
 0x3ea   :  { %1492 = vmatpush.msrb.mxu0 %v3299_v56  ;;  %1512 = vmatpush.msrb.mxu1 %v3300_v58 }
 0x3eb   :  { %1532 = vmatpush.msra.mxu2 %v3301_v60  ;;  %1552 = vmatpush.msra.mxu3 %v3302_v21  ;;  %v1659_v21 = vld [vmem:[%s3072_s6 + $0x78] sm:$0xff] }
 0x447   :  { %v1154_v14 = vpop.f32.mrf.mxu0  ;;  %v1174_v4 = vpop.f32.mrf.mxu1 }
 0x448   :  { %v1221_v17 = vrot.slane %v1154_v14, 6  ;;  %v1222_v18 = vrot.slane %v1174_v4, 6  ;;  %v1658_v14 = vld [vmem:[%s3072_s6 + $0x70] sm:$0xff]  ;;  %v1657_v4 = vld [vmem:[%s3072_s6 + $0x68] sm:$0xff] }
 0x44a   :  { %v1229_v51 = vadd.f32 %v1221_v17, %v1133_v3  ;;  %v1230_v24 = vadd.f32 %v1222_v18, %v1134_v0  ;;  %v1656_v17 = vld [vmem:[%s3072_s6 + $0x60] sm:$0xff] }
 0x44c   :  { %v1756_v63 = vmul.f32 -1.442695, %v1229_v51  ;;  %v1757_v29 = vmul.f32 -1.442695, %v1230_v24  ;;  %v1655_v24 = vld [vmem:[%s3072_s6 + $0x58] sm:$0xff] }
 0x44e   :  { %1855 = vpow2.f32 %v1756_v63  ;;  %v1214_v12 = vpop.f32.mrf.mxu3  ;;  %v1194_v26 = vpop.f32.mrf.mxu2  ;;  %v1300_v63 = vld [vmem:[#allocation2 + $0x8] sm:$0x30] }
 0x44f   :  { %1857 = vpow2.f32 %v1757_v29  ;;  %v1224_v43 = vrot.slane %v1214_v12, 6  ;;  %v1223_v45 = vrot.slane %v1194_v26, 6  ;;  %v1301_v29 = vld [vmem:[#allocation2 + $0x20] sm:$0x30] }
 0x451   :  { %v1232_v7 = vadd.f32 %v1224_v43, %v1136_v31  ;;  %v1231_v41 = vadd.f32 %v1223_v45, %v1135_v52  ;;  %v1654_v31 = vld [vmem:[%s3072_s6 + $0x50] sm:$0xff]  ;;  %v1303_v45 = vld [vmem:[#allocation2 + $0x38] sm:$0x30] }
 0x453   :  { %v1758_v20 = vmul.f32 -1.442695, %v1232_v7 }
 0x454   :  { %v1856_v47 = vpop.eup %1855 }
 0x455   :  { %v1858_v1 = vpop.eup %1857  ;;  %v1236_v28 = vadd.f32 1.0, %v1856_v47  ;;  %1859 = vpow2.f32 %v1758_v20  ;;  %v1653_v47 = vld [vmem:[%s3072_s6 + $0x48] sm:$0xff] }
 0x456   :  { %v1255_v10 = vadd.f32 1.0, %v1858_v1  ;;  %v1652_v1 = vld [vmem:[%s3072_s6 + $0x40] sm:$0xff] }
 0x457   :  { %1861 = vrcp.f32 %v1236_v28  ;;  %v1248_v22 = vand.u32 2147483648, %v1236_v28  ;;  %v1246_v9 = vand.u32 2147483647, %v1236_v28  ;;  %vm1242_vm14 = vweird.f32 %v1236_v28 }
 0x458   :  { %1863 = vrcp.f32 %v1255_v10  ;;  %v1267_v46 = vand.u32 2147483648, %v1255_v10  ;;  %v1265_v19 = vand.u32 2147483647, %v1255_v10  ;;  %vm1261_vm15 = vweird.f32 %v1255_v10 }
 0x459   :  { %v1249_v48 = vor.u32 1.1754944e-38, %v1248_v22  ;;  %vm1247_vm2 = vcmp.eq.f32.partialorder %v1246_v9, 8.507059e+37 }
 0x45a   :  { %v1268_v57 = vor.u32 1.1754944e-38, %v1267_v46  ;;  %vm1266_vm3 = vcmp.eq.f32.partialorder %v1265_v19, 8.507059e+37  ;;  %v1647_v46 = vld [vmem:[%s3072_s6 + $0x18] sm:$0xff]  ;;  %v1302_v19 = vld [vmem:[#allocation2 + $0x28] sm:$0x30] }
 0x45b   :  { %v1860_v32 = vpop.eup %1859 }
 0x45c   :  { %v1275_v49 = vadd.f32 1.0, %v1860_v32  ;;  %v1650_v32 = vld [vmem:[%s3072_s6 + $0x30] sm:$0xff] }
 0x45d   :  { %v1862_v15 = vpop.eup %1861 }
 0x45e   :  { %v1864_v37 = vpop.eup %1863  ;;  %v1238_v30 = vmul.f32 %v1862_v15, %v1236_v28  ;;  %1865 = vrcp.f32 %v1275_v49  ;;  %vm1243_vm12 = vweird.f32 %v1862_v15  ;;  %v1287_v39 = vand.u32 2147483648, %v1275_v49 }
 0x45f   :  { %v1257_v61 = vmul.f32 %v1864_v37, %v1255_v10  ;;  %1867 = vtanh.f32 %v1231_v41  ;;  %vm1262_vm13 = vweird.f32 %v1864_v37  ;;  %vm1244_vm0 = vmor %vm1242_vm14, %vm1243_vm12  ;;  %vm1281_vm5 = vweird.f32 %v1275_v49  ;;  %v1651_v10 = vld [vmem:[%s3072_s6 + $0x38] sm:$0xff] }
 0x460   :  { %v1239_v6 = vsub.f32 1.0, %v1238_v30  ;;  %vm1263_vm1 = vmor %vm1261_vm15, %vm1262_vm13  ;;  %v1285_v16 = vand.u32 2147483647, %v1275_v49  ;;  %v1288_v53 = vor.u32 1.1754944e-38, %v1287_v39 }
 0x461   :  { %v1258_v36 = vsub.f32 1.0, %v1257_v61 }
 0x462   :  { %v1240_v44 = vmul.f32 %v1862_v15, %v1239_v6  ;;  %vm1286_vm7 = vcmp.eq.f32.partialorder %v1285_v16, 8.507059e+37 }
 0x463   :  { %v1259_v11 = vmul.f32 %v1864_v37, %v1258_v36 }
 0x464   :  { %v1866_v40 = vpop.eup %1865  ;;  %v1241_v25 = vadd.f32 %v1862_v15, %v1240_v44  ;;  %v1646_v44 = vld [vmem:[%s3072_s6 + $0x10] sm:$0xff] }
 0x465   :  { %v1260_v5 = vadd.f32 %v1864_v37, %v1259_v11  ;;  %v1277_v13 = vmul.f32 %v1866_v40, %v1275_v49  ;;  %v1868_v34 = vpop.eup %1867  ;;  %vm1282_vm4 = vweird.f32 %v1866_v40  ;;  %v1649_v49 = vld [vmem:[%s3072_s6 + $0x28] sm:$0xff] }
 0x466   :  { %v1245_v33 = vsel %vm1244_vm0, %v1862_v15, %v1241_v25  ;;  %vm1283_vm6 = vmor %vm1281_vm5, %vm1282_vm4  ;;  %v1645_v11 = vld [vmem:[%s3072_s6 + $0x8] sm:$0xff]  ;;  %vm1687_vm4 = vcmask 261120  }
 0x467   :  { %v1250_v62 = vsel %vm1247_vm2, %v1249_v48, %v1245_v33  ;;  %v1264_v38 = vsel %vm1263_vm1, %v1864_v37, %v1260_v5  ;;  %v1278_v42 = vsub.f32 1.0, %v1277_v13  ;;  %v1648_v37 = vld [vmem:[%s3072_s6 + $0x20] sm:$0xff] }
 0x468   :  { %v1269_v2 = vsel %vm1266_vm3, %v1268_v57, %v1264_v38  ;;  %v1295_v50 = vmul.f32 %v1868_v34, %v1250_v62  ;;  %v1644_v5 = vld [vmem:[%s3072_s6] sm:$0xff] }
 0x469   :  { %v1294_v54 = vmul.f32 %v1292_v23, %v1269_v2  ;;  %v1279_v8 = vmul.f32 %v1866_v40, %v1278_v42 }
 0x46b   :  { %v2992_v35 = vadd.f32 %v1295_v50, %v1294_v54  ;;  %v1280_v55 = vadd.f32 %v1866_v40, %v1279_v8 }
 0x46d   :  { %1869 = vtanh.f32 %v2992_v35  ;;  %v1284_v59 = vsel %vm1283_vm6, %v1866_v40, %v1280_v55 }
 0x46e   :  { %v1289_v56 = vsel %vm1286_vm7, %v1288_v53, %v1284_v59  ;;  %v1462_v53 = vrot.slane %v2992_v35, 6 }
 0x473   :  { %v1870_v27 = vpop.eup %1869 }
 0x474   :  { %v1298_v58 = vmul.f32 %v1870_v27, %v1289_v56 }
 0x476   :  { %1299 = vst [vmem:[#allocation3 + $0x8] sm:$0xc] %v1298_v58  ;;  %v1305_v60 = vrot.slane %v1298_v58, 2 }
 0x478   :  { %1323 = vmatmul.f32.vlgmr.msra.gmra.mxu0 %v1305_v60  ;;  %1343 = vmatmul.f32.vlgmr.msra.gmra.mxu1 %v1305_v60 }
 0x479   :  { %1363 = vmatmul.f32.vlgmr.msrb.gmra.mxu2 %v1305_v60  ;;  %1383 = vmatmul.f32.vlgmr.msrb.gmra.mxu3 %v1305_v60 }
 0x47a   :  { %1664 = vmatpush.msra.mxu0 %v1659_v21 }
 0x47c   :  { %1665 = vmatpush.msra.mxu0 %v1658_v14 }
 0x47e   :  { %1666 = vmatpush.msra.mxu0 %v1657_v4 }
 0x480   :  { %1667 = vmatpush.msra.mxu0 %v1656_v17 }
 0x482   :  { %1668 = vmatpush.msra.mxu0 %v1655_v24 }
 0x484   :  { %1669 = vmatpush.msra.mxu0 %v1654_v31 }
 0x486   :  { %1670 = vmatpush.msra.mxu0 %v1653_v47 }
 0x488   :  { %1671 = vmatpush.msra.mxu0 %v1652_v1 }
 0x48a   :  { %1672 = vmatpush.msra.mxu0 %v1651_v10 }
 0x48c   :  { %1673 = vmatpush.msra.mxu0 %v1650_v32 }
 0x48e   :  { %1674 = vmatpush.msra.mxu0 %v1649_v49 }
 0x490   :  { %1675 = vmatpush.msra.mxu0 %v1648_v37 }
 0x492   :  { %1676 = vmatpush.msra.mxu0 %v1647_v46 }
 0x494   :  { %1677 = vmatpush.msra.mxu0 %v1646_v44 }
 0x496   :  { %1678 = vmatpush.msra.mxu0 %v1645_v11 }
 0x498   :  { %1679 = vmatpush.msra.mxu0 %v1644_v5  ;;  %v1472_v5 = vld [vmem:[#allocation2 + $0x28] sm:$0xc0] }
 0x4f5   :  { %v1324_v18 = vpop.f32.mrf.mxu0  ;;  %v1344_v3 = vpop.f32.mrf.mxu1 }
 0x4f6   :  { %v1391_v0 = vrot.slane %v1324_v18, 4  ;;  %v1392_v51 = vrot.slane %v1344_v3, 4 }
 0x4f8   :  { %v1399_v12 = vadd.f32 %v1391_v0, %v1300_v63  ;;  %v1400_v43 = vadd.f32 %v1392_v51, %v1301_v29 }
 0x4fa   :  { %v1759_v7 = vmul.f32 -1.442695, %v1399_v12  ;;  %v1760_v20 = vmul.f32 -1.442695, %v1400_v43 }
 0x4fc   :  { %1871 = vpow2.f32 %v1759_v7  ;;  %v1384_v28 = vpop.f32.mrf.mxu3  ;;  %v1364_v36 = vpop.f32.mrf.mxu2 }
 0x4fd   :  { %1873 = vpow2.f32 %v1760_v20  ;;  %v1394_v26 = vrot.slane %v1384_v28, 4  ;;  %v1393_v22 = vrot.slane %v1364_v36, 4  ;;  %v1642_v20 = vld [vmem:[#allocation3] sm:$0xff] }
 0x4ff   :  { %v1402_v52 = vadd.f32 %v1394_v26, %v1303_v45  ;;  %v1401_v48 = vadd.f32 %v1393_v22, %v1302_v19  ;;  %v1470_v26 = vld [vmem:[#allocation2 + $0x8] sm:$0xc0]  ;;  %v1471_v45 = vld [vmem:[#allocation2 + $0x20] sm:$0xc0] }
 0x501   :  { %v1761_v15 = vmul.f32 -1.442695, %v1402_v52 }
 0x502   :  { %v1872_v41 = vpop.eup %1871 }
 0x503   :  { %v1874_v30 = vpop.eup %1873  ;;  %v1406_v61 = vadd.f32 1.0, %v1872_v41  ;;  %1875 = vpow2.f32 %v1761_v15  ;;  %v3050_v41 = vld [vmem:[%s3073_s7] ss:$0 sm:$0xff]  ;;  %s2099_s7 = smov [#allocation10]  }
 0x504   :  { %v1425_v6 = vadd.f32 1.0, %v1874_v30  ;;  %s1708_s16 = sshll.u32 %s2099_s7, 4  ;;  %s1709_s16 = int_to_ptr.vmem [resolvable:$true] %s1708_s16 }
 0x505   :  { %1877 = vrcp.f32 %v1406_v61  ;;  %v1418_v62 = vand.u32 2147483648, %v1406_v61  ;;  %v1416_v2 = vand.u32 2147483647, %v1406_v61  ;;  %vm1412_vm10 = vweird.f32 %v1406_v61 }
 0x506   :  { %1879 = vrcp.f32 %v1425_v6  ;;  %v1437_v38 = vand.u32 2147483648, %v1425_v6  ;;  %v1435_v54 = vand.u32 2147483647, %v1425_v6  ;;  %vm1431_vm11 = vweird.f32 %v1425_v6 }
 0x507   :  { %v1419_v39 = vor.u32 1.1754944e-38, %v1418_v62  ;;  %vm1417_vm14 = vcmp.eq.f32.partialorder %v1416_v2, 8.507059e+37 }
 0x508   :  { %v1438_v27 = vor.u32 1.1754944e-38, %v1437_v38  ;;  %vm1436_vm15 = vcmp.eq.f32.partialorder %v1435_v54, 8.507059e+37 }
 0x509   :  { %v1876_v9 = vpop.eup %1875 }
 0x50a   :  { %v1445_v40 = vadd.f32 1.0, %v1876_v9 }
 0x50b   :  { %v1878_v25 = vpop.eup %1877 }
 0x50c   :  { %v1880_v13 = vpop.eup %1879  ;;  %v1408_v23 = vmul.f32 %v1878_v25, %v1406_v61  ;;  %1881 = vrcp.f32 %v1445_v40  ;;  %vm1413_vm8 = vweird.f32 %v1878_v25  ;;  %v1457_v35 = vand.u32 2147483648, %v1445_v40 }
 0x50d   :  { %v1427_v57 = vmul.f32 %v1880_v13, %v1425_v6  ;;  %1883 = vtanh.f32 %v1401_v48  ;;  %vm1432_vm9 = vweird.f32 %v1880_v13  ;;  %vm1414_vm12 = vmor %vm1412_vm10, %vm1413_vm8  ;;  %vm1451_vm1 = vweird.f32 %v1445_v40  ;;  %v1473_v6 = vld [vmem:[#allocation2 + $0x38] sm:$0xc0] }
 0x50e   :  { %v1409_v33 = vsub.f32 1.0, %v1408_v23  ;;  %vm1433_vm13 = vmor %vm1431_vm11, %vm1432_vm9  ;;  %v1455_v24 = vand.u32 2147483647, %v1445_v40  ;;  %v1458_v29 = vor.u32 1.1754944e-38, %v1457_v35 }
 0x50f   :  { %v1428_v34 = vsub.f32 1.0, %v1427_v57 }
 0x510   :  { %v1410_v42 = vmul.f32 %v1878_v25, %v1409_v33  ;;  %vm1456_vm3 = vcmp.eq.f32.partialorder %v1455_v24, 8.507059e+37 }
 0x511   :  { %v1429_v50 = vmul.f32 %v1880_v13, %v1428_v34 }
 0x512   :  { %v1882_v8 = vpop.eup %1881  ;;  %v1411_v55 = vadd.f32 %v1878_v25, %v1410_v42 }
 0x513   :  { %v1430_v16 = vadd.f32 %v1880_v13, %v1429_v50  ;;  %v1447_v59 = vmul.f32 %v1882_v8, %v1445_v40  ;;  %v1884_v58 = vpop.eup %1883  ;;  %vm1452_vm0 = vweird.f32 %v1882_v8 }
 0x514   :  { %v1415_v56 = vsel %vm1414_vm12, %v1878_v25, %v1411_v55  ;;  %vm1453_vm2 = vmor %vm1451_vm1, %vm1452_vm0 }
 0x515   :  { %v1420_v60 = vsel %vm1417_vm14, %v1419_v39, %v1415_v56  ;;  %v1434_v21 = vsel %vm1433_vm13, %v1880_v13, %v1430_v16  ;;  %v1448_v14 = vsub.f32 1.0, %v1447_v59 }
 0x516   :  { %v1439_v4 = vsel %vm1436_vm15, %v1438_v27, %v1434_v21  ;;  %v1465_v17 = vmul.f32 %v1884_v58, %v1420_v60 }
 0x517   :  { %v1464_v18 = vmul.f32 %v1462_v53, %v1439_v4  ;;  %v1449_v3 = vmul.f32 %v1882_v8, %v1448_v14 }
 0x519   :  { %v3044_v0 = vadd.f32 %v1465_v17, %v1464_v18  ;;  %v1450_v51 = vadd.f32 %v1882_v8, %v1449_v3 }
 0x51b   :  { %1885 = vtanh.f32 %v3044_v0  ;;  %v1454_v63 = vsel %vm1453_vm2, %v1882_v8, %v1450_v51  ;;  %v1632_v58 = vrot.slane %v3044_v0, 6 }
 0x51c   :  { %v1459_v43 = vsel %vm1456_vm3, %v1458_v29, %v1454_v63 }
 0x521   :  { %v1886_v12 = vpop.eup %1885 }
 0x522   :  { %v1468_v31 = vmul.f32 %v1886_v12, %v1459_v43 }
 0x524   :  { %1469 = vst [vmem:[#allocation3 + $0x8] sm:$0x30] %v1468_v31  ;;  %v1475_v7 = vrot.slane %v1468_v31, 4 }
 0x526   :  { %1493 = vmatmul.f32.vlgmr.msrb.gmra.mxu0 %v1475_v7  ;;  %1513 = vmatmul.f32.vlgmr.msrb.gmra.mxu1 %v1475_v7 }
 0x527   :  { %1533 = vmatmul.f32.vlgmr.msra.gmra.mxu2 %v1475_v7  ;;  %1553 = vmatmul.f32.vlgmr.msra.gmra.mxu3 %v1475_v7 }
 0x52e   :  { %1680 = vmatmul.f32.vlgmr.msra.gmra.mxu0 %v1642_v20 }
 0x5a3   :  { %v1494_v47 = vpop.f32.mrf.mxu0  ;;  %v1514_v1 = vpop.f32.mrf.mxu1 }
 0x5a4   :  { %v1561_v28 = vrot.slane %v1494_v47, 2  ;;  %v1562_v10 = vrot.slane %v1514_v1, 2 }
 0x5a6   :  { %v1569_v32 = vadd.f32 %v1561_v28, %v1470_v26  ;;  %v1570_v52 = vadd.f32 %v1562_v10, %v1471_v45 }
 0x5a8   :  { %v1762_v49 = vmul.f32 -1.442695, %v1569_v32  ;;  %v1763_v15 = vmul.f32 -1.442695, %v1570_v52 }
 0x5aa   :  { %1887 = vpow2.f32 %v1762_v49  ;;  %v1554_v37 = vpop.f32.mrf.mxu3  ;;  %v1534_v40 = vpop.f32.mrf.mxu2 }
 0x5ab   :  { %1889 = vpow2.f32 %v1763_v15  ;;  %v1564_v30 = vrot.slane %v1554_v37, 2  ;;  %v1681_v61 = vpop.f32.mrf.mxu0  ;;  %v1563_v25 = vrot.slane %v1534_v40, 2 }
 0x5ac   :  { %v1682_v36 = vadd.f32 %v3050_v41, %v1681_v61 }
 0x5ad   :  { %v1572_v22 = vadd.f32 %v1564_v30, %v1473_v6  ;;  %v1571_v57 = vadd.f32 %v1563_v25, %v1472_v5 }
 0x5ae   :  { %1688 = vst.msk [vmem:[#allocation9] sm:$0xff] %vm1687_vm4, %v1682_v36 }
 0x5af   :  { %v1764_v46 = vmul.f32 -1.442695, %v1572_v22 }
 0x5b0   :  { %v1888_v44 = vpop.eup %1887 }
 0x5b1   :  { %v1890_v9 = vpop.eup %1889  ;;  %v1576_v11 = vadd.f32 1.0, %v1888_v44  ;;  %1891 = vpow2.f32 %v1764_v46 }
 0x5b2   :  { %v1595_v19 = vadd.f32 1.0, %v1890_v9 }
 0x5b3   :  { %1893 = vrcp.f32 %v1576_v11  ;;  %v1588_v2 = vand.u32 2147483648, %v1576_v11  ;;  %v1586_v8 = vand.u32 2147483647, %v1576_v11  ;;  %vm1582_vm7 = vweird.f32 %v1576_v11 }
 0x5b4   :  { %1895 = vrcp.f32 %v1595_v19  ;;  %v1607_v50 = vand.u32 2147483648, %v1595_v19  ;;  %v1605_v39 = vand.u32 2147483647, %v1595_v19  ;;  %vm1601_vm8 = vweird.f32 %v1595_v19 }
 0x5b5   :  { %v1589_v53 = vor.u32 1.1754944e-38, %v1588_v2  ;;  %vm1587_vm11 = vcmp.eq.f32.partialorder %v1586_v8, 8.507059e+37 }
 0x5b6   :  { %v1608_v60 = vor.u32 1.1754944e-38, %v1607_v50  ;;  %vm1606_vm12 = vcmp.eq.f32.partialorder %v1605_v39, 8.507059e+37 }
 0x5b7   :  { %v1892_v48 = vpop.eup %1891 }
 0x5b8   :  { %v1615_v13 = vadd.f32 1.0, %v1892_v48 }
 0x5b9   :  { %v1894_v23 = vpop.eup %1893 }
 0x5ba   :  { %v1896_v33 = vpop.eup %1895  ;;  %v1578_v34 = vmul.f32 %v1894_v23, %v1576_v11  ;;  %1897 = vrcp.f32 %v1615_v13  ;;  %vm1583_vm5 = vweird.f32 %v1894_v23  ;;  %v1627_v12 = vand.u32 2147483648, %v1615_v13 }
 0x5bb   :  { %v1597_v62 = vmul.f32 %v1896_v33, %v1595_v19  ;;  %1899 = vtanh.f32 %v1571_v57  ;;  %vm1602_vm6 = vweird.f32 %v1896_v33  ;;  %vm1584_vm9 = vmor %vm1582_vm7, %vm1583_vm5  ;;  %vm1621_vm14 = vweird.f32 %v1615_v13 }
 0x5bc   :  { %v1579_v38 = vsub.f32 1.0, %v1578_v34  ;;  %vm1603_vm10 = vmor %vm1601_vm8, %vm1602_vm6  ;;  %v1625_v0 = vand.u32 2147483647, %v1615_v13  ;;  %v1628_v31 = vor.u32 1.1754944e-38, %v1627_v12 }
 0x5bd   :  { %v1598_v42 = vsub.f32 1.0, %v1597_v62 }
 0x5be   :  { %v1580_v54 = vmul.f32 %v1894_v23, %v1579_v38  ;;  %vm1626_vm0 = vcmp.eq.f32.partialorder %v1625_v0, 8.507059e+37 }
 0x5bf   :  { %v1599_v55 = vmul.f32 %v1896_v33, %v1598_v42 }
 0x5c0   :  { %v1898_v16 = vpop.eup %1897  ;;  %v1581_v59 = vadd.f32 %v1894_v23, %v1580_v54 }
 0x5c1   :  { %v1600_v27 = vadd.f32 %v1896_v33, %v1599_v55  ;;  %v1617_v56 = vmul.f32 %v1898_v16, %v1615_v13  ;;  %v1900_v14 = vpop.eup %1899  ;;  %vm1622_vm13 = vweird.f32 %v1898_v16 }
 0x5c2   :  { %v1585_v21 = vsel %vm1584_vm9, %v1894_v23, %v1581_v59  ;;  %vm1623_vm15 = vmor %vm1621_vm14, %vm1622_vm13 }
 0x5c3   :  { %v1590_v4 = vsel %vm1587_vm11, %v1589_v53, %v1585_v21  ;;  %v1604_v17 = vsel %vm1603_vm10, %v1896_v33, %v1600_v27  ;;  %v1618_v18 = vsub.f32 1.0, %v1617_v56 }
 0x5c4   :  { %v1609_v3 = vsel %vm1606_vm12, %v1608_v60, %v1604_v17  ;;  %v1635_v51 = vmul.f32 %v1900_v14, %v1590_v4 }
 0x5c5   :  { %v1634_v35 = vmul.f32 %v1632_v58, %v1609_v3  ;;  %v1619_v24 = vmul.f32 %v1898_v16, %v1618_v18 }
 0x5c7   :  { %v1636_v63 = vadd.f32 %v1635_v51, %v1634_v35  ;;  %v1620_v29 = vadd.f32 %v1898_v16, %v1619_v24 }
 0x5c9   :  { %1901 = vtanh.f32 %v1636_v63  ;;  %1641 = vst [vmem:[#allocation12 - $0x6] sm:$0xc0] %v1636_v63  ;;  %v1624_v43 = vsel %vm1623_vm15, %v1898_v16, %v1620_v29 }
 0x5ca   :  { %v1629_v20 = vsel %vm1626_vm0, %v1628_v31, %v1624_v43 }
 0x5cf   :  { %v1902_v7 = vpop.eup %1901 }
 0x5d0   :  { %v1638_v47 = vmul.f32 %v1902_v7, %v1629_v20 }
 0x5d2   :  { %1639 = vst [vmem:[#allocation3 + $0x8] sm:$0xc0] %v1638_v47 }
 0x5d3   :  { %1640 = vst [vmem:[#allocation10 - $0x6] sm:$0xc0] %v1638_v47 }
 0x5d4   :  { %1713 = dma.vmem_to_hbm [thread:$0]  %s1709_s16, 32, %s1711_s19, [#allocation11]  }
 0x5d5   :  { %1724 = dma.vmem_to_hbm [thread:$0]  %s1720_s21, 32, %s1722_s24, [#allocation11]  }
 0x5d9   :  { %v1643_v1 = vld [vmem:[#allocation3 + $0x8] sm:$0xff] }
 0x5da   :  { %1683 = vmatmul.f32.gmra.mxu0 %v1643_v1 }
 0x657   :  { %v1684_v28 = vpop.f32.mrf.mxu0 }
 0x658   :  { %v1685_v10 = vadd.f32 %v3050_v41, %v1684_v28 }
 0x65a   :  { %1689 = vst.msk [vmem:[#allocation9 + $0x8] sm:$0xff] %vm1687_vm4, %v1685_v10 }
 0x65b   :  { %1702 = dma.vmem_to_hbm [thread:$0]  %s1695_s5, 256, %s1697_s1, [#allocation6], %s2102_s9, %s2102_s9, %s2103_s27  }
 0x65c   :  { %2091 = dma.done.wait [#allocation6], 256  }
 0x65d   :  { %2092 = vsyncadd [#allocation6], 4294967040 }
 0x65e   :  { %2093 = dma.done.wait [#allocation11], 64  }
 0x65f   :  { %2094 = vsyncadd [#allocation11], 4294967232 }
 0x660   :  { %1737 = vsyncpa [#allocation5], 1 }
 0x661   :  { %1738 = vsyncpa [#allocation8], 1 }
 0x662   :  { %1739 = vsyncpa [#allocation6], 1 }
 0x663   :  { %1740 = vsyncpa [#allocation11], 1 }

</bundles_post_ra>
